<compile_context>
chip_gen: v5e
topology: v5e:2x2
jax: 0.10.0
libtpu: 0.0.40
codegen_flags: <defaults>
</compile_context>

<pallas_src>
import functools

import jax
import jax.numpy as jnp
from jax import lax
from jax.experimental import pallas as pl
from jax.experimental.pallas import tpu as pltpu

_LANE = 128
_VMEM_LIMIT = 32 * 1024 * 1024          # safe scoped-VMEM budget on v5e/v6e/v7x
_AFFINE_BLOCK_ELEMS = 1 << 19           # ~1 MiB bf16 per affine block


def _round_up(x, m):
    return ((x + m - 1) // m) * m


# ---------------------------------------------------------------------------
# Pallas kernels
# ---------------------------------------------------------------------------

def _conv_row_kernel(*refs, n_phase, kw, stride, ow, negative_slope,
                     with_bias, with_stats):
    """Direct KHxKW conv for one (sample, output-row) over the KH-tap grid axis.

    refs = phase_rows[n_phase], w, [bias], y_out, [psum, pssq], acc_scratch
      phase_rows[p]: (1, 1, Wp_p, Cin)   one padded input row, column phase p
      w:             (KH*KW, Cin, Cout)  full weight, VMEM resident (const index)
      bias:          (1, Cout) f32
      y_out:         (1, 1, OW, Cout)
      psum/pssq:     (1, 1, 1, Cout) f32 per-row partial BatchNorm stats
      acc_scratch:   (OW, Cout) f32
    """
    x_refs = refs[:n_phase]
    w_ref = refs[n_phase]
    pos = n_phase + 1
    if with_bias:
        b_ref = refs[pos]
        pos += 1
    o_ref = refs[pos]
    pos += 1
    if with_stats:
        sum_ref, ssq_ref = refs[pos], refs[pos + 1]
        pos += 2
    acc_ref = refs[-1]

    i = pl.program_id(2)                       # kernel-row tap 0..KH-1

    @pl.when(i == 0)
    def _init():
        acc_ref[...] = jnp.zeros_like(acc_ref)

    # KW column taps, unrolled. Tap j reads column phase (j % stride) at the
    # contiguous offset j // stride, so no strided in-kernel loads are needed.
    for j in range(kw):
        x = x_refs[j % stride][0, 0, pl.ds(j // stride, ow), :]   # (OW, Cin)
        w = w_ref[i * kw + j]                                     # (Cin, Cout)
        acc_ref[...] += jnp.dot(x, w, preferred_element_type=jnp.float32)

    @pl.when(i == pl.num_programs(2) - 1)
    def _finalize():
        y = acc_ref[...]
        if with_stats:
            # Per-output-row partial batch stats straight from the f32 acc.
            sum_ref[0, 0] = jnp.sum(y, axis=0, keepdims=True)
            ssq_ref[0, 0] = jnp.sum(y * y, axis=0, keepdims=True)
        if with_bias:
            y = y + b_ref[...]
        if negative_slope is not None:
            y = jnp.where(y >= 0, y, negative_slope * y)
        o_ref[0, 0] = y.astype(o_ref.dtype)


def _affine_lrelu_kernel(x_ref, scale_ref, shift_ref, o_ref):
    """Per-channel affine (BatchNorm with precomputed scale/shift) + LeakyReLU(0.2)."""
    y = x_ref[...].astype(jnp.float32) * scale_ref[...] + shift_ref[...]
    o_ref[...] = jnp.where(y >= 0, y, 0.2 * y).astype(o_ref.dtype)


# ---------------------------------------------------------------------------
# Pallas wrappers
# ---------------------------------------------------------------------------

def _conv_layer(x_nhwc, w3, bias, *, stride, out_dtype, negative_slope,
                with_stats):
    """Direct 4x4 conv (padding=1) of NHWC bf16 input with a VMEM-resident weight."""
    n, h, wdt, cin = x_nhwc.shape
    khkw, cin_w, cout = w3.shape
    kw = 4
    kh = khkw // kw
    assert cin_w == cin

    # Spatial zero pad (padding=1): ~1x-input copy; no 4-16x patch matrix in HBM.
    xp = jnp.pad(x_nhwc, ((0, 0), (1, 1), (1, 1), (0, 0)))
    hp, wp = h + 2, wdt + 2
    oh = (hp - kh) // stride + 1
    ow = (wp - kw) // stride + 1
    # Column-phase split for stride 2 so all in-kernel tap reads are contiguous.
    # TODO(synk): a manual-DMA direct conv could fold the pad/phase-split (and
    # per-generation buffer depth, e.g. Buffered(3) on v5e) into the kernel too.
    phases = [xp] if stride == 1 else [xp[:, :, p::stride, :] for p in range(stride)]

    in_specs = []
    operands = []
    for ph in phases:
        in_specs.append(pl.BlockSpec(
            (1, 1, ph.shape[2], cin),
            lambda b, oy, i: (b, oy * stride + i, 0, 0)))
        operands.append(ph)
    # Full weight resident in VMEM (constant index map): fetched once per layer.
    in_specs.append(pl.BlockSpec((khkw, cin, cout), lambda b, oy, i: (0, 0, 0)))
    operands.append(w3)
    if bias is not None:
        in_specs.append(pl.BlockSpec((1, cout), lambda b, oy, i: (0, 0)))
        operands.append(bias)

    y_sds = jax.ShapeDtypeStruct((n, oh, ow, cout), out_dtype)
    y_spec = pl.BlockSpec((1, 1, ow, cout), lambda b, oy, i: (b, oy, 0, 0))
    if with_stats:
        s_sds = jax.ShapeDtypeStruct((n, oh, 1, cout), jnp.float32)
        s_spec = pl.BlockSpec((1, 1, 1, cout), lambda b, oy, i: (b, oy, 0, 0))
        out_shape = (y_sds, s_sds, s_sds)
        out_specs = (y_spec, s_spec, s_spec)
    else:
        out_shape = y_sds
        out_specs = y_spec

    kernel = functools.partial(
        _conv_row_kernel, n_phase=len(phases), kw=kw, stride=stride, ow=ow,
        negative_slope=negative_slope, with_bias=bias is not None,
        with_stats=with_stats)

    return pl.pallas_call(
        kernel,
        out_shape=out_shape,
        grid_spec=pltpu.PrefetchScalarGridSpec(
            num_scalar_prefetch=0,
            grid=(n, oh, kh),
            in_specs=in_specs,
            out_specs=out_specs,
            scratch_shapes=[pltpu.VMEM((ow, cout), jnp.float32)],
        ),
        compiler_params=pltpu.CompilerParams(
            dimension_semantics=("parallel", "parallel", "arbitrary"),
            vmem_limit_bytes=_VMEM_LIMIT,
        ),
    )(*operands)


def _affine_lrelu(y, scale, shift):
    n, oh, ow, c = y.shape
    r = max(1, min(oh, _AFFINE_BLOCK_ELEMS // max(1, ow * c)))
    return pl.pallas_call(
        _affine_lrelu_kernel,
        out_shape=jax.ShapeDtypeStruct(y.shape, y.dtype),
        grid_spec=pltpu.PrefetchScalarGridSpec(
            num_scalar_prefetch=0,
            grid=(n, pl.cdiv(oh, r)),
            in_specs=[
                pl.BlockSpec((1, r, ow, c), lambda b, t: (b, t, 0, 0)),
                pl.BlockSpec((1, 1, 1, c), lambda b, t: (0, 0, 0, 0)),
                pl.BlockSpec((1, 1, 1, c), lambda b, t: (0, 0, 0, 0)),
            ],
            out_specs=pl.BlockSpec((1, r, ow, c), lambda b, t: (b, t, 0, 0)),
        ),
        compiler_params=pltpu.CompilerParams(
            dimension_semantics=("parallel", "parallel"),
            vmem_limit_bytes=_VMEM_LIMIT,
        ),
    )(y, scale, shift)


# ---------------------------------------------------------------------------
# Per-layer forward (weight prep / BN scale-shift math is tiny plain-JAX glue)
# ---------------------------------------------------------------------------

def _layer_forward(x_nhwc, cfg, p):
    w = p["w"]                                   # [Cout, Cin, KH, KW] f32
    cout, cin, kh, kw = w.shape
    cin_pad = x_nhwc.shape[-1]                   # incoming activation channel pad
    cout_pad = _round_up(cout, _LANE)            # lane-dense output stores

    # [Cout, Cin, KH, KW] -> [KH, KW, Cin, Cout] -> pad -> [KH*KW, Cin_pad, Cout_pad]
    w4 = jnp.transpose(w, (2, 3, 1, 0))
    w4 = jnp.pad(w4, ((0, 0), (0, 0), (0, cin_pad - cin), (0, cout_pad - cout)))
    w3 = w4.reshape(kh * kw, cin_pad, cout_pad).astype(jnp.bfloat16)

    bias = None
    if cfg["bias"]:
        bias = jnp.pad(p["b"], (0, cout_pad - cout)).reshape(1, cout_pad)
        bias = bias.astype(jnp.float32)

    if cfg["bn"]:
        # Fused batch stats assume no bias on BN layers (true with BatchNorm2d).
        assert not cfg["bias"]
        y, psum, pssq = _conv_layer(
            x_nhwc, w3, None, stride=cfg["stride"], out_dtype=jnp.bfloat16,
            negative_slope=None, with_stats=True)
        n, oh, ow, _ = y.shape
        m = float(n * oh * ow)
        # TODO(synk): E[x^2]-mean^2 in f32 can cancel when |mean| >> std; switch
        # to a shifted/Welford reduction if exact BatchNorm parity is required.
        mean = jnp.sum(psum, axis=(0, 1, 2)) / m
        var = jnp.maximum(jnp.sum(pssq, axis=(0, 1, 2)) / m - mean * mean, 0.0)
        inv_std = lax.rsqrt(var + 1e-5)                      # PyTorch BN eps
        gamma = jnp.pad(p["gamma"], (0, cout_pad - cout))    # zero pad -> padded
        beta = jnp.pad(p["beta"], (0, cout_pad - cout))      # channels stay zero
        scale = (gamma * inv_std).reshape(1, 1, 1, cout_pad)
        shift = (beta - mean * gamma * inv_std).reshape(1, 1, 1, cout_pad)
        y = _affine_lrelu(y, scale, shift)
    else:
        slope = 0.2 if cfg["lrelu"] else None
        out_dtype = jnp.bfloat16 if cfg["lrelu"] else jnp.float32   # head stays f32
        y = _conv_layer(x_nhwc, w3, bias, stride=cfg["stride"],
                        out_dtype=out_dtype, negative_slope=slope,
                        with_stats=False)
    return y


# ---------------------------------------------------------------------------
# Model: layer config, parameters, forward
# ---------------------------------------------------------------------------

def build_layer_cfg(input_nc, ndf=64, n_layers=3):
    layers = [dict(cin=input_nc, cout=ndf, stride=2, bias=True, bn=False, lrelu=True)]
    nf_mult = 1
    for n in range(1, n_layers):
        nf_mult_prev, nf_mult = nf_mult, min(2 ** n, 8)
        layers.append(dict(cin=ndf * nf_mult_prev, cout=ndf * nf_mult,
                           stride=2, bias=False, bn=True, lrelu=True))
    nf_mult_prev, nf_mult = nf_mult, min(2 ** n_layers, 8)
    layers.append(dict(cin=ndf * nf_mult_prev, cout=ndf * nf_mult,
                       stride=1, bias=False, bn=True, lrelu=True))
    layers.append(dict(cin=ndf * nf_mult, cout=1,
                       stride=1, bias=True, bn=False, lrelu=False))
    return layers


def init_params(key, layer_cfg, kw=4):
    params = []
    for cfg in layer_cfg:
        key, k_w, k_b = jax.random.split(key, 3)
        p = {"w": 0.05 * jax.random.normal(
            k_w, (cfg["cout"], cfg["cin"], kw, kw), dtype=jnp.float32)}
        if cfg["bias"]:
            p["b"] = 0.01 * jax.random.normal(k_b, (cfg["cout"],), dtype=jnp.float32)
        if cfg["bn"]:
            p["gamma"] = jnp.ones((cfg["cout"],), dtype=jnp.float32)
            p["beta"] = jnp.zeros((cfg["cout"],), dtype=jnp.float32)
        params.append(p)
    return params


def nlayer_discriminator_forward(x_nchw, layer_cfg, params):
    x = jnp.transpose(x_nchw, (0, 2, 3, 1))                       # NCHW -> NHWC
    cin = x.shape[-1]
    x = jnp.pad(x, ((0, 0), (0, 0), (0, 0), (0, _round_up(cin, 8) - cin)))
    x = x.astype(jnp.bfloat16)
    for cfg, p in zip(layer_cfg, params):
        x = _layer_forward(x, cfg, p)
    x = x[..., :layer_cfg[-1]["cout"]].astype(jnp.float32)        # drop lane padding
    return jnp.transpose(x, (0, 3, 1, 2))                         # NHWC -> NCHW


# ---------------------------------------------------------------------------
# Main
# ---------------------------------------------------------------------------

if __name__ == "__main__":
    key = jax.random.PRNGKey(0)
    k_in, k_par = jax.random.split(key)

    # Small deterministic example. 32x32 is the smallest "nice" spatial size:
    # 16x16 would give a zero-sized map at the final stride-1 conv, which the
    # PyTorch reference itself rejects.
    batch, input_nc, H, W = 2, 4, 32, 32
    ndf, n_layers = 8, 3

    x = jax.random.normal(k_in, (batch, input_nc, H, W), dtype=jnp.float32)
    layer_cfg = build_layer_cfg(input_nc, ndf=ndf, n_layers=n_layers)
    params = init_params(k_par, layer_cfg)

    fwd = jax.jit(lambda inp, prm: nlayer_discriminator_forward(inp, layer_cfg, prm))
    out = jax.block_until_ready(fwd(x, params))

    # PatchGAN logit map: 32 -> 16 -> 8 -> 4 -> 3 -> 2 spatially.
    assert out.shape == (batch, 1, 2, 2), out.shape
    assert out.dtype == jnp.float32
    assert bool(jnp.isfinite(out).all())
    print("KERNEL_OK")
</pallas_src>

<mosaic_0001>
module attributes {stable_mosaic.version = 11 : i64} {
  func.func @_conv_row_kernel(%arg0: i32, %arg1: i32, %arg2: i32, %arg3: memref<1x1x17x8xbf16, #tpu.memory_space<vmem>>, %arg4: memref<1x1x17x8xbf16, #tpu.memory_space<vmem>>, %arg5: memref<16x8x128xbf16, #tpu.memory_space<vmem>>, %arg6: memref<1x128xf32, #tpu.memory_space<vmem>>, %arg7: memref<1x1x16x128xbf16, #tpu.memory_space<vmem>>, %arg8: memref<16x128xf32, #tpu.memory_space<vmem>>) attributes {dimension_semantics = [#tpu.dimension_semantics<parallel>, #tpu.dimension_semantics<parallel>, #tpu.dimension_semantics<arbitrary>], iteration_bounds = array<i64: 2, 16, 4>, scalar_prefetch = 0 : i64, scratch_operands = 1 : i64, tpu.core_type = #tpu.core_type<tc>, window_params = [{transform_indices = @transform_0, window_bounds = array<i64: 1, 1, 17, 8>}, {transform_indices = @transform_1, window_bounds = array<i64: 1, 1, 17, 8>}, {pipeline_mode = #tpu.pipeline_mode<synchronous>, transform_indices = @transform_2, window_bounds = array<i64: 16, 8, 128>}, {pipeline_mode = #tpu.pipeline_mode<synchronous>, transform_indices = @transform_3, window_bounds = array<i64: 1, 128>}, {transform_indices = @transform_4, window_bounds = array<i64: 1, 1, 16, 128>}]} {
    %c0_i32 = arith.constant 0 : i32
    %0 = arith.cmpi eq, %arg2, %c0_i32 : i32
    %1 = arith.extui %0 : i1 to i32
    %c0_i32_0 = arith.constant 0 : i32
    %2 = arith.cmpi ne, %1, %c0_i32_0 : i32
    scf.if %2 {
      %cst_48 = arith.constant 0.000000e+00 : f32
      %50 = vector.broadcast %cst_48 : f32 to vector<16x128xf32>
      %c0_49 = arith.constant 0 : index
      %c0_50 = arith.constant 0 : index
      %51 = vector.load %arg8[%c0_49, %c0_50] : memref<16x128xf32, #tpu.memory_space<vmem>>, vector<16x128xf32>
      tpu.vector_store %arg8[%c0_49, %c0_50], %50 {strides = array<i32>} : memref<16x128xf32, #tpu.memory_space<vmem>>, vector<16x128xf32>,
    } else {
    }
    %c0 = arith.constant 0 : index
    %c0_1 = arith.constant 0 : index
    %c0_2 = arith.constant 0 : index
    %c0_3 = arith.constant 0 : index
    %3 = vector.load %arg3[%c0, %c0_1, %c0_2, %c0_3] : memref<1x1x17x8xbf16, #tpu.memory_space<vmem>>, vector<1x1x16x8xbf16>
    %4 = vector.shape_cast %3 : vector<1x1x16x8xbf16> to vector<16x8xbf16>
    %c4_i32 = arith.constant 4 : i32
    %5 = arith.muli %arg2, %c4_i32 : i32
    %c0_i32_4 = arith.constant 0 : i32
    %6 = arith.addi %5, %c0_i32_4 : i32
    %7 = arith.index_cast %6 : i32 to index
    %c0_5 = arith.constant 0 : index
    %c0_6 = arith.constant 0 : index
    %8 = vector.load %arg5[%7, %c0_5, %c0_6] : memref<16x8x128xbf16, #tpu.memory_space<vmem>>, vector<1x8x128xbf16>
    %9 = vector.shape_cast %8 : vector<1x8x128xbf16> to vector<8x128xbf16>
    %c0_7 = arith.constant 0 : index
    %c0_8 = arith.constant 0 : index
    %10 = vector.load %arg8[%c0_7, %c0_8] : memref<16x128xf32, #tpu.memory_space<vmem>>, vector<16x128xf32>
    %cst = arith.constant dense<0.000000e+00> : vector<16x128xf32>
    %11 = tpu.matmul %4, %9, %cst {dimension_numbers = #tpu.dot_dimension_numbers<[1], [0], [0], [1], [0, 0, 1, 1], [], []>} : vector<16x8xbf16>, vector<8x128xbf16>, vector<16x128xf32> -> vector<16x128xf32>
    %12 = arith.addf %10, %11 : vector<16x128xf32>
    %c0_9 = arith.constant 0 : index
    %c0_10 = arith.constant 0 : index
    %13 = vector.load %arg8[%c0_9, %c0_10] : memref<16x128xf32, #tpu.memory_space<vmem>>, vector<16x128xf32>
    tpu.vector_store %arg8[%c0_9, %c0_10], %12 {strides = array<i32>} : memref<16x128xf32, #tpu.memory_space<vmem>>, vector<16x128xf32>,
    %c0_11 = arith.constant 0 : index
    %c0_12 = arith.constant 0 : index
    %c0_13 = arith.constant 0 : index
    %c0_14 = arith.constant 0 : index
    %14 = vector.load %arg4[%c0_11, %c0_12, %c0_13, %c0_14] : memref<1x1x17x8xbf16, #tpu.memory_space<vmem>>, vector<1x1x16x8xbf16>
    %15 = vector.shape_cast %14 : vector<1x1x16x8xbf16> to vector<16x8xbf16>
    %c4_i32_15 = arith.constant 4 : i32
    %16 = arith.muli %arg2, %c4_i32_15 : i32
    %c1_i32 = arith.constant 1 : i32
    %17 = arith.addi %16, %c1_i32 : i32
    %18 = arith.index_cast %17 : i32 to index
    %c0_16 = arith.constant 0 : index
    %c0_17 = arith.constant 0 : index
    %19 = vector.load %arg5[%18, %c0_16, %c0_17] : memref<16x8x128xbf16, #tpu.memory_space<vmem>>, vector<1x8x128xbf16>
    %20 = vector.shape_cast %19 : vector<1x8x128xbf16> to vector<8x128xbf16>
    %c0_18 = arith.constant 0 : index
    %c0_19 = arith.constant 0 : index
    %21 = vector.load %arg8[%c0_18, %c0_19] : memref<16x128xf32, #tpu.memory_space<vmem>>, vector<16x128xf32>
    %cst_20 = arith.constant dense<0.000000e+00> : vector<16x128xf32>
    %22 = tpu.matmul %15, %20, %cst_20 {dimension_numbers = #tpu.dot_dimension_numbers<[1], [0], [0], [1], [0, 0, 1, 1], [], []>} : vector<16x8xbf16>, vector<8x128xbf16>, vector<16x128xf32> -> vector<16x128xf32>
    %23 = arith.addf %21, %22 : vector<16x128xf32>
    %c0_21 = arith.constant 0 : index
    %c0_22 = arith.constant 0 : index
    %24 = vector.load %arg8[%c0_21, %c0_22] : memref<16x128xf32, #tpu.memory_space<vmem>>, vector<16x128xf32>
    tpu.vector_store %arg8[%c0_21, %c0_22], %23 {strides = array<i32>} : memref<16x128xf32, #tpu.memory_space<vmem>>, vector<16x128xf32>,
    %c0_23 = arith.constant 0 : index
    %c0_24 = arith.constant 0 : index
    %c1 = arith.constant 1 : index
    %c0_25 = arith.constant 0 : index
    %25 = vector.load %arg3[%c0_23, %c0_24, %c1, %c0_25] : memref<1x1x17x8xbf16, #tpu.memory_space<vmem>>, vector<1x1x16x8xbf16>
    %26 = vector.shape_cast %25 : vector<1x1x16x8xbf16> to vector<16x8xbf16>
    %c4_i32_26 = arith.constant 4 : i32
    %27 = arith.muli %arg2, %c4_i32_26 : i32
    %c2_i32 = arith.constant 2 : i32
    %28 = arith.addi %27, %c2_i32 : i32
    %29 = arith.index_cast %28 : i32 to index
    %c0_27 = arith.constant 0 : index
    %c0_28 = arith.constant 0 : index
    %30 = vector.load %arg5[%29, %c0_27, %c0_28] : memref<16x8x128xbf16, #tpu.memory_space<vmem>>, vector<1x8x128xbf16>
    %31 = vector.shape_cast %30 : vector<1x8x128xbf16> to vector<8x128xbf16>
    %c0_29 = arith.constant 0 : index
    %c0_30 = arith.constant 0 : index
    %32 = vector.load %arg8[%c0_29, %c0_30] : memref<16x128xf32, #tpu.memory_space<vmem>>, vector<16x128xf32>
    %cst_31 = arith.constant dense<0.000000e+00> : vector<16x128xf32>
    %33 = tpu.matmul %26, %31, %cst_31 {dimension_numbers = #tpu.dot_dimension_numbers<[1], [0], [0], [1], [0, 0, 1, 1], [], []>} : vector<16x8xbf16>, vector<8x128xbf16>, vector<16x128xf32> -> vector<16x128xf32>
    %34 = arith.addf %32, %33 : vector<16x128xf32>
    %c0_32 = arith.constant 0 : index
    %c0_33 = arith.constant 0 : index
    %35 = vector.load %arg8[%c0_32, %c0_33] : memref<16x128xf32, #tpu.memory_space<vmem>>, vector<16x128xf32>
    tpu.vector_store %arg8[%c0_32, %c0_33], %34 {strides = array<i32>} : memref<16x128xf32, #tpu.memory_space<vmem>>, vector<16x128xf32>,
    %c0_34 = arith.constant 0 : index
    %c0_35 = arith.constant 0 : index
    %c1_36 = arith.constant 1 : index
    %c0_37 = arith.constant 0 : index
    %36 = vector.load %arg4[%c0_34, %c0_35, %c1_36, %c0_37] : memref<1x1x17x8xbf16, #tpu.memory_space<vmem>>, vector<1x1x16x8xbf16>
    %37 = vector.shape_cast %36 : vector<1x1x16x8xbf16> to vector<16x8xbf16>
    %c4_i32_38 = arith.constant 4 : i32
    %38 = arith.muli %arg2, %c4_i32_38 : i32
    %c3_i32 = arith.constant 3 : i32
    %39 = arith.addi %38, %c3_i32 : i32
    %40 = arith.index_cast %39 : i32 to index
    %c0_39 = arith.constant 0 : index
    %c0_40 = arith.constant 0 : index
    %41 = vector.load %arg5[%40, %c0_39, %c0_40] : memref<16x8x128xbf16, #tpu.memory_space<vmem>>, vector<1x8x128xbf16>
    %42 = vector.shape_cast %41 : vector<1x8x128xbf16> to vector<8x128xbf16>
    %c0_41 = arith.constant 0 : index
    %c0_42 = arith.constant 0 : index
    %43 = vector.load %arg8[%c0_41, %c0_42] : memref<16x128xf32, #tpu.memory_space<vmem>>, vector<16x128xf32>
    %cst_43 = arith.constant dense<0.000000e+00> : vector<16x128xf32>
    %44 = tpu.matmul %37, %42, %cst_43 {dimension_numbers = #tpu.dot_dimension_numbers<[1], [0], [0], [1], [0, 0, 1, 1], [], []>} : vector<16x8xbf16>, vector<8x128xbf16>, vector<16x128xf32> -> vector<16x128xf32>
    %45 = arith.addf %43, %44 : vector<16x128xf32>
    %c0_44 = arith.constant 0 : index
    %c0_45 = arith.constant 0 : index
    %46 = vector.load %arg8[%c0_44, %c0_45] : memref<16x128xf32, #tpu.memory_space<vmem>>, vector<16x128xf32>
    tpu.vector_store %arg8[%c0_44, %c0_45], %45 {strides = array<i32>} : memref<16x128xf32, #tpu.memory_space<vmem>>, vector<16x128xf32>,
    %c3_i32_46 = arith.constant 3 : i32
    %47 = arith.cmpi eq, %arg2, %c3_i32_46 : i32
    %48 = arith.extui %47 : i1 to i32
    %c0_i32_47 = arith.constant 0 : i32
    %49 = arith.cmpi ne, %48, %c0_i32_47 : i32
    scf.if %49 {
      %c0_48 = arith.constant 0 : index
      %c0_49 = arith.constant 0 : index
      %50 = vector.load %arg8[%c0_48, %c0_49] : memref<16x128xf32, #tpu.memory_space<vmem>>, vector<16x128xf32>
      %c0_50 = arith.constant 0 : index
      %c0_51 = arith.constant 0 : index
      %51 = vector.load %arg6[%c0_50, %c0_51] : memref<1x128xf32, #tpu.memory_space<vmem>>, vector<1x128xf32>
      %52 = vector.broadcast %51 : vector<1x128xf32> to vector<16x128xf32>
      %53 = arith.addf %50, %52 : vector<16x128xf32>
      %cst_52 = arith.constant 0.000000e+00 : f32
      %54 = vector.broadcast %cst_52 : f32 to vector<16x128xf32>
      %55 = arith.cmpf oge, %53, %54 : vector<16x128xf32>
      %cst_53 = arith.constant 2.000000e-01 : f32
      %56 = vector.broadcast %cst_53 : f32 to vector<16x128xf32>
      %57 = arith.mulf %56, %53 : vector<16x128xf32>
      %58 = arith.select %55, %53, %57 : vector<16x128xi1>, vector<16x128xf32>
      %59 = arith.truncf %58 : vector<16x128xf32> to vector<16x128xbf16>
      %c0_54 = arith.constant 0 : index
      %c0_55 = arith.constant 0 : index
      %c0_56 = arith.constant 0 : index
      %c0_57 = arith.constant 0 : index
      %60 = vector.load %arg7[%c0_54, %c0_55, %c0_56, %c0_57] : memref<1x1x16x128xbf16, #tpu.memory_space<vmem>>, vector<1x1x16x128xbf16>
      %61 = vector.shape_cast %60 : vector<1x1x16x128xbf16> to vector<16x128xbf16>
      %62 = vector.shape_cast %59 : vector<16x128xbf16> to vector<1x1x16x128xbf16>
      tpu.vector_store %arg7[%c0_54, %c0_55, %c0_56, %c0_57], %62 {strides = array<i32>} : memref<1x1x16x128xbf16, #tpu.memory_space<vmem>>, vector<1x1x16x128xbf16>,
    } else {
    }
    return
  }
  func.func @transform_0(%arg0: i32, %arg1: i32, %arg2: i32) -> (i32, i32, i32, i32) {
    %c2_i32 = arith.constant 2 : i32
    %0 = arith.muli %arg1, %c2_i32 : i32
    %1 = arith.addi %0, %arg2 : i32
    %c0_i32 = arith.constant 0 : i32
    %c0_i32_0 = arith.constant 0 : i32
    %c0_i32_1 = arith.constant 0 : i32
    return %arg0, %1, %c0_i32, %c0_i32_0 : i32, i32, i32, i32
  }
  func.func @transform_1(%arg0: i32, %arg1: i32, %arg2: i32) -> (i32, i32, i32, i32) {
    %c2_i32 = arith.constant 2 : i32
    %0 = arith.muli %arg1, %c2_i32 : i32
    %1 = arith.addi %0, %arg2 : i32
    %c0_i32 = arith.constant 0 : i32
    %c0_i32_0 = arith.constant 0 : i32
    %c0_i32_1 = arith.constant 0 : i32
    return %arg0, %1, %c0_i32, %c0_i32_0 : i32, i32, i32, i32
  }
  func.func @transform_2(%arg0: i32, %arg1: i32, %arg2: i32) -> (i32, i32, i32) {
    %c0_i32 = arith.constant 0 : i32
    %c0_i32_0 = arith.constant 0 : i32
    %c0_i32_1 = arith.constant 0 : i32
    %c0_i32_2 = arith.constant 0 : i32
    return %c0_i32, %c0_i32_0, %c0_i32_1 : i32, i32, i32
  }
  func.func @transform_3(%arg0: i32, %arg1: i32, %arg2: i32) -> (i32, i32) {
    %c0_i32 = arith.constant 0 : i32
    %c0_i32_0 = arith.constant 0 : i32
    %c0_i32_1 = arith.constant 0 : i32
    return %c0_i32, %c0_i32_0 : i32, i32
  }
  func.func @transform_4(%arg0: i32, %arg1: i32, %arg2: i32) -> (i32, i32, i32, i32) {
    %c0_i32 = arith.constant 0 : i32
    %c0_i32_0 = arith.constant 0 : i32
    %c0_i32_1 = arith.constant 0 : i32
    return %arg0, %arg1, %c0_i32, %c0_i32_0 : i32, i32, i32, i32
  }
}

module attributes {stable_mosaic.version = 11 : i64} {
  func.func @_affine_lrelu_kernel(%arg0: i32, %arg1: i32, %arg2: memref<1x8x8x128xbf16, #tpu.memory_space<vmem>>, %arg3: memref<1x1x1x128xf32, #tpu.memory_space<vmem>>, %arg4: memref<1x1x1x128xf32, #tpu.memory_space<vmem>>, %arg5: memref<1x8x8x128xbf16, #tpu.memory_space<vmem>>) attributes {dimension_semantics = [#tpu.dimension_semantics<parallel>, #tpu.dimension_semantics<parallel>], iteration_bounds = array<i64: 2, 1>, scalar_prefetch = 0 : i64, scratch_operands = 0 : i64, tpu.core_type = #tpu.core_type<tc>, window_params = [{transform_indices = @transform_0, window_bounds = array<i64: 1, 8, 8, 128>}, {pipeline_mode = #tpu.pipeline_mode<synchronous>, transform_indices = @transform_1, window_bounds = array<i64: 1, 1, 1, 128>}, {pipeline_mode = #tpu.pipeline_mode<synchronous>, transform_indices = @transform_2, window_bounds = array<i64: 1, 1, 1, 128>}, {transform_indices = @transform_3, window_bounds = array<i64: 1, 8, 8, 128>}]} {
    %c0 = arith.constant 0 : index
    %c0_0 = arith.constant 0 : index
    %c0_1 = arith.constant 0 : index
    %c0_2 = arith.constant 0 : index
    %0 = vector.load %arg2[%c0, %c0_0, %c0_1, %c0_2] : memref<1x8x8x128xbf16, #tpu.memory_space<vmem>>, vector<1x8x8x128xbf16>
    %1 = arith.extf %0 : vector<1x8x8x128xbf16> to vector<1x8x8x128xf32>
    %c0_3 = arith.constant 0 : index
    %c0_4 = arith.constant 0 : index
    %c0_5 = arith.constant 0 : index
    %c0_6 = arith.constant 0 : index
    %2 = vector.load %arg3[%c0_3, %c0_4, %c0_5, %c0_6] : memref<1x1x1x128xf32, #tpu.memory_space<vmem>>, vector<1x1x1x128xf32>
    %3 = vector.broadcast %2 : vector<1x1x1x128xf32> to vector<1x8x8x128xf32>
    %4 = arith.mulf %1, %3 : vector<1x8x8x128xf32>
    %c0_7 = arith.constant 0 : index
    %c0_8 = arith.constant 0 : index
    %c0_9 = arith.constant 0 : index
    %c0_10 = arith.constant 0 : index
    %5 = vector.load %arg4[%c0_7, %c0_8, %c0_9, %c0_10] : memref<1x1x1x128xf32, #tpu.memory_space<vmem>>, vector<1x1x1x128xf32>
    %6 = vector.broadcast %5 : vector<1x1x1x128xf32> to vector<1x8x8x128xf32>
    %7 = arith.addf %4, %6 : vector<1x8x8x128xf32>
    %cst = arith.constant 0.000000e+00 : f32
    %8 = vector.broadcast %cst : f32 to vector<1x8x8x128xf32>
    %9 = arith.cmpf oge, %7, %8 : vector<1x8x8x128xf32>
    %cst_11 = arith.constant 2.000000e-01 : f32
    %10 = vector.broadcast %cst_11 : f32 to vector<1x8x8x128xf32>
    %11 = arith.mulf %10, %7 : vector<1x8x8x128xf32>
    %12 = arith.select %9, %7, %11 : vector<1x8x8x128xi1>, vector<1x8x8x128xf32>
    %13 = arith.truncf %12 : vector<1x8x8x128xf32> to vector<1x8x8x128xbf16>
    %c0_12 = arith.constant 0 : index
    %c0_13 = arith.constant 0 : index
    %c0_14 = arith.constant 0 : index
    %c0_15 = arith.constant 0 : index
    %14 = vector.load %arg5[%c0_12, %c0_13, %c0_14, %c0_15] : memref<1x8x8x128xbf16, #tpu.memory_space<vmem>>, vector<1x8x8x128xbf16>
    tpu.vector_store %arg5[%c0_12, %c0_13, %c0_14, %c0_15], %13 {strides = array<i32>} : memref<1x8x8x128xbf16, #tpu.memory_space<vmem>>, vector<1x8x8x128xbf16>,
    return
  }
  func.func @transform_0(%arg0: i32, %arg1: i32) -> (i32, i32, i32, i32) {
    %c0_i32 = arith.constant 0 : i32
    %c0_i32_0 = arith.constant 0 : i32
    %c0_i32_1 = arith.constant 0 : i32
    return %arg0, %arg1, %c0_i32, %c0_i32_0 : i32, i32, i32, i32
  }
  func.func @transform_1(%arg0: i32, %arg1: i32) -> (i32, i32, i32, i32) {
    %c0_i32 = arith.constant 0 : i32
    %c0_i32_0 = arith.constant 0 : i32
    %c0_i32_1 = arith.constant 0 : i32
    %c0_i32_2 = arith.constant 0 : i32
    %c0_i32_3 = arith.constant 0 : i32
    return %c0_i32, %c0_i32_0, %c0_i32_1, %c0_i32_2 : i32, i32, i32, i32
  }
  func.func @transform_2(%arg0: i32, %arg1: i32) -> (i32, i32, i32, i32) {
    %c0_i32 = arith.constant 0 : i32
    %c0_i32_0 = arith.constant 0 : i32
    %c0_i32_1 = arith.constant 0 : i32
    %c0_i32_2 = arith.constant 0 : i32
    %c0_i32_3 = arith.constant 0 : i32
    return %c0_i32, %c0_i32_0, %c0_i32_1, %c0_i32_2 : i32, i32, i32, i32
  }
  func.func @transform_3(%arg0: i32, %arg1: i32) -> (i32, i32, i32, i32) {
    %c0_i32 = arith.constant 0 : i32
    %c0_i32_0 = arith.constant 0 : i32
    %c0_i32_1 = arith.constant 0 : i32
    return %arg0, %arg1, %c0_i32, %c0_i32_0 : i32, i32, i32, i32
  }
}

module attributes {stable_mosaic.version = 11 : i64} {
  func.func @_conv_row_kernel(%arg0: i32, %arg1: i32, %arg2: i32, %arg3: memref<1x1x9x128xbf16, #tpu.memory_space<vmem>>, %arg4: memref<1x1x9x128xbf16, #tpu.memory_space<vmem>>, %arg5: memref<16x128x128xbf16, #tpu.memory_space<vmem>>, %arg6: memref<1x1x8x128xbf16, #tpu.memory_space<vmem>>, %arg7: memref<1x1x1x128xf32, #tpu.memory_space<vmem>>, %arg8: memref<1x1x1x128xf32, #tpu.memory_space<vmem>>, %arg9: memref<8x128xf32, #tpu.memory_space<vmem>>) attributes {dimension_semantics = [#tpu.dimension_semantics<parallel>, #tpu.dimension_semantics<parallel>, #tpu.dimension_semantics<arbitrary>], iteration_bounds = array<i64: 2, 8, 4>, scalar_prefetch = 0 : i64, scratch_operands = 1 : i64, tpu.core_type = #tpu.core_type<tc>, window_params = [{transform_indices = @transform_0, window_bounds = array<i64: 1, 1, 9, 128>}, {transform_indices = @transform_1, window_bounds = array<i64: 1, 1, 9, 128>}, {pipeline_mode = #tpu.pipeline_mode<synchronous>, transform_indices = @transform_2, window_bounds = array<i64: 16, 128, 128>}, {transform_indices = @transform_3, window_bounds = array<i64: 1, 1, 8, 128>}, {transform_indices = @transform_4, window_bounds = array<i64: 1, 1, 1, 128>}, {transform_indices = @transform_5, window_bounds = array<i64: 1, 1, 1, 128>}]} {
    %c0_i32 = arith.constant 0 : i32
    %0 = arith.cmpi eq, %arg2, %c0_i32 : i32
    %1 = arith.extui %0 : i1 to i32
    %c0_i32_0 = arith.constant 0 : i32
    %2 = arith.cmpi ne, %1, %c0_i32_0 : i32
    scf.if %2 {
      %cst_48 = arith.constant 0.000000e+00 : f32
      %50 = vector.broadcast %cst_48 : f32 to vector<8x128xf32>
      %c0_49 = arith.constant 0 : index
      %c0_50 = arith.constant 0 : index
      %51 = vector.load %arg9[%c0_49, %c0_50] : memref<8x128xf32, #tpu.memory_space<vmem>>, vector<8x128xf32>
      tpu.vector_store %arg9[%c0_49, %c0_50], %50 {strides = array<i32>} : memref<8x128xf32, #tpu.memory_space<vmem>>, vector<8x128xf32>,
    } else {
    }
    %c0 = arith.constant 0 : index
    %c0_1 = arith.constant 0 : index
    %c0_2 = arith.constant 0 : index
    %c0_3 = arith.constant 0 : index
    %3 = vector.load %arg3[%c0, %c0_1, %c0_2, %c0_3] : memref<1x1x9x128xbf16, #tpu.memory_space<vmem>>, vector<1x1x8x128xbf16>
    %4 = vector.shape_cast %3 : vector<1x1x8x128xbf16> to vector<8x128xbf16>
    %c4_i32 = arith.constant 4 : i32
    %5 = arith.muli %arg2, %c4_i32 : i32
    %c0_i32_4 = arith.constant 0 : i32
    %6 = arith.addi %5, %c0_i32_4 : i32
    %7 = arith.index_cast %6 : i32 to index
    %c0_5 = arith.constant 0 : index
    %c0_6 = arith.constant 0 : index
    %8 = vector.load %arg5[%7, %c0_5, %c0_6] : memref<16x128x128xbf16, #tpu.memory_space<vmem>>, vector<1x128x128xbf16>
    %9 = vector.shape_cast %8 : vector<1x128x128xbf16> to vector<128x128xbf16>
    %c0_7 = arith.constant 0 : index
    %c0_8 = arith.constant 0 : index
    %10 = vector.load %arg9[%c0_7, %c0_8] : memref<8x128xf32, #tpu.memory_space<vmem>>, vector<8x128xf32>
    %cst = arith.constant dense<0.000000e+00> : vector<8x128xf32>
    %11 = tpu.matmul %4, %9, %cst {dimension_numbers = #tpu.dot_dimension_numbers<[1], [0], [0], [1], [0, 0, 1, 1], [], []>} : vector<8x128xbf16>, vector<128x128xbf16>, vector<8x128xf32> -> vector<8x128xf32>
    %12 = arith.addf %10, %11 : vector<8x128xf32>
    %c0_9 = arith.constant 0 : index
    %c0_10 = arith.constant 0 : index
    %13 = vector.load %arg9[%c0_9, %c0_10] : memref<8x128xf32, #tpu.memory_space<vmem>>, vector<8x128xf32>
    tpu.vector_store %arg9[%c0_9, %c0_10], %12 {strides = array<i32>} : memref<8x128xf32, #tpu.memory_space<vmem>>, vector<8x128xf32>,
    %c0_11 = arith.constant 0 : index
    %c0_12 = arith.constant 0 : index
    %c0_13 = arith.constant 0 : index
    %c0_14 = arith.constant 0 : index
    %14 = vector.load %arg4[%c0_11, %c0_12, %c0_13, %c0_14] : memref<1x1x9x128xbf16, #tpu.memory_space<vmem>>, vector<1x1x8x128xbf16>
    %15 = vector.shape_cast %14 : vector<1x1x8x128xbf16> to vector<8x128xbf16>
    %c4_i32_15 = arith.constant 4 : i32
    %16 = arith.muli %arg2, %c4_i32_15 : i32
    %c1_i32 = arith.constant 1 : i32
    %17 = arith.addi %16, %c1_i32 : i32
    %18 = arith.index_cast %17 : i32 to index
    %c0_16 = arith.constant 0 : index
    %c0_17 = arith.constant 0 : index
    %19 = vector.load %arg5[%18, %c0_16, %c0_17] : memref<16x128x128xbf16, #tpu.memory_space<vmem>>, vector<1x128x128xbf16>
    %20 = vector.shape_cast %19 : vector<1x128x128xbf16> to vector<128x128xbf16>
    %c0_18 = arith.constant 0 : index
    %c0_19 = arith.constant 0 : index
    %21 = vector.load %arg9[%c0_18, %c0_19] : memref<8x128xf32, #tpu.memory_space<vmem>>, vector<8x128xf32>
    %cst_20 = arith.constant dense<0.000000e+00> : vector<8x128xf32>
    %22 = tpu.matmul %15, %20, %cst_20 {dimension_numbers = #tpu.dot_dimension_numbers<[1], [0], [0], [1], [0, 0, 1, 1], [], []>} : vector<8x128xbf16>, vector<128x128xbf16>, vector<8x128xf32> -> vector<8x128xf32>
    %23 = arith.addf %21, %22 : vector<8x128xf32>
    %c0_21 = arith.constant 0 : index
    %c0_22 = arith.constant 0 : index
    %24 = vector.load %arg9[%c0_21, %c0_22] : memref<8x128xf32, #tpu.memory_space<vmem>>, vector<8x128xf32>
    tpu.vector_store %arg9[%c0_21, %c0_22], %23 {strides = array<i32>} : memref<8x128xf32, #tpu.memory_space<vmem>>, vector<8x128xf32>,
    %c0_23 = arith.constant 0 : index
    %c0_24 = arith.constant 0 : index
    %c1 = arith.constant 1 : index
    %c0_25 = arith.constant 0 : index
    %25 = vector.load %arg3[%c0_23, %c0_24, %c1, %c0_25] : memref<1x1x9x128xbf16, #tpu.memory_space<vmem>>, vector<1x1x8x128xbf16>
    %26 = vector.shape_cast %25 : vector<1x1x8x128xbf16> to vector<8x128xbf16>
    %c4_i32_26 = arith.constant 4 : i32
    %27 = arith.muli %arg2, %c4_i32_26 : i32
    %c2_i32 = arith.constant 2 : i32
    %28 = arith.addi %27, %c2_i32 : i32
    %29 = arith.index_cast %28 : i32 to index
    %c0_27 = arith.constant 0 : index
    %c0_28 = arith.constant 0 : index
    %30 = vector.load %arg5[%29, %c0_27, %c0_28] : memref<16x128x128xbf16, #tpu.memory_space<vmem>>, vector<1x128x128xbf16>
    %31 = vector.shape_cast %30 : vector<1x128x128xbf16> to vector<128x128xbf16>
    %c0_29 = arith.constant 0 : index
    %c0_30 = arith.constant 0 : index
    %32 = vector.load %arg9[%c0_29, %c0_30] : memref<8x128xf32, #tpu.memory_space<vmem>>, vector<8x128xf32>
    %cst_31 = arith.constant dense<0.000000e+00> : vector<8x128xf32>
    %33 = tpu.matmul %26, %31, %cst_31 {dimension_numbers = #tpu.dot_dimension_numbers<[1], [0], [0], [1], [0, 0, 1, 1], [], []>} : vector<8x128xbf16>, vector<128x128xbf16>, vector<8x128xf32> -> vector<8x128xf32>
    %34 = arith.addf %32, %33 : vector<8x128xf32>
    %c0_32 = arith.constant 0 : index
    %c0_33 = arith.constant 0 : index
    %35 = vector.load %arg9[%c0_32, %c0_33] : memref<8x128xf32, #tpu.memory_space<vmem>>, vector<8x128xf32>
    tpu.vector_store %arg9[%c0_32, %c0_33], %34 {strides = array<i32>} : memref<8x128xf32, #tpu.memory_space<vmem>>, vector<8x128xf32>,
    %c0_34 = arith.constant 0 : index
    %c0_35 = arith.constant 0 : index
    %c1_36 = arith.constant 1 : index
    %c0_37 = arith.constant 0 : index
    %36 = vector.load %arg4[%c0_34, %c0_35, %c1_36, %c0_37] : memref<1x1x9x128xbf16, #tpu.memory_space<vmem>>, vector<1x1x8x128xbf16>
    %37 = vector.shape_cast %36 : vector<1x1x8x128xbf16> to vector<8x128xbf16>
    %c4_i32_38 = arith.constant 4 : i32
    %38 = arith.muli %arg2, %c4_i32_38 : i32
    %c3_i32 = arith.constant 3 : i32
    %39 = arith.addi %38, %c3_i32 : i32
    %40 = arith.index_cast %39 : i32 to index
    %c0_39 = arith.constant 0 : index
    %c0_40 = arith.constant 0 : index
    %41 = vector.load %arg5[%40, %c0_39, %c0_40] : memref<16x128x128xbf16, #tpu.memory_space<vmem>>, vector<1x128x128xbf16>
    %42 = vector.shape_cast %41 : vector<1x128x128xbf16> to vector<128x128xbf16>
    %c0_41 = arith.constant 0 : index
    %c0_42 = arith.constant 0 : index
    %43 = vector.load %arg9[%c0_41, %c0_42] : memref<8x128xf32, #tpu.memory_space<vmem>>, vector<8x128xf32>
    %cst_43 = arith.constant dense<0.000000e+00> : vector<8x128xf32>
    %44 = tpu.matmul %37, %42, %cst_43 {dimension_numbers = #tpu.dot_dimension_numbers<[1], [0], [0], [1], [0, 0, 1, 1], [], []>} : vector<8x128xbf16>, vector<128x128xbf16>, vector<8x128xf32> -> vector<8x128xf32>
    %45 = arith.addf %43, %44 : vector<8x128xf32>
    %c0_44 = arith.constant 0 : index
    %c0_45 = arith.constant 0 : index
    %46 = vector.load %arg9[%c0_44, %c0_45] : memref<8x128xf32, #tpu.memory_space<vmem>>, vector<8x128xf32>
    tpu.vector_store %arg9[%c0_44, %c0_45], %45 {strides = array<i32>} : memref<8x128xf32, #tpu.memory_space<vmem>>, vector<8x128xf32>,
    %c3_i32_46 = arith.constant 3 : i32
    %47 = arith.cmpi eq, %arg2, %c3_i32_46 : i32
    %48 = arith.extui %47 : i1 to i32
    %c0_i32_47 = arith.constant 0 : i32
    %49 = arith.cmpi ne, %48, %c0_i32_47 : i32
    scf.if %49 {
      %c0_48 = arith.constant 0 : index
      %c0_49 = arith.constant 0 : index
      %50 = vector.load %arg9[%c0_48, %c0_49] : memref<8x128xf32, #tpu.memory_space<vmem>>, vector<8x128xf32>
      %cst_50 = arith.constant dense<0.000000e+00> : vector<128xf32>
      %51 = vector.multi_reduction <add>, %50, %cst_50 [0] : vector<8x128xf32> to vector<128xf32>
      %52 = vector.shape_cast %51 : vector<128xf32> to vector<1x128xf32>
      %c0_51 = arith.constant 0 : index
      %c0_52 = arith.constant 0 : index
      %c0_53 = arith.constant 0 : index
      %c0_54 = arith.constant 0 : index
      %53 = vector.load %arg7[%c0_51, %c0_52, %c0_53, %c0_54] : memref<1x1x1x128xf32, #tpu.memory_space<vmem>>, vector<1x1x1x128xf32>
      %54 = vector.shape_cast %53 : vector<1x1x1x128xf32> to vector<1x128xf32>
      %55 = vector.shape_cast %52 : vector<1x128xf32> to vector<1x1x1x128xf32>
      tpu.vector_store %arg7[%c0_51, %c0_52, %c0_53, %c0_54], %55 {strides = array<i32>} : memref<1x1x1x128xf32, #tpu.memory_space<vmem>>, vector<1x1x1x128xf32>,
      %56 = arith.mulf %50, %50 : vector<8x128xf32>
      %cst_55 = arith.constant dense<0.000000e+00> : vector<128xf32>
      %57 = vector.multi_reduction <add>, %56, %cst_55 [0] : vector<8x128xf32> to vector<128xf32>
      %58 = vector.shape_cast %57 : vector<128xf32> to vector<1x128xf32>
      %c0_56 = arith.constant 0 : index
      %c0_57 = arith.constant 0 : index
      %c0_58 = arith.constant 0 : index
      %c0_59 = arith.constant 0 : index
      %59 = vector.load %arg8[%c0_56, %c0_57, %c0_58, %c0_59] : memref<1x1x1x128xf32, #tpu.memory_space<vmem>>, vector<1x1x1x128xf32>
      %60 = vector.shape_cast %59 : vector<1x1x1x128xf32> to vector<1x128xf32>
      %61 = vector.shape_cast %58 : vector<1x128xf32> to vector<1x1x1x128xf32>
      tpu.vector_store %arg8[%c0_56, %c0_57, %c0_58, %c0_59], %61 {strides = array<i32>} : memref<1x1x1x128xf32, #tpu.memory_space<vmem>>, vector<1x1x1x128xf32>,
      %62 = arith.truncf %50 : vector<8x128xf32> to vector<8x128xbf16>
      %c0_60 = arith.constant 0 : index
      %c0_61 = arith.constant 0 : index
      %c0_62 = arith.constant 0 : index
      %c0_63 = arith.constant 0 : index
      %63 = vector.load %arg6[%c0_60, %c0_61, %c0_62, %c0_63] : memref<1x1x8x128xbf16, #tpu.memory_space<vmem>>, vector<1x1x8x128xbf16>
      %64 = vector.shape_cast %63 : vector<1x1x8x128xbf16> to vector<8x128xbf16>
      %65 = vector.shape_cast %62 : vector<8x128xbf16> to vector<1x1x8x128xbf16>
      tpu.vector_store %arg6[%c0_60, %c0_61, %c0_62, %c0_63], %65 {strides = array<i32>} : memref<1x1x8x128xbf16, #tpu.memory_space<vmem>>, vector<1x1x8x128xbf16>,
    } else {
    }
    return
  }
  func.func @transform_0(%arg0: i32, %arg1: i32, %arg2: i32) -> (i32, i32, i32, i32) {
    %c2_i32 = arith.constant 2 : i32
    %0 = arith.muli %arg1, %c2_i32 : i32
    %1 = arith.addi %0, %arg2 : i32
    %c0_i32 = arith.constant 0 : i32
    %c0_i32_0 = arith.constant 0 : i32
    %c0_i32_1 = arith.constant 0 : i32
    return %arg0, %1, %c0_i32, %c0_i32_0 : i32, i32, i32, i32
  }
  func.func @transform_1(%arg0: i32, %arg1: i32, %arg2: i32) -> (i32, i32, i32, i32) {
    %c2_i32 = arith.constant 2 : i32
    %0 = arith.muli %arg1, %c2_i32 : i32
    %1 = arith.addi %0, %arg2 : i32
    %c0_i32 = arith.constant 0 : i32
    %c0_i32_0 = arith.constant 0 : i32
    %c0_i32_1 = arith.constant 0 : i32
    return %arg0, %1, %c0_i32, %c0_i32_0 : i32, i32, i32, i32
  }
  func.func @transform_2(%arg0: i32, %arg1: i32, %arg2: i32) -> (i32, i32, i32) {
    %c0_i32 = arith.constant 0 : i32
    %c0_i32_0 = arith.constant 0 : i32
    %c0_i32_1 = arith.constant 0 : i32
    %c0_i32_2 = arith.constant 0 : i32
    return %c0_i32, %c0_i32_0, %c0_i32_1 : i32, i32, i32
  }
  func.func @transform_3(%arg0: i32, %arg1: i32, %arg2: i32) -> (i32, i32, i32, i32) {
    %c0_i32 = arith.constant 0 : i32
    %c0_i32_0 = arith.constant 0 : i32
    %c0_i32_1 = arith.constant 0 : i32
    return %arg0, %arg1, %c0_i32, %c0_i32_0 : i32, i32, i32, i32
  }
  func.func @transform_4(%arg0: i32, %arg1: i32, %arg2: i32) -> (i32, i32, i32, i32) {
    %c0_i32 = arith.constant 0 : i32
    %c0_i32_0 = arith.constant 0 : i32
    %c0_i32_1 = arith.constant 0 : i32
    return %arg0, %arg1, %c0_i32, %c0_i32_0 : i32, i32, i32, i32
  }
  func.func @transform_5(%arg0: i32, %arg1: i32, %arg2: i32) -> (i32, i32, i32, i32) {
    %c0_i32 = arith.constant 0 : i32
    %c0_i32_0 = arith.constant 0 : i32
    %c0_i32_1 = arith.constant 0 : i32
    return %arg0, %arg1, %c0_i32, %c0_i32_0 : i32, i32, i32, i32
  }
}

module attributes {stable_mosaic.version = 11 : i64} {
  func.func @_conv_row_kernel(%arg0: i32, %arg1: i32, %arg2: i32, %arg3: memref<1x1x5x128xbf16, #tpu.memory_space<vmem>>, %arg4: memref<1x1x5x128xbf16, #tpu.memory_space<vmem>>, %arg5: memref<16x128x128xbf16, #tpu.memory_space<vmem>>, %arg6: memref<1x1x4x128xbf16, #tpu.memory_space<vmem>>, %arg7: memref<1x1x1x128xf32, #tpu.memory_space<vmem>>, %arg8: memref<1x1x1x128xf32, #tpu.memory_space<vmem>>, %arg9: memref<4x128xf32, #tpu.memory_space<vmem>>) attributes {dimension_semantics = [#tpu.dimension_semantics<parallel>, #tpu.dimension_semantics<parallel>, #tpu.dimension_semantics<arbitrary>], iteration_bounds = array<i64: 2, 4, 4>, scalar_prefetch = 0 : i64, scratch_operands = 1 : i64, tpu.core_type = #tpu.core_type<tc>, window_params = [{transform_indices = @transform_0, window_bounds = array<i64: 1, 1, 5, 128>}, {transform_indices = @transform_1, window_bounds = array<i64: 1, 1, 5, 128>}, {pipeline_mode = #tpu.pipeline_mode<synchronous>, transform_indices = @transform_2, window_bounds = array<i64: 16, 128, 128>}, {transform_indices = @transform_3, window_bounds = array<i64: 1, 1, 4, 128>}, {transform_indices = @transform_4, window_bounds = array<i64: 1, 1, 1, 128>}, {transform_indices = @transform_5, window_bounds = array<i64: 1, 1, 1, 128>}]} {
    %c0_i32 = arith.constant 0 : i32
    %0 = arith.cmpi eq, %arg2, %c0_i32 : i32
    %1 = arith.extui %0 : i1 to i32
    %c0_i32_0 = arith.constant 0 : i32
    %2 = arith.cmpi ne, %1, %c0_i32_0 : i32
    scf.if %2 {
      %cst_48 = arith.constant 0.000000e+00 : f32
      %50 = vector.broadcast %cst_48 : f32 to vector<4x128xf32>
      %c0_49 = arith.constant 0 : index
      %c0_50 = arith.constant 0 : index
      %51 = vector.load %arg9[%c0_49, %c0_50] : memref<4x128xf32, #tpu.memory_space<vmem>>, vector<4x128xf32>
      tpu.vector_store %arg9[%c0_49, %c0_50], %50 {strides = array<i32>} : memref<4x128xf32, #tpu.memory_space<vmem>>, vector<4x128xf32>,
    } else {
    }
    %c0 = arith.constant 0 : index
    %c0_1 = arith.constant 0 : index
    %c0_2 = arith.constant 0 : index
    %c0_3 = arith.constant 0 : index
    %3 = vector.load %arg3[%c0, %c0_1, %c0_2, %c0_3] : memref<1x1x5x128xbf16, #tpu.memory_space<vmem>>, vector<1x1x4x128xbf16>
    %4 = vector.shape_cast %3 : vector<1x1x4x128xbf16> to vector<4x128xbf16>
    %c4_i32 = arith.constant 4 : i32
    %5 = arith.muli %arg2, %c4_i32 : i32
    %c0_i32_4 = arith.constant 0 : i32
    %6 = arith.addi %5, %c0_i32_4 : i32
    %7 = arith.index_cast %6 : i32 to index
    %c0_5 = arith.constant 0 : index
    %c0_6 = arith.constant 0 : index
    %8 = vector.load %arg5[%7, %c0_5, %c0_6] : memref<16x128x128xbf16, #tpu.memory_space<vmem>>, vector<1x128x128xbf16>
    %9 = vector.shape_cast %8 : vector<1x128x128xbf16> to vector<128x128xbf16>
    %c0_7 = arith.constant 0 : index
    %c0_8 = arith.constant 0 : index
    %10 = vector.load %arg9[%c0_7, %c0_8] : memref<4x128xf32, #tpu.memory_space<vmem>>, vector<4x128xf32>
    %cst = arith.constant dense<0.000000e+00> : vector<4x128xf32>
    %11 = tpu.matmul %4, %9, %cst {dimension_numbers = #tpu.dot_dimension_numbers<[1], [0], [0], [1], [0, 0, 1, 1], [], []>} : vector<4x128xbf16>, vector<128x128xbf16>, vector<4x128xf32> -> vector<4x128xf32>
    %12 = arith.addf %10, %11 : vector<4x128xf32>
    %c0_9 = arith.constant 0 : index
    %c0_10 = arith.constant 0 : index
    %13 = vector.load %arg9[%c0_9, %c0_10] : memref<4x128xf32, #tpu.memory_space<vmem>>, vector<4x128xf32>
    tpu.vector_store %arg9[%c0_9, %c0_10], %12 {strides = array<i32>} : memref<4x128xf32, #tpu.memory_space<vmem>>, vector<4x128xf32>,
    %c0_11 = arith.constant 0 : index
    %c0_12 = arith.constant 0 : index
    %c0_13 = arith.constant 0 : index
    %c0_14 = arith.constant 0 : index
    %14 = vector.load %arg4[%c0_11, %c0_12, %c0_13, %c0_14] : memref<1x1x5x128xbf16, #tpu.memory_space<vmem>>, vector<1x1x4x128xbf16>
    %15 = vector.shape_cast %14 : vector<1x1x4x128xbf16> to vector<4x128xbf16>
    %c4_i32_15 = arith.constant 4 : i32
    %16 = arith.muli %arg2, %c4_i32_15 : i32
    %c1_i32 = arith.constant 1 : i32
    %17 = arith.addi %16, %c1_i32 : i32
    %18 = arith.index_cast %17 : i32 to index
    %c0_16 = arith.constant 0 : index
    %c0_17 = arith.constant 0 : index
    %19 = vector.load %arg5[%18, %c0_16, %c0_17] : memref<16x128x128xbf16, #tpu.memory_space<vmem>>, vector<1x128x128xbf16>
    %20 = vector.shape_cast %19 : vector<1x128x128xbf16> to vector<128x128xbf16>
    %c0_18 = arith.constant 0 : index
    %c0_19 = arith.constant 0 : index
    %21 = vector.load %arg9[%c0_18, %c0_19] : memref<4x128xf32, #tpu.memory_space<vmem>>, vector<4x128xf32>
    %cst_20 = arith.constant dense<0.000000e+00> : vector<4x128xf32>
    %22 = tpu.matmul %15, %20, %cst_20 {dimension_numbers = #tpu.dot_dimension_numbers<[1], [0], [0], [1], [0, 0, 1, 1], [], []>} : vector<4x128xbf16>, vector<128x128xbf16>, vector<4x128xf32> -> vector<4x128xf32>
    %23 = arith.addf %21, %22 : vector<4x128xf32>
    %c0_21 = arith.constant 0 : index
    %c0_22 = arith.constant 0 : index
    %24 = vector.load %arg9[%c0_21, %c0_22] : memref<4x128xf32, #tpu.memory_space<vmem>>, vector<4x128xf32>
    tpu.vector_store %arg9[%c0_21, %c0_22], %23 {strides = array<i32>} : memref<4x128xf32, #tpu.memory_space<vmem>>, vector<4x128xf32>,
    %c0_23 = arith.constant 0 : index
    %c0_24 = arith.constant 0 : index
    %c1 = arith.constant 1 : index
    %c0_25 = arith.constant 0 : index
    %25 = vector.load %arg3[%c0_23, %c0_24, %c1, %c0_25] : memref<1x1x5x128xbf16, #tpu.memory_space<vmem>>, vector<1x1x4x128xbf16>
    %26 = vector.shape_cast %25 : vector<1x1x4x128xbf16> to vector<4x128xbf16>
    %c4_i32_26 = arith.constant 4 : i32
    %27 = arith.muli %arg2, %c4_i32_26 : i32
    %c2_i32 = arith.constant 2 : i32
    %28 = arith.addi %27, %c2_i32 : i32
    %29 = arith.index_cast %28 : i32 to index
    %c0_27 = arith.constant 0 : index
    %c0_28 = arith.constant 0 : index
    %30 = vector.load %arg5[%29, %c0_27, %c0_28] : memref<16x128x128xbf16, #tpu.memory_space<vmem>>, vector<1x128x128xbf16>
    %31 = vector.shape_cast %30 : vector<1x128x128xbf16> to vector<128x128xbf16>
    %c0_29 = arith.constant 0 : index
    %c0_30 = arith.constant 0 : index
    %32 = vector.load %arg9[%c0_29, %c0_30] : memref<4x128xf32, #tpu.memory_space<vmem>>, vector<4x128xf32>
    %cst_31 = arith.constant dense<0.000000e+00> : vector<4x128xf32>
    %33 = tpu.matmul %26, %31, %cst_31 {dimension_numbers = #tpu.dot_dimension_numbers<[1], [0], [0], [1], [0, 0, 1, 1], [], []>} : vector<4x128xbf16>, vector<128x128xbf16>, vector<4x128xf32> -> vector<4x128xf32>
    %34 = arith.addf %32, %33 : vector<4x128xf32>
    %c0_32 = arith.constant 0 : index
    %c0_33 = arith.constant 0 : index
    %35 = vector.load %arg9[%c0_32, %c0_33] : memref<4x128xf32, #tpu.memory_space<vmem>>, vector<4x128xf32>
    tpu.vector_store %arg9[%c0_32, %c0_33], %34 {strides = array<i32>} : memref<4x128xf32, #tpu.memory_space<vmem>>, vector<4x128xf32>,
    %c0_34 = arith.constant 0 : index
    %c0_35 = arith.constant 0 : index
    %c1_36 = arith.constant 1 : index
    %c0_37 = arith.constant 0 : index
    %36 = vector.load %arg4[%c0_34, %c0_35, %c1_36, %c0_37] : memref<1x1x5x128xbf16, #tpu.memory_space<vmem>>, vector<1x1x4x128xbf16>
    %37 = vector.shape_cast %36 : vector<1x1x4x128xbf16> to vector<4x128xbf16>
    %c4_i32_38 = arith.constant 4 : i32
    %38 = arith.muli %arg2, %c4_i32_38 : i32
    %c3_i32 = arith.constant 3 : i32
    %39 = arith.addi %38, %c3_i32 : i32
    %40 = arith.index_cast %39 : i32 to index
    %c0_39 = arith.constant 0 : index
    %c0_40 = arith.constant 0 : index
    %41 = vector.load %arg5[%40, %c0_39, %c0_40] : memref<16x128x128xbf16, #tpu.memory_space<vmem>>, vector<1x128x128xbf16>
    %42 = vector.shape_cast %41 : vector<1x128x128xbf16> to vector<128x128xbf16>
    %c0_41 = arith.constant 0 : index
    %c0_42 = arith.constant 0 : index
    %43 = vector.load %arg9[%c0_41, %c0_42] : memref<4x128xf32, #tpu.memory_space<vmem>>, vector<4x128xf32>
    %cst_43 = arith.constant dense<0.000000e+00> : vector<4x128xf32>
    %44 = tpu.matmul %37, %42, %cst_43 {dimension_numbers = #tpu.dot_dimension_numbers<[1], [0], [0], [1], [0, 0, 1, 1], [], []>} : vector<4x128xbf16>, vector<128x128xbf16>, vector<4x128xf32> -> vector<4x128xf32>
    %45 = arith.addf %43, %44 : vector<4x128xf32>
    %c0_44 = arith.constant 0 : index
    %c0_45 = arith.constant 0 : index
    %46 = vector.load %arg9[%c0_44, %c0_45] : memref<4x128xf32, #tpu.memory_space<vmem>>, vector<4x128xf32>
    tpu.vector_store %arg9[%c0_44, %c0_45], %45 {strides = array<i32>} : memref<4x128xf32, #tpu.memory_space<vmem>>, vector<4x128xf32>,
    %c3_i32_46 = arith.constant 3 : i32
    %47 = arith.cmpi eq, %arg2, %c3_i32_46 : i32
    %48 = arith.extui %47 : i1 to i32
    %c0_i32_47 = arith.constant 0 : i32
    %49 = arith.cmpi ne, %48, %c0_i32_47 : i32
    scf.if %49 {
      %c0_48 = arith.constant 0 : index
      %c0_49 = arith.constant 0 : index
      %50 = vector.load %arg9[%c0_48, %c0_49] : memref<4x128xf32, #tpu.memory_space<vmem>>, vector<4x128xf32>
      %cst_50 = arith.constant dense<0.000000e+00> : vector<128xf32>
      %51 = vector.multi_reduction <add>, %50, %cst_50 [0] : vector<4x128xf32> to vector<128xf32>
      %52 = vector.shape_cast %51 : vector<128xf32> to vector<1x128xf32>
      %c0_51 = arith.constant 0 : index
      %c0_52 = arith.constant 0 : index
      %c0_53 = arith.constant 0 : index
      %c0_54 = arith.constant 0 : index
      %53 = vector.load %arg7[%c0_51, %c0_52, %c0_53, %c0_54] : memref<1x1x1x128xf32, #tpu.memory_space<vmem>>, vector<1x1x1x128xf32>
      %54 = vector.shape_cast %53 : vector<1x1x1x128xf32> to vector<1x128xf32>
      %55 = vector.shape_cast %52 : vector<1x128xf32> to vector<1x1x1x128xf32>
      tpu.vector_store %arg7[%c0_51, %c0_52, %c0_53, %c0_54], %55 {strides = array<i32>} : memref<1x1x1x128xf32, #tpu.memory_space<vmem>>, vector<1x1x1x128xf32>,
      %56 = arith.mulf %50, %50 : vector<4x128xf32>
      %cst_55 = arith.constant dense<0.000000e+00> : vector<128xf32>
      %57 = vector.multi_reduction <add>, %56, %cst_55 [0] : vector<4x128xf32> to vector<128xf32>
      %58 = vector.shape_cast %57 : vector<128xf32> to vector<1x128xf32>
      %c0_56 = arith.constant 0 : index
      %c0_57 = arith.constant 0 : index
      %c0_58 = arith.constant 0 : index
      %c0_59 = arith.constant 0 : index
      %59 = vector.load %arg8[%c0_56, %c0_57, %c0_58, %c0_59] : memref<1x1x1x128xf32, #tpu.memory_space<vmem>>, vector<1x1x1x128xf32>
      %60 = vector.shape_cast %59 : vector<1x1x1x128xf32> to vector<1x128xf32>
      %61 = vector.shape_cast %58 : vector<1x128xf32> to vector<1x1x1x128xf32>
      tpu.vector_store %arg8[%c0_56, %c0_57, %c0_58, %c0_59], %61 {strides = array<i32>} : memref<1x1x1x128xf32, #tpu.memory_space<vmem>>, vector<1x1x1x128xf32>,
      %62 = arith.truncf %50 : vector<4x128xf32> to vector<4x128xbf16>
      %c0_60 = arith.constant 0 : index
      %c0_61 = arith.constant 0 : index
      %c0_62 = arith.constant 0 : index
      %c0_63 = arith.constant 0 : index
      %63 = vector.load %arg6[%c0_60, %c0_61, %c0_62, %c0_63] : memref<1x1x4x128xbf16, #tpu.memory_space<vmem>>, vector<1x1x4x128xbf16>
      %64 = vector.shape_cast %63 : vector<1x1x4x128xbf16> to vector<4x128xbf16>
      %65 = vector.shape_cast %62 : vector<4x128xbf16> to vector<1x1x4x128xbf16>
      tpu.vector_store %arg6[%c0_60, %c0_61, %c0_62, %c0_63], %65 {strides = array<i32>} : memref<1x1x4x128xbf16, #tpu.memory_space<vmem>>, vector<1x1x4x128xbf16>,
    } else {
    }
    return
  }
  func.func @transform_0(%arg0: i32, %arg1: i32, %arg2: i32) -> (i32, i32, i32, i32) {
    %c2_i32 = arith.constant 2 : i32
    %0 = arith.muli %arg1, %c2_i32 : i32
    %1 = arith.addi %0, %arg2 : i32
    %c0_i32 = arith.constant 0 : i32
    %c0_i32_0 = arith.constant 0 : i32
    %c0_i32_1 = arith.constant 0 : i32
    return %arg0, %1, %c0_i32, %c0_i32_0 : i32, i32, i32, i32
  }
  func.func @transform_1(%arg0: i32, %arg1: i32, %arg2: i32) -> (i32, i32, i32, i32) {
    %c2_i32 = arith.constant 2 : i32
    %0 = arith.muli %arg1, %c2_i32 : i32
    %1 = arith.addi %0, %arg2 : i32
    %c0_i32 = arith.constant 0 : i32
    %c0_i32_0 = arith.constant 0 : i32
    %c0_i32_1 = arith.constant 0 : i32
    return %arg0, %1, %c0_i32, %c0_i32_0 : i32, i32, i32, i32
  }
  func.func @transform_2(%arg0: i32, %arg1: i32, %arg2: i32) -> (i32, i32, i32) {
    %c0_i32 = arith.constant 0 : i32
    %c0_i32_0 = arith.constant 0 : i32
    %c0_i32_1 = arith.constant 0 : i32
    %c0_i32_2 = arith.constant 0 : i32
    return %c0_i32, %c0_i32_0, %c0_i32_1 : i32, i32, i32
  }
  func.func @transform_3(%arg0: i32, %arg1: i32, %arg2: i32) -> (i32, i32, i32, i32) {
    %c0_i32 = arith.constant 0 : i32
    %c0_i32_0 = arith.constant 0 : i32
    %c0_i32_1 = arith.constant 0 : i32
    return %arg0, %arg1, %c0_i32, %c0_i32_0 : i32, i32, i32, i32
  }
  func.func @transform_4(%arg0: i32, %arg1: i32, %arg2: i32) -> (i32, i32, i32, i32) {
    %c0_i32 = arith.constant 0 : i32
    %c0_i32_0 = arith.constant 0 : i32
    %c0_i32_1 = arith.constant 0 : i32
    return %arg0, %arg1, %c0_i32, %c0_i32_0 : i32, i32, i32, i32
  }
  func.func @transform_5(%arg0: i32, %arg1: i32, %arg2: i32) -> (i32, i32, i32, i32) {
    %c0_i32 = arith.constant 0 : i32
    %c0_i32_0 = arith.constant 0 : i32
    %c0_i32_1 = arith.constant 0 : i32
    return %arg0, %arg1, %c0_i32, %c0_i32_0 : i32, i32, i32, i32
  }
}

module attributes {stable_mosaic.version = 11 : i64} {
  func.func @_affine_lrelu_kernel(%arg0: i32, %arg1: i32, %arg2: memref<1x4x4x128xbf16, #tpu.memory_space<vmem>>, %arg3: memref<1x1x1x128xf32, #tpu.memory_space<vmem>>, %arg4: memref<1x1x1x128xf32, #tpu.memory_space<vmem>>, %arg5: memref<1x4x4x128xbf16, #tpu.memory_space<vmem>>) attributes {dimension_semantics = [#tpu.dimension_semantics<parallel>, #tpu.dimension_semantics<parallel>], iteration_bounds = array<i64: 2, 1>, scalar_prefetch = 0 : i64, scratch_operands = 0 : i64, tpu.core_type = #tpu.core_type<tc>, window_params = [{transform_indices = @transform_0, window_bounds = array<i64: 1, 4, 4, 128>}, {pipeline_mode = #tpu.pipeline_mode<synchronous>, transform_indices = @transform_1, window_bounds = array<i64: 1, 1, 1, 128>}, {pipeline_mode = #tpu.pipeline_mode<synchronous>, transform_indices = @transform_2, window_bounds = array<i64: 1, 1, 1, 128>}, {transform_indices = @transform_3, window_bounds = array<i64: 1, 4, 4, 128>}]} {
    %c0 = arith.constant 0 : index
    %c0_0 = arith.constant 0 : index
    %c0_1 = arith.constant 0 : index
    %c0_2 = arith.constant 0 : index
    %0 = vector.load %arg2[%c0, %c0_0, %c0_1, %c0_2] : memref<1x4x4x128xbf16, #tpu.memory_space<vmem>>, vector<1x4x4x128xbf16>
    %1 = arith.extf %0 : vector<1x4x4x128xbf16> to vector<1x4x4x128xf32>
    %c0_3 = arith.constant 0 : index
    %c0_4 = arith.constant 0 : index
    %c0_5 = arith.constant 0 : index
    %c0_6 = arith.constant 0 : index
    %2 = vector.load %arg3[%c0_3, %c0_4, %c0_5, %c0_6] : memref<1x1x1x128xf32, #tpu.memory_space<vmem>>, vector<1x1x1x128xf32>
    %3 = vector.broadcast %2 : vector<1x1x1x128xf32> to vector<1x4x4x128xf32>
    %4 = arith.mulf %1, %3 : vector<1x4x4x128xf32>
    %c0_7 = arith.constant 0 : index
    %c0_8 = arith.constant 0 : index
    %c0_9 = arith.constant 0 : index
    %c0_10 = arith.constant 0 : index
    %5 = vector.load %arg4[%c0_7, %c0_8, %c0_9, %c0_10] : memref<1x1x1x128xf32, #tpu.memory_space<vmem>>, vector<1x1x1x128xf32>
    %6 = vector.broadcast %5 : vector<1x1x1x128xf32> to vector<1x4x4x128xf32>
    %7 = arith.addf %4, %6 : vector<1x4x4x128xf32>
    %cst = arith.constant 0.000000e+00 : f32
    %8 = vector.broadcast %cst : f32 to vector<1x4x4x128xf32>
    %9 = arith.cmpf oge, %7, %8 : vector<1x4x4x128xf32>
    %cst_11 = arith.constant 2.000000e-01 : f32
    %10 = vector.broadcast %cst_11 : f32 to vector<1x4x4x128xf32>
    %11 = arith.mulf %10, %7 : vector<1x4x4x128xf32>
    %12 = arith.select %9, %7, %11 : vector<1x4x4x128xi1>, vector<1x4x4x128xf32>
    %13 = arith.truncf %12 : vector<1x4x4x128xf32> to vector<1x4x4x128xbf16>
    %c0_12 = arith.constant 0 : index
    %c0_13 = arith.constant 0 : index
    %c0_14 = arith.constant 0 : index
    %c0_15 = arith.constant 0 : index
    %14 = vector.load %arg5[%c0_12, %c0_13, %c0_14, %c0_15] : memref<1x4x4x128xbf16, #tpu.memory_space<vmem>>, vector<1x4x4x128xbf16>
    tpu.vector_store %arg5[%c0_12, %c0_13, %c0_14, %c0_15], %13 {strides = array<i32>} : memref<1x4x4x128xbf16, #tpu.memory_space<vmem>>, vector<1x4x4x128xbf16>,
    return
  }
  func.func @transform_0(%arg0: i32, %arg1: i32) -> (i32, i32, i32, i32) {
    %c0_i32 = arith.constant 0 : i32
    %c0_i32_0 = arith.constant 0 : i32
    %c0_i32_1 = arith.constant 0 : i32
    return %arg0, %arg1, %c0_i32, %c0_i32_0 : i32, i32, i32, i32
  }
  func.func @transform_1(%arg0: i32, %arg1: i32) -> (i32, i32, i32, i32) {
    %c0_i32 = arith.constant 0 : i32
    %c0_i32_0 = arith.constant 0 : i32
    %c0_i32_1 = arith.constant 0 : i32
    %c0_i32_2 = arith.constant 0 : i32
    %c0_i32_3 = arith.constant 0 : i32
    return %c0_i32, %c0_i32_0, %c0_i32_1, %c0_i32_2 : i32, i32, i32, i32
  }
  func.func @transform_2(%arg0: i32, %arg1: i32) -> (i32, i32, i32, i32) {
    %c0_i32 = arith.constant 0 : i32
    %c0_i32_0 = arith.constant 0 : i32
    %c0_i32_1 = arith.constant 0 : i32
    %c0_i32_2 = arith.constant 0 : i32
    %c0_i32_3 = arith.constant 0 : i32
    return %c0_i32, %c0_i32_0, %c0_i32_1, %c0_i32_2 : i32, i32, i32, i32
  }
  func.func @transform_3(%arg0: i32, %arg1: i32) -> (i32, i32, i32, i32) {
    %c0_i32 = arith.constant 0 : i32
    %c0_i32_0 = arith.constant 0 : i32
    %c0_i32_1 = arith.constant 0 : i32
    return %arg0, %arg1, %c0_i32, %c0_i32_0 : i32, i32, i32, i32
  }
}

module attributes {stable_mosaic.version = 11 : i64} {
  func.func @_affine_lrelu_kernel(%arg0: i32, %arg1: i32, %arg2: memref<1x3x3x128xbf16, #tpu.memory_space<vmem>>, %arg3: memref<1x1x1x128xf32, #tpu.memory_space<vmem>>, %arg4: memref<1x1x1x128xf32, #tpu.memory_space<vmem>>, %arg5: memref<1x3x3x128xbf16, #tpu.memory_space<vmem>>) attributes {dimension_semantics = [#tpu.dimension_semantics<parallel>, #tpu.dimension_semantics<parallel>], iteration_bounds = array<i64: 2, 1>, scalar_prefetch = 0 : i64, scratch_operands = 0 : i64, tpu.core_type = #tpu.core_type<tc>, window_params = [{transform_indices = @transform_0, window_bounds = array<i64: 1, 3, 3, 128>}, {pipeline_mode = #tpu.pipeline_mode<synchronous>, transform_indices = @transform_1, window_bounds = array<i64: 1, 1, 1, 128>}, {pipeline_mode = #tpu.pipeline_mode<synchronous>, transform_indices = @transform_2, window_bounds = array<i64: 1, 1, 1, 128>}, {transform_indices = @transform_3, window_bounds = array<i64: 1, 3, 3, 128>}]} {
    %c0 = arith.constant 0 : index
    %c0_0 = arith.constant 0 : index
    %c0_1 = arith.constant 0 : index
    %c0_2 = arith.constant 0 : index
    %0 = vector.load %arg2[%c0, %c0_0, %c0_1, %c0_2] : memref<1x3x3x128xbf16, #tpu.memory_space<vmem>>, vector<1x3x3x128xbf16>
    %1 = arith.extf %0 : vector<1x3x3x128xbf16> to vector<1x3x3x128xf32>
    %c0_3 = arith.constant 0 : index
    %c0_4 = arith.constant 0 : index
    %c0_5 = arith.constant 0 : index
    %c0_6 = arith.constant 0 : index
    %2 = vector.load %arg3[%c0_3, %c0_4, %c0_5, %c0_6] : memref<1x1x1x128xf32, #tpu.memory_space<vmem>>, vector<1x1x1x128xf32>
    %3 = vector.broadcast %2 : vector<1x1x1x128xf32> to vector<1x3x3x128xf32>
    %4 = arith.mulf %1, %3 : vector<1x3x3x128xf32>
    %c0_7 = arith.constant 0 : index
    %c0_8 = arith.constant 0 : index
    %c0_9 = arith.constant 0 : index
    %c0_10 = arith.constant 0 : index
    %5 = vector.load %arg4[%c0_7, %c0_8, %c0_9, %c0_10] : memref<1x1x1x128xf32, #tpu.memory_space<vmem>>, vector<1x1x1x128xf32>
    %6 = vector.broadcast %5 : vector<1x1x1x128xf32> to vector<1x3x3x128xf32>
    %7 = arith.addf %4, %6 : vector<1x3x3x128xf32>
    %cst = arith.constant 0.000000e+00 : f32
    %8 = vector.broadcast %cst : f32 to vector<1x3x3x128xf32>
    %9 = arith.cmpf oge, %7, %8 : vector<1x3x3x128xf32>
    %cst_11 = arith.constant 2.000000e-01 : f32
    %10 = vector.broadcast %cst_11 : f32 to vector<1x3x3x128xf32>
    %11 = arith.mulf %10, %7 : vector<1x3x3x128xf32>
    %12 = arith.select %9, %7, %11 : vector<1x3x3x128xi1>, vector<1x3x3x128xf32>
    %13 = arith.truncf %12 : vector<1x3x3x128xf32> to vector<1x3x3x128xbf16>
    %c0_12 = arith.constant 0 : index
    %c0_13 = arith.constant 0 : index
    %c0_14 = arith.constant 0 : index
    %c0_15 = arith.constant 0 : index
    %14 = vector.load %arg5[%c0_12, %c0_13, %c0_14, %c0_15] : memref<1x3x3x128xbf16, #tpu.memory_space<vmem>>, vector<1x3x3x128xbf16>
    tpu.vector_store %arg5[%c0_12, %c0_13, %c0_14, %c0_15], %13 {strides = array<i32>} : memref<1x3x3x128xbf16, #tpu.memory_space<vmem>>, vector<1x3x3x128xbf16>,
    return
  }
  func.func @transform_0(%arg0: i32, %arg1: i32) -> (i32, i32, i32, i32) {
    %c0_i32 = arith.constant 0 : i32
    %c0_i32_0 = arith.constant 0 : i32
    %c0_i32_1 = arith.constant 0 : i32
    return %arg0, %arg1, %c0_i32, %c0_i32_0 : i32, i32, i32, i32
  }
  func.func @transform_1(%arg0: i32, %arg1: i32) -> (i32, i32, i32, i32) {
    %c0_i32 = arith.constant 0 : i32
    %c0_i32_0 = arith.constant 0 : i32
    %c0_i32_1 = arith.constant 0 : i32
    %c0_i32_2 = arith.constant 0 : i32
    %c0_i32_3 = arith.constant 0 : i32
    return %c0_i32, %c0_i32_0, %c0_i32_1, %c0_i32_2 : i32, i32, i32, i32
  }
  func.func @transform_2(%arg0: i32, %arg1: i32) -> (i32, i32, i32, i32) {
    %c0_i32 = arith.constant 0 : i32
    %c0_i32_0 = arith.constant 0 : i32
    %c0_i32_1 = arith.constant 0 : i32
    %c0_i32_2 = arith.constant 0 : i32
    %c0_i32_3 = arith.constant 0 : i32
    return %c0_i32, %c0_i32_0, %c0_i32_1, %c0_i32_2 : i32, i32, i32, i32
  }
  func.func @transform_3(%arg0: i32, %arg1: i32) -> (i32, i32, i32, i32) {
    %c0_i32 = arith.constant 0 : i32
    %c0_i32_0 = arith.constant 0 : i32
    %c0_i32_1 = arith.constant 0 : i32
    return %arg0, %arg1, %c0_i32, %c0_i32_0 : i32, i32, i32, i32
  }
}

module attributes {stable_mosaic.version = 11 : i64} {
  func.func @_conv_row_kernel(%arg0: i32, %arg1: i32, %arg2: i32, %arg3: memref<1x1x6x128xbf16, #tpu.memory_space<vmem>>, %arg4: memref<16x128x128xbf16, #tpu.memory_space<vmem>>, %arg5: memref<1x1x3x128xbf16, #tpu.memory_space<vmem>>, %arg6: memref<1x1x1x128xf32, #tpu.memory_space<vmem>>, %arg7: memref<1x1x1x128xf32, #tpu.memory_space<vmem>>, %arg8: memref<3x128xf32, #tpu.memory_space<vmem>>) attributes {dimension_semantics = [#tpu.dimension_semantics<parallel>, #tpu.dimension_semantics<parallel>, #tpu.dimension_semantics<arbitrary>], iteration_bounds = array<i64: 2, 3, 4>, scalar_prefetch = 0 : i64, scratch_operands = 1 : i64, tpu.core_type = #tpu.core_type<tc>, window_params = [{transform_indices = @transform_0, window_bounds = array<i64: 1, 1, 6, 128>}, {pipeline_mode = #tpu.pipeline_mode<synchronous>, transform_indices = @transform_1, window_bounds = array<i64: 16, 128, 128>}, {transform_indices = @transform_2, window_bounds = array<i64: 1, 1, 3, 128>}, {transform_indices = @transform_3, window_bounds = array<i64: 1, 1, 1, 128>}, {transform_indices = @transform_4, window_bounds = array<i64: 1, 1, 1, 128>}]} {
    %c0_i32 = arith.constant 0 : i32
    %0 = arith.cmpi eq, %arg2, %c0_i32 : i32
    %1 = arith.extui %0 : i1 to i32
    %c0_i32_0 = arith.constant 0 : i32
    %2 = arith.cmpi ne, %1, %c0_i32_0 : i32
    scf.if %2 {
      %cst_46 = arith.constant 0.000000e+00 : f32
      %50 = vector.broadcast %cst_46 : f32 to vector<3x128xf32>
      %c0_47 = arith.constant 0 : index
      %c0_48 = arith.constant 0 : index
      %51 = vector.load %arg8[%c0_47, %c0_48] : memref<3x128xf32, #tpu.memory_space<vmem>>, vector<3x128xf32>
      tpu.vector_store %arg8[%c0_47, %c0_48], %50 {strides = array<i32>} : memref<3x128xf32, #tpu.memory_space<vmem>>, vector<3x128xf32>,
    } else {
    }
    %c0 = arith.constant 0 : index
    %c0_1 = arith.constant 0 : index
    %c0_2 = arith.constant 0 : index
    %c0_3 = arith.constant 0 : index
    %3 = vector.load %arg3[%c0, %c0_1, %c0_2, %c0_3] : memref<1x1x6x128xbf16, #tpu.memory_space<vmem>>, vector<1x1x3x128xbf16>
    %4 = vector.shape_cast %3 : vector<1x1x3x128xbf16> to vector<3x128xbf16>
    %c4_i32 = arith.constant 4 : i32
    %5 = arith.muli %arg2, %c4_i32 : i32
    %c0_i32_4 = arith.constant 0 : i32
    %6 = arith.addi %5, %c0_i32_4 : i32
    %7 = arith.index_cast %6 : i32 to index
    %c0_5 = arith.constant 0 : index
    %c0_6 = arith.constant 0 : index
    %8 = vector.load %arg4[%7, %c0_5, %c0_6] : memref<16x128x128xbf16, #tpu.memory_space<vmem>>, vector<1x128x128xbf16>
    %9 = vector.shape_cast %8 : vector<1x128x128xbf16> to vector<128x128xbf16>
    %c0_7 = arith.constant 0 : index
    %c0_8 = arith.constant 0 : index
    %10 = vector.load %arg8[%c0_7, %c0_8] : memref<3x128xf32, #tpu.memory_space<vmem>>, vector<3x128xf32>
    %cst = arith.constant dense<0.000000e+00> : vector<3x128xf32>
    %11 = tpu.matmul %4, %9, %cst {dimension_numbers = #tpu.dot_dimension_numbers<[1], [0], [0], [1], [0, 0, 1, 1], [], []>} : vector<3x128xbf16>, vector<128x128xbf16>, vector<3x128xf32> -> vector<3x128xf32>
    %12 = arith.addf %10, %11 : vector<3x128xf32>
    %c0_9 = arith.constant 0 : index
    %c0_10 = arith.constant 0 : index
    %13 = vector.load %arg8[%c0_9, %c0_10] : memref<3x128xf32, #tpu.memory_space<vmem>>, vector<3x128xf32>
    tpu.vector_store %arg8[%c0_9, %c0_10], %12 {strides = array<i32>} : memref<3x128xf32, #tpu.memory_space<vmem>>, vector<3x128xf32>,
    %c0_11 = arith.constant 0 : index
    %c0_12 = arith.constant 0 : index
    %c1 = arith.constant 1 : index
    %c0_13 = arith.constant 0 : index
    %14 = vector.load %arg3[%c0_11, %c0_12, %c1, %c0_13] : memref<1x1x6x128xbf16, #tpu.memory_space<vmem>>, vector<1x1x3x128xbf16>
    %15 = vector.shape_cast %14 : vector<1x1x3x128xbf16> to vector<3x128xbf16>
    %c4_i32_14 = arith.constant 4 : i32
    %16 = arith.muli %arg2, %c4_i32_14 : i32
    %c1_i32 = arith.constant 1 : i32
    %17 = arith.addi %16, %c1_i32 : i32
    %18 = arith.index_cast %17 : i32 to index
    %c0_15 = arith.constant 0 : index
    %c0_16 = arith.constant 0 : index
    %19 = vector.load %arg4[%18, %c0_15, %c0_16] : memref<16x128x128xbf16, #tpu.memory_space<vmem>>, vector<1x128x128xbf16>
    %20 = vector.shape_cast %19 : vector<1x128x128xbf16> to vector<128x128xbf16>
    %c0_17 = arith.constant 0 : index
    %c0_18 = arith.constant 0 : index
    %21 = vector.load %arg8[%c0_17, %c0_18] : memref<3x128xf32, #tpu.memory_space<vmem>>, vector<3x128xf32>
    %cst_19 = arith.constant dense<0.000000e+00> : vector<3x128xf32>
    %22 = tpu.matmul %15, %20, %cst_19 {dimension_numbers = #tpu.dot_dimension_numbers<[1], [0], [0], [1], [0, 0, 1, 1], [], []>} : vector<3x128xbf16>, vector<128x128xbf16>, vector<3x128xf32> -> vector<3x128xf32>
    %23 = arith.addf %21, %22 : vector<3x128xf32>
    %c0_20 = arith.constant 0 : index
    %c0_21 = arith.constant 0 : index
    %24 = vector.load %arg8[%c0_20, %c0_21] : memref<3x128xf32, #tpu.memory_space<vmem>>, vector<3x128xf32>
    tpu.vector_store %arg8[%c0_20, %c0_21], %23 {strides = array<i32>} : memref<3x128xf32, #tpu.memory_space<vmem>>, vector<3x128xf32>,
    %c0_22 = arith.constant 0 : index
    %c0_23 = arith.constant 0 : index
    %c2 = arith.constant 2 : index
    %c0_24 = arith.constant 0 : index
    %25 = vector.load %arg3[%c0_22, %c0_23, %c2, %c0_24] : memref<1x1x6x128xbf16, #tpu.memory_space<vmem>>, vector<1x1x3x128xbf16>
    %26 = vector.shape_cast %25 : vector<1x1x3x128xbf16> to vector<3x128xbf16>
    %c4_i32_25 = arith.constant 4 : i32
    %27 = arith.muli %arg2, %c4_i32_25 : i32
    %c2_i32 = arith.constant 2 : i32
    %28 = arith.addi %27, %c2_i32 : i32
    %29 = arith.index_cast %28 : i32 to index
    %c0_26 = arith.constant 0 : index
    %c0_27 = arith.constant 0 : index
    %30 = vector.load %arg4[%29, %c0_26, %c0_27] : memref<16x128x128xbf16, #tpu.memory_space<vmem>>, vector<1x128x128xbf16>
    %31 = vector.shape_cast %30 : vector<1x128x128xbf16> to vector<128x128xbf16>
    %c0_28 = arith.constant 0 : index
    %c0_29 = arith.constant 0 : index
    %32 = vector.load %arg8[%c0_28, %c0_29] : memref<3x128xf32, #tpu.memory_space<vmem>>, vector<3x128xf32>
    %cst_30 = arith.constant dense<0.000000e+00> : vector<3x128xf32>
    %33 = tpu.matmul %26, %31, %cst_30 {dimension_numbers = #tpu.dot_dimension_numbers<[1], [0], [0], [1], [0, 0, 1, 1], [], []>} : vector<3x128xbf16>, vector<128x128xbf16>, vector<3x128xf32> -> vector<3x128xf32>
    %34 = arith.addf %32, %33 : vector<3x128xf32>
    %c0_31 = arith.constant 0 : index
    %c0_32 = arith.constant 0 : index
    %35 = vector.load %arg8[%c0_31, %c0_32] : memref<3x128xf32, #tpu.memory_space<vmem>>, vector<3x128xf32>
    tpu.vector_store %arg8[%c0_31, %c0_32], %34 {strides = array<i32>} : memref<3x128xf32, #tpu.memory_space<vmem>>, vector<3x128xf32>,
    %c0_33 = arith.constant 0 : index
    %c0_34 = arith.constant 0 : index
    %c3 = arith.constant 3 : index
    %c0_35 = arith.constant 0 : index
    %36 = vector.load %arg3[%c0_33, %c0_34, %c3, %c0_35] : memref<1x1x6x128xbf16, #tpu.memory_space<vmem>>, vector<1x1x3x128xbf16>
    %37 = vector.shape_cast %36 : vector<1x1x3x128xbf16> to vector<3x128xbf16>
    %c4_i32_36 = arith.constant 4 : i32
    %38 = arith.muli %arg2, %c4_i32_36 : i32
    %c3_i32 = arith.constant 3 : i32
    %39 = arith.addi %38, %c3_i32 : i32
    %40 = arith.index_cast %39 : i32 to index
    %c0_37 = arith.constant 0 : index
    %c0_38 = arith.constant 0 : index
    %41 = vector.load %arg4[%40, %c0_37, %c0_38] : memref<16x128x128xbf16, #tpu.memory_space<vmem>>, vector<1x128x128xbf16>
    %42 = vector.shape_cast %41 : vector<1x128x128xbf16> to vector<128x128xbf16>
    %c0_39 = arith.constant 0 : index
    %c0_40 = arith.constant 0 : index
    %43 = vector.load %arg8[%c0_39, %c0_40] : memref<3x128xf32, #tpu.memory_space<vmem>>, vector<3x128xf32>
    %cst_41 = arith.constant dense<0.000000e+00> : vector<3x128xf32>
    %44 = tpu.matmul %37, %42, %cst_41 {dimension_numbers = #tpu.dot_dimension_numbers<[1], [0], [0], [1], [0, 0, 1, 1], [], []>} : vector<3x128xbf16>, vector<128x128xbf16>, vector<3x128xf32> -> vector<3x128xf32>
    %45 = arith.addf %43, %44 : vector<3x128xf32>
    %c0_42 = arith.constant 0 : index
    %c0_43 = arith.constant 0 : index
    %46 = vector.load %arg8[%c0_42, %c0_43] : memref<3x128xf32, #tpu.memory_space<vmem>>, vector<3x128xf32>
    tpu.vector_store %arg8[%c0_42, %c0_43], %45 {strides = array<i32>} : memref<3x128xf32, #tpu.memory_space<vmem>>, vector<3x128xf32>,
    %c3_i32_44 = arith.constant 3 : i32
    %47 = arith.cmpi eq, %arg2, %c3_i32_44 : i32
    %48 = arith.extui %47 : i1 to i32
    %c0_i32_45 = arith.constant 0 : i32
    %49 = arith.cmpi ne, %48, %c0_i32_45 : i32
    scf.if %49 {
      %c0_46 = arith.constant 0 : index
      %c0_47 = arith.constant 0 : index
      %50 = vector.load %arg8[%c0_46, %c0_47] : memref<3x128xf32, #tpu.memory_space<vmem>>, vector<3x128xf32>
      %cst_48 = arith.constant dense<0.000000e+00> : vector<128xf32>
      %51 = vector.multi_reduction <add>, %50, %cst_48 [0] : vector<3x128xf32> to vector<128xf32>
      %52 = vector.shape_cast %51 : vector<128xf32> to vector<1x128xf32>
      %c0_49 = arith.constant 0 : index
      %c0_50 = arith.constant 0 : index
      %c0_51 = arith.constant 0 : index
      %c0_52 = arith.constant 0 : index
      %53 = vector.load %arg6[%c0_49, %c0_50, %c0_51, %c0_52] : memref<1x1x1x128xf32, #tpu.memory_space<vmem>>, vector<1x1x1x128xf32>
      %54 = vector.shape_cast %53 : vector<1x1x1x128xf32> to vector<1x128xf32>
      %55 = vector.shape_cast %52 : vector<1x128xf32> to vector<1x1x1x128xf32>
      tpu.vector_store %arg6[%c0_49, %c0_50, %c0_51, %c0_52], %55 {strides = array<i32>} : memref<1x1x1x128xf32, #tpu.memory_space<vmem>>, vector<1x1x1x128xf32>,
      %56 = arith.mulf %50, %50 : vector<3x128xf32>
      %cst_53 = arith.constant dense<0.000000e+00> : vector<128xf32>
      %57 = vector.multi_reduction <add>, %56, %cst_53 [0] : vector<3x128xf32> to vector<128xf32>
      %58 = vector.shape_cast %57 : vector<128xf32> to vector<1x128xf32>
      %c0_54 = arith.constant 0 : index
      %c0_55 = arith.constant 0 : index
      %c0_56 = arith.constant 0 : index
      %c0_57 = arith.constant 0 : index
      %59 = vector.load %arg7[%c0_54, %c0_55, %c0_56, %c0_57] : memref<1x1x1x128xf32, #tpu.memory_space<vmem>>, vector<1x1x1x128xf32>
      %60 = vector.shape_cast %59 : vector<1x1x1x128xf32> to vector<1x128xf32>
      %61 = vector.shape_cast %58 : vector<1x128xf32> to vector<1x1x1x128xf32>
      tpu.vector_store %arg7[%c0_54, %c0_55, %c0_56, %c0_57], %61 {strides = array<i32>} : memref<1x1x1x128xf32, #tpu.memory_space<vmem>>, vector<1x1x1x128xf32>,
      %62 = arith.truncf %50 : vector<3x128xf32> to vector<3x128xbf16>
      %c0_58 = arith.constant 0 : index
      %c0_59 = arith.constant 0 : index
      %c0_60 = arith.constant 0 : index
      %c0_61 = arith.constant 0 : index
      %63 = vector.load %arg5[%c0_58, %c0_59, %c0_60, %c0_61] : memref<1x1x3x128xbf16, #tpu.memory_space<vmem>>, vector<1x1x3x128xbf16>
      %64 = vector.shape_cast %63 : vector<1x1x3x128xbf16> to vector<3x128xbf16>
      %65 = vector.shape_cast %62 : vector<3x128xbf16> to vector<1x1x3x128xbf16>
      tpu.vector_store %arg5[%c0_58, %c0_59, %c0_60, %c0_61], %65 {strides = array<i32>} : memref<1x1x3x128xbf16, #tpu.memory_space<vmem>>, vector<1x1x3x128xbf16>,
    } else {
    }
    return
  }
  func.func @transform_0(%arg0: i32, %arg1: i32, %arg2: i32) -> (i32, i32, i32, i32) {
    %c1_i32 = arith.constant 1 : i32
    %0 = arith.muli %arg1, %c1_i32 : i32
    %1 = arith.addi %0, %arg2 : i32
    %c0_i32 = arith.constant 0 : i32
    %c0_i32_0 = arith.constant 0 : i32
    %c0_i32_1 = arith.constant 0 : i32
    return %arg0, %1, %c0_i32, %c0_i32_0 : i32, i32, i32, i32
  }
  func.func @transform_1(%arg0: i32, %arg1: i32, %arg2: i32) -> (i32, i32, i32) {
    %c0_i32 = arith.constant 0 : i32
    %c0_i32_0 = arith.constant 0 : i32
    %c0_i32_1 = arith.constant 0 : i32
    %c0_i32_2 = arith.constant 0 : i32
    return %c0_i32, %c0_i32_0, %c0_i32_1 : i32, i32, i32
  }
  func.func @transform_2(%arg0: i32, %arg1: i32, %arg2: i32) -> (i32, i32, i32, i32) {
    %c0_i32 = arith.constant 0 : i32
    %c0_i32_0 = arith.constant 0 : i32
    %c0_i32_1 = arith.constant 0 : i32
    return %arg0, %arg1, %c0_i32, %c0_i32_0 : i32, i32, i32, i32
  }
  func.func @transform_3(%arg0: i32, %arg1: i32, %arg2: i32) -> (i32, i32, i32, i32) {
    %c0_i32 = arith.constant 0 : i32
    %c0_i32_0 = arith.constant 0 : i32
    %c0_i32_1 = arith.constant 0 : i32
    return %arg0, %arg1, %c0_i32, %c0_i32_0 : i32, i32, i32, i32
  }
  func.func @transform_4(%arg0: i32, %arg1: i32, %arg2: i32) -> (i32, i32, i32, i32) {
    %c0_i32 = arith.constant 0 : i32
    %c0_i32_0 = arith.constant 0 : i32
    %c0_i32_1 = arith.constant 0 : i32
    return %arg0, %arg1, %c0_i32, %c0_i32_0 : i32, i32, i32, i32
  }
}

module attributes {stable_mosaic.version = 11 : i64} {
  func.func @_conv_row_kernel(%arg0: i32, %arg1: i32, %arg2: i32, %arg3: memref<1x1x5x128xbf16, #tpu.memory_space<vmem>>, %arg4: memref<16x128x128xbf16, #tpu.memory_space<vmem>>, %arg5: memref<1x128xf32, #tpu.memory_space<vmem>>, %arg6: memref<1x1x2x128xf32, #tpu.memory_space<vmem>>, %arg7: memref<2x128xf32, #tpu.memory_space<vmem>>) attributes {dimension_semantics = [#tpu.dimension_semantics<parallel>, #tpu.dimension_semantics<parallel>, #tpu.dimension_semantics<arbitrary>], iteration_bounds = array<i64: 2, 2, 4>, scalar_prefetch = 0 : i64, scratch_operands = 1 : i64, tpu.core_type = #tpu.core_type<tc>, window_params = [{transform_indices = @transform_0, window_bounds = array<i64: 1, 1, 5, 128>}, {pipeline_mode = #tpu.pipeline_mode<synchronous>, transform_indices = @transform_1, window_bounds = array<i64: 16, 128, 128>}, {pipeline_mode = #tpu.pipeline_mode<synchronous>, transform_indices = @transform_2, window_bounds = array<i64: 1, 128>}, {transform_indices = @transform_3, window_bounds = array<i64: 1, 1, 2, 128>}]} {
    %c0_i32 = arith.constant 0 : i32
    %0 = arith.cmpi eq, %arg2, %c0_i32 : i32
    %1 = arith.extui %0 : i1 to i32
    %c0_i32_0 = arith.constant 0 : i32
    %2 = arith.cmpi ne, %1, %c0_i32_0 : i32
    scf.if %2 {
      %cst_46 = arith.constant 0.000000e+00 : f32
      %50 = vector.broadcast %cst_46 : f32 to vector<2x128xf32>
      %c0_47 = arith.constant 0 : index
      %c0_48 = arith.constant 0 : index
      %51 = vector.load %arg7[%c0_47, %c0_48] : memref<2x128xf32, #tpu.memory_space<vmem>>, vector<2x128xf32>
      tpu.vector_store %arg7[%c0_47, %c0_48], %50 {strides = array<i32>} : memref<2x128xf32, #tpu.memory_space<vmem>>, vector<2x128xf32>,
    } else {
    }
    %c0 = arith.constant 0 : index
    %c0_1 = arith.constant 0 : index
    %c0_2 = arith.constant 0 : index
    %c0_3 = arith.constant 0 : index
    %3 = vector.load %arg3[%c0, %c0_1, %c0_2, %c0_3] : memref<1x1x5x128xbf16, #tpu.memory_space<vmem>>, vector<1x1x2x128xbf16>
    %4 = vector.shape_cast %3 : vector<1x1x2x128xbf16> to vector<2x128xbf16>
    %c4_i32 = arith.constant 4 : i32
    %5 = arith.muli %arg2, %c4_i32 : i32
    %c0_i32_4 = arith.constant 0 : i32
    %6 = arith.addi %5, %c0_i32_4 : i32
    %7 = arith.index_cast %6 : i32 to index
    %c0_5 = arith.constant 0 : index
    %c0_6 = arith.constant 0 : index
    %8 = vector.load %arg4[%7, %c0_5, %c0_6] : memref<16x128x128xbf16, #tpu.memory_space<vmem>>, vector<1x128x128xbf16>
    %9 = vector.shape_cast %8 : vector<1x128x128xbf16> to vector<128x128xbf16>
    %c0_7 = arith.constant 0 : index
    %c0_8 = arith.constant 0 : index
    %10 = vector.load %arg7[%c0_7, %c0_8] : memref<2x128xf32, #tpu.memory_space<vmem>>, vector<2x128xf32>
    %cst = arith.constant dense<0.000000e+00> : vector<2x128xf32>
    %11 = tpu.matmul %4, %9, %cst {dimension_numbers = #tpu.dot_dimension_numbers<[1], [0], [0], [1], [0, 0, 1, 1], [], []>} : vector<2x128xbf16>, vector<128x128xbf16>, vector<2x128xf32> -> vector<2x128xf32>
    %12 = arith.addf %10, %11 : vector<2x128xf32>
    %c0_9 = arith.constant 0 : index
    %c0_10 = arith.constant 0 : index
    %13 = vector.load %arg7[%c0_9, %c0_10] : memref<2x128xf32, #tpu.memory_space<vmem>>, vector<2x128xf32>
    tpu.vector_store %arg7[%c0_9, %c0_10], %12 {strides = array<i32>} : memref<2x128xf32, #tpu.memory_space<vmem>>, vector<2x128xf32>,
    %c0_11 = arith.constant 0 : index
    %c0_12 = arith.constant 0 : index
    %c1 = arith.constant 1 : index
    %c0_13 = arith.constant 0 : index
    %14 = vector.load %arg3[%c0_11, %c0_12, %c1, %c0_13] : memref<1x1x5x128xbf16, #tpu.memory_space<vmem>>, vector<1x1x2x128xbf16>
    %15 = vector.shape_cast %14 : vector<1x1x2x128xbf16> to vector<2x128xbf16>
    %c4_i32_14 = arith.constant 4 : i32
    %16 = arith.muli %arg2, %c4_i32_14 : i32
    %c1_i32 = arith.constant 1 : i32
    %17 = arith.addi %16, %c1_i32 : i32
    %18 = arith.index_cast %17 : i32 to index
    %c0_15 = arith.constant 0 : index
    %c0_16 = arith.constant 0 : index
    %19 = vector.load %arg4[%18, %c0_15, %c0_16] : memref<16x128x128xbf16, #tpu.memory_space<vmem>>, vector<1x128x128xbf16>
    %20 = vector.shape_cast %19 : vector<1x128x128xbf16> to vector<128x128xbf16>
    %c0_17 = arith.constant 0 : index
    %c0_18 = arith.constant 0 : index
    %21 = vector.load %arg7[%c0_17, %c0_18] : memref<2x128xf32, #tpu.memory_space<vmem>>, vector<2x128xf32>
    %cst_19 = arith.constant dense<0.000000e+00> : vector<2x128xf32>
    %22 = tpu.matmul %15, %20, %cst_19 {dimension_numbers = #tpu.dot_dimension_numbers<[1], [0], [0], [1], [0, 0, 1, 1], [], []>} : vector<2x128xbf16>, vector<128x128xbf16>, vector<2x128xf32> -> vector<2x128xf32>
    %23 = arith.addf %21, %22 : vector<2x128xf32>
    %c0_20 = arith.constant 0 : index
    %c0_21 = arith.constant 0 : index
    %24 = vector.load %arg7[%c0_20, %c0_21] : memref<2x128xf32, #tpu.memory_space<vmem>>, vector<2x128xf32>
    tpu.vector_store %arg7[%c0_20, %c0_21], %23 {strides = array<i32>} : memref<2x128xf32, #tpu.memory_space<vmem>>, vector<2x128xf32>,
    %c0_22 = arith.constant 0 : index
    %c0_23 = arith.constant 0 : index
    %c2 = arith.constant 2 : index
    %c0_24 = arith.constant 0 : index
    %25 = vector.load %arg3[%c0_22, %c0_23, %c2, %c0_24] : memref<1x1x5x128xbf16, #tpu.memory_space<vmem>>, vector<1x1x2x128xbf16>
    %26 = vector.shape_cast %25 : vector<1x1x2x128xbf16> to vector<2x128xbf16>
    %c4_i32_25 = arith.constant 4 : i32
    %27 = arith.muli %arg2, %c4_i32_25 : i32
    %c2_i32 = arith.constant 2 : i32
    %28 = arith.addi %27, %c2_i32 : i32
    %29 = arith.index_cast %28 : i32 to index
    %c0_26 = arith.constant 0 : index
    %c0_27 = arith.constant 0 : index
    %30 = vector.load %arg4[%29, %c0_26, %c0_27] : memref<16x128x128xbf16, #tpu.memory_space<vmem>>, vector<1x128x128xbf16>
    %31 = vector.shape_cast %30 : vector<1x128x128xbf16> to vector<128x128xbf16>
    %c0_28 = arith.constant 0 : index
    %c0_29 = arith.constant 0 : index
    %32 = vector.load %arg7[%c0_28, %c0_29] : memref<2x128xf32, #tpu.memory_space<vmem>>, vector<2x128xf32>
    %cst_30 = arith.constant dense<0.000000e+00> : vector<2x128xf32>
    %33 = tpu.matmul %26, %31, %cst_30 {dimension_numbers = #tpu.dot_dimension_numbers<[1], [0], [0], [1], [0, 0, 1, 1], [], []>} : vector<2x128xbf16>, vector<128x128xbf16>, vector<2x128xf32> -> vector<2x128xf32>
    %34 = arith.addf %32, %33 : vector<2x128xf32>
    %c0_31 = arith.constant 0 : index
    %c0_32 = arith.constant 0 : index
    %35 = vector.load %arg7[%c0_31, %c0_32] : memref<2x128xf32, #tpu.memory_space<vmem>>, vector<2x128xf32>
    tpu.vector_store %arg7[%c0_31, %c0_32], %34 {strides = array<i32>} : memref<2x128xf32, #tpu.memory_space<vmem>>, vector<2x128xf32>,
    %c0_33 = arith.constant 0 : index
    %c0_34 = arith.constant 0 : index
    %c3 = arith.constant 3 : index
    %c0_35 = arith.constant 0 : index
    %36 = vector.load %arg3[%c0_33, %c0_34, %c3, %c0_35] : memref<1x1x5x128xbf16, #tpu.memory_space<vmem>>, vector<1x1x2x128xbf16>
    %37 = vector.shape_cast %36 : vector<1x1x2x128xbf16> to vector<2x128xbf16>
    %c4_i32_36 = arith.constant 4 : i32
    %38 = arith.muli %arg2, %c4_i32_36 : i32
    %c3_i32 = arith.constant 3 : i32
    %39 = arith.addi %38, %c3_i32 : i32
    %40 = arith.index_cast %39 : i32 to index
    %c0_37 = arith.constant 0 : index
    %c0_38 = arith.constant 0 : index
    %41 = vector.load %arg4[%40, %c0_37, %c0_38] : memref<16x128x128xbf16, #tpu.memory_space<vmem>>, vector<1x128x128xbf16>
    %42 = vector.shape_cast %41 : vector<1x128x128xbf16> to vector<128x128xbf16>
    %c0_39 = arith.constant 0 : index
    %c0_40 = arith.constant 0 : index
    %43 = vector.load %arg7[%c0_39, %c0_40] : memref<2x128xf32, #tpu.memory_space<vmem>>, vector<2x128xf32>
    %cst_41 = arith.constant dense<0.000000e+00> : vector<2x128xf32>
    %44 = tpu.matmul %37, %42, %cst_41 {dimension_numbers = #tpu.dot_dimension_numbers<[1], [0], [0], [1], [0, 0, 1, 1], [], []>} : vector<2x128xbf16>, vector<128x128xbf16>, vector<2x128xf32> -> vector<2x128xf32>
    %45 = arith.addf %43, %44 : vector<2x128xf32>
    %c0_42 = arith.constant 0 : index
    %c0_43 = arith.constant 0 : index
    %46 = vector.load %arg7[%c0_42, %c0_43] : memref<2x128xf32, #tpu.memory_space<vmem>>, vector<2x128xf32>
    tpu.vector_store %arg7[%c0_42, %c0_43], %45 {strides = array<i32>} : memref<2x128xf32, #tpu.memory_space<vmem>>, vector<2x128xf32>,
    %c3_i32_44 = arith.constant 3 : i32
    %47 = arith.cmpi eq, %arg2, %c3_i32_44 : i32
    %48 = arith.extui %47 : i1 to i32
    %c0_i32_45 = arith.constant 0 : i32
    %49 = arith.cmpi ne, %48, %c0_i32_45 : i32
    scf.if %49 {
      %c0_46 = arith.constant 0 : index
      %c0_47 = arith.constant 0 : index
      %50 = vector.load %arg7[%c0_46, %c0_47] : memref<2x128xf32, #tpu.memory_space<vmem>>, vector<2x128xf32>
      %c0_48 = arith.constant 0 : index
      %c0_49 = arith.constant 0 : index
      %51 = vector.load %arg5[%c0_48, %c0_49] : memref<1x128xf32, #tpu.memory_space<vmem>>, vector<1x128xf32>
      %52 = vector.broadcast %51 : vector<1x128xf32> to vector<2x128xf32>
      %53 = arith.addf %50, %52 : vector<2x128xf32>
      %c0_50 = arith.constant 0 : index
      %c0_51 = arith.constant 0 : index
      %c0_52 = arith.constant 0 : index
      %c0_53 = arith.constant 0 : index
      %54 = vector.load %arg6[%c0_50, %c0_51, %c0_52, %c0_53] : memref<1x1x2x128xf32, #tpu.memory_space<vmem>>, vector<1x1x2x128xf32>
      %55 = vector.shape_cast %54 : vector<1x1x2x128xf32> to vector<2x128xf32>
      %56 = vector.shape_cast %53 : vector<2x128xf32> to vector<1x1x2x128xf32>
      tpu.vector_store %arg6[%c0_50, %c0_51, %c0_52, %c0_53], %56 {strides = array<i32>} : memref<1x1x2x128xf32, #tpu.memory_space<vmem>>, vector<1x1x2x128xf32>,
    } else {
    }
    return
  }
  func.func @transform_0(%arg0: i32, %arg1: i32, %arg2: i32) -> (i32, i32, i32, i32) {
    %c1_i32 = arith.constant 1 : i32
    %0 = arith.muli %arg1, %c1_i32 : i32
    %1 = arith.addi %0, %arg2 : i32
    %c0_i32 = arith.constant 0 : i32
    %c0_i32_0 = arith.constant 0 : i32
    %c0_i32_1 = arith.constant 0 : i32
    return %arg0, %1, %c0_i32, %c0_i32_0 : i32, i32, i32, i32
  }
  func.func @transform_1(%arg0: i32, %arg1: i32, %arg2: i32) -> (i32, i32, i32) {
    %c0_i32 = arith.constant 0 : i32
    %c0_i32_0 = arith.constant 0 : i32
    %c0_i32_1 = arith.constant 0 : i32
    %c0_i32_2 = arith.constant 0 : i32
    return %c0_i32, %c0_i32_0, %c0_i32_1 : i32, i32, i32
  }
  func.func @transform_2(%arg0: i32, %arg1: i32, %arg2: i32) -> (i32, i32) {
    %c0_i32 = arith.constant 0 : i32
    %c0_i32_0 = arith.constant 0 : i32
    %c0_i32_1 = arith.constant 0 : i32
    return %c0_i32, %c0_i32_0 : i32, i32
  }
  func.func @transform_3(%arg0: i32, %arg1: i32, %arg2: i32) -> (i32, i32, i32, i32) {
    %c0_i32 = arith.constant 0 : i32
    %c0_i32_0 = arith.constant 0 : i32
    %c0_i32_1 = arith.constant 0 : i32
    return %arg0, %arg1, %c0_i32, %c0_i32_0 : i32, i32, i32, i32
  }
}

</mosaic_0001>

<bundles_post_ra>
// kernel: _lambda_.8
= control target key start
LH: loop header
LB: loop body
LE: loop exit
PB: predicated region body
PF: predicated region fallthrough
CT: control target
= control target key end

     0   :  { %s857_s15 = smov 0   ;;  %s859_s16 = smov 0   ;;  %s962_s0 = inlined_call_operand.vmem [shape: bf16[2,34,17,8], index: 0, kind: input, shape index: {}]   ;;  %s963_s1 = inlined_call_operand.vmem [shape: bf16[2,34,17,8], index: 1, kind: input, shape index: {}]   ;;  %s964_s2 = inlined_call_operand.vmem [shape: bf16[16,8,128], index: 2, kind: input, shape index: {}]   ;;  %s965_s3 = inlined_call_operand.vmem [shape: f32[1,128], index: 3, kind: input, shape index: {}]   ;;  %s966_s4 = inlined_call_operand.vmem [shape: bf16[2,16,16,128], index: 4, kind: output, shape index: {}]  }
   0x1   :  { %s861_s17 = smov 0   ;;  %s863_s18 = smov 0  }
   0x2   :  { %s865_s19 = smov 0   ;;  %s867_s20 = smov 0  }
   0x3   :  { %s869_s21 = smov 0  }
   0x4 LB: > { %s26_s22 = sadd.s32 1, %s817_s18  ;;  %s29_s23 = sadd.s32 1, %s821_s19  ;;  %s829_s21 = sphi %s869_s21, %s14_s21   ;;  %s825_s20 = sphi %s867_s20, %s974_s20   ;;  %s821_s19 = sphi %s865_s19, %s973_s19   ;;  %s817_s18 = sphi %s863_s18, %s972_s18   ;;  %s813_s17 = sphi %s861_s17, %s971_s17   ;;  %s809_s16 = sphi %s859_s16, %s970_s16   ;;  %s805_s15 = sphi %s857_s15, %s969_s15  }
   0x5   : > { %p27_p0 = scmp.ge.s32.totalorder %s26_s22, 4  ;;  %p659_p1 = scmp.ge.s32.totalorder %s829_s21, 1 }
   0x6   : > { %p221_p2 = scmp.lt.s32.totalorder %s829_s21, 129  ;;  %s33_s24 = sadd.s32 1, %s825_s20 }
   0x7   : > { %s976_s22 = smov (%p27_p0, %s26_s22), 0  ;;  %s978_s23 = smov (!%p27_p0, %s29_s23), %s821_s19 }
   0x8   : > { %p222_p3 = pnand %p659_p1, %p221_p2  ;;  %p31_p4 = scmp.ge.s32.totalorder %s978_s23, 16 }
   0x9   : > { %s660_s25 = sshll.u32 (!%p222_p3), %s809_s16, 1  ;;  %p270_p6 = scmp.lt.s32.totalorder (!%p222_p3), %s813_s17, 1 }
   0xa   : > { %s980_s23 = smov (%p31_p4, %s978_s23), 0  ;;  %s982_s24 = smov (!%p31_p4, %s33_s24), %s825_s20 }
   0xb   : > { %p35_p5 = scmp.ge.s32.totalorder %s982_s24, 2  ;;  %225 = sbr.rel (%p222_p3) target bundleno = 197 (0xc5), region = 36 }
   0xc   : > { %s269_s26 = sadd.s32 (!%p222_p3), %s805_s15, %s660_s25  ;;  %p296_p7 = scmp.lt.s32.totalorder (!%p222_p3), %s809_s16, 15 }
   0xd   : > { %s984_s24 = smov (%p35_p5, %s982_s24), 0  ;;  %p272_p8 = scmp.lt.s32.totalorder (!%p222_p3), %s269_s26, 33 }
   0xe   : > { %967 = sst [smem:[#allocation3_spill]] %s984_s24  ;;  %p667_p9 = scmp.ne.s32.totalorder (!%p222_p3), %s805_s15, 0 }
  0x10   : > { %s986_s17 = smov (!%p270_p6, %s813_s17), 1  ;;  %s988_s26 = smov (!%p272_p8, %s269_s26), 33 }
  0x11   : > { %s716_s27 = smul.u32 102, %s986_s17  ;;  %s665_s28 = sshll.u32 %s986_s17, 5 }
  0x12   : > { %s990_s16 = smov (!%p296_p7, %s809_s16), 15  ;;  %s715_s29 = smul.u32 3, %s988_s26 }
  0x13   : > { %s664_s30 = sshll.u32 %s990_s16, 1  ;;  %307 = sbr.rel (%p667_p9) target bundleno = 27 (0x1b), region = 40 }
  0x14   : > { %s276_s5 = sadd.s32 %s716_s27, %s715_s29  ;;  %s300_s6 = sadd.s32 %s665_s28, %s664_s30 }
  0x15   : > { %s661_s7 = sshll.u32 %s276_s5, 2  ;;  %s666_s8 = sshll.u32 %s300_s6, 2 }
  0x16   : > { %s278_s11 = scalar_lea.vmem %s962_s0, %s661_s7  ;;  %s913_s14 = scalar_lea.vmem %s963_s1, %s661_s7 }
  0x17   : > { %s918_s17 = scalar_lea.vmem %s966_s4, %s666_s8 }
  0x18   : > { %v831_v0 = vmov 0.0  }
  0x19   : > { %308 = vst [vmem:[#allocation2] sm:$0xff] %v831_v0 }
  0x1a   : > { %309 = vst [vmem:[#allocation2 + $0x8] sm:$0xff] %v831_v0 }
  0x1b PF: > { %s703_s16 = sshll.u32 %s805_s15, 4  ;;  %vm327_vm0 = vcmask 1043456   ;;  %v706_v1 = vld [vmem:[%s278_s11] sm:$0xff]  ;;  %vm323_vm1 = vcmask 64512   ;;  %v388_v3 = vld [vmem:[%s278_s11 + $0x8] sm:$0x1] }
  0x1c   : > { %s314_s28 = scalar_lea.vmem %s964_s2, %s703_s16  ;;  %v702_v2 = vld [vmem:[%s278_s11] sm:$0xff]  ;;  %v400_v8 = vunpack.c.l.b16 %v388_v3  ;;  %v405_v15 = vshrl.u32 %v706_v1, 16  ;;  %v407_v16 = vshll.u32 %v706_v1, 16  ;;  %v442_v18 = vld [vmem:[%s913_s14 + $0x8] sm:$0x1]  ;;  %p699_p10 = scmp.ne.s32.totalorder %s805_s15, 3 }
  0x1d   : > { %v708_v4 = vld [vmem:[%s913_s14] sm:$0xff]  ;;  %v685_v7 = vld [vmem:[%s314_s28 + $0x8] sm:$0xf]  ;;  %v693_v13 = vld [vmem:[%s314_s28 + $0xc] sm:$0xf]  ;;  %v454_v19 = vunpack.c.l.b16 %v442_v18 }
  0x1e   : > { %v315_v5 = vld [vmem:[%s314_s28] sm:$0xf]  ;;  %v677_v6 = vld [vmem:[%s314_s28 + $0x4] sm:$0xf]  ;;  %v420_v12 = vsel %vm327_vm0, %v685_v7, 0  ;;  %v402_v14 = vpack.c.b16 %v400_v8, %v400_v8  ;;  %v473_v17 = vsel %vm327_vm0, %v693_v13, 0 }
  0x1f   : > { %v329_v9 = vsel %vm327_vm0, %v315_v5, 0  ;;  %v366_v10 = vsel %vm327_vm0, %v677_v6, 0  ;;  %v704_v11 = vld [vmem:[%s913_s14] sm:$0xff]  ;;  %429 = vmatpush.bf16.msra.mxu2 %v420_v12  ;;  %482 = vmatpush.bf16.msra.mxu3 %v473_v17  ;;  %v458_v20 = vshrl.u32 %v708_v4, 16  ;;  %v460_v21 = vshll.u32 %v708_v4, 16 }
  0x20   : > { %338 = vmatpush.bf16.msra.mxu0 %v329_v9  ;;  %375 = vmatpush.bf16.msra.mxu1 %v366_v10  ;;  %v409_v22 = vrot.slane %v407_v16, 1  ;;  %v412_v23 = vshll.u32 %v402_v14, 16  ;;  %vm403_vm2 = vsmask.f32 7424  ;;  %v456_v24 = vpack.c.b16 %v454_v19, %v454_v19  ;;  %v316_v33 = vld [vmem:[#allocation2] sm:$0xff] }
  0x21   : > { %v462_v25 = vrot.slane %v460_v21, 1  ;;  %v317_v38 = vld [vmem:[#allocation2 + $0x8] sm:$0xff] }
  0x22   : > { %v410_v26 = vor.u32 %v409_v22, %v405_v15  ;;  %v414_v27 = vrot.slane %v412_v23, 1  ;;  %v465_v29 = vshll.u32 %v456_v24, 16 }
  0x23   : > { %674 = vmatmul.msk.bf16.vlgmr.msra.gmra.mxu0 %vm323_vm1, %v702_v2  ;;  %682 = vmatmul.msk.bf16.vlgmr.msra.gmra.mxu1 %vm323_vm1, %v704_v11  ;;  %v463_v28 = vor.u32 %v462_v25, %v458_v20 }
  0x24   : > { %v415_v30 = vsel %vm403_vm2, %v410_v26, %v414_v27  ;;  %v467_v31 = vrot.slane %v465_v29, 1 }
  0x25   : > { %690 = vmatmul.msk.bf16.vlgmr.msra.gmra.mxu2 %vm323_vm1, %v415_v30 }
  0x26   : > { %v468_v32 = vsel %vm403_vm2, %v463_v28, %v467_v31 }
  0x27   : > { %698 = vmatmul.msk.bf16.vlgmr.msra.gmra.mxu3 %vm323_vm1, %v468_v32 }
  0xa0   : > { %v340_v34 = vpop.f32.mrf.mxu0  ;;  %v377_v36 = vpop.f32.mrf.mxu1 }
  0xa1   : > { %v345_v35 = vadd.f32 %v340_v34, %v316_v33 }
  0xa3   : > { %v382_v37 = vadd.f32 %v377_v36, %v345_v35 }
  0xa8   : > { %v342_v39 = vpop.f32.mrf.mxu0  ;;  %v431_v40 = vpop.f32.mrf.mxu2 }
  0xa9   : > { %v436_v41 = vadd.f32 %v431_v40, %v382_v37  ;;  %v346_v42 = vadd.f32 %v342_v39, %v317_v38  ;;  %v379_v45 = vpop.f32.mrf.mxu1 }
  0xaa   : > { %v484_v43 = vpop.f32.mrf.mxu3 }
  0xab   : > { %v489_v44 = vadd.f32 %v484_v43, %v436_v41  ;;  %v383_v46 = vadd.f32 %v379_v45, %v346_v42 }
  0xad   : > { %491 = vst [vmem:[#allocation2] sm:$0xff] %v489_v44 }
  0xb0   : > { %v433_v47 = vpop.f32.mrf.mxu2 }
  0xb1   : > { %v437_v48 = vadd.f32 %v433_v47, %v383_v46  ;;  %496 = sbr.rel (%p699_p10) target bundleno = 197 (0xc5), region = 44 }
  0xb2   : > { %v486_v49 = vpop.f32.mrf.mxu3 }
  0xb3   : > { %v490_v50 = vadd.f32 %v486_v49, %v437_v48 }
  0xb5   : > { %492 = vst [vmem:[#allocation2 + $0x8] sm:$0xff] %v490_v50 }
  0xb6   : > { %v497_v51 = vld [vmem:[#allocation2] sm:$0xff] }
  0xb7   : > { %v774_v53 = vld [vmem:[%s965_s3] ss:$0 sm:$0xff] }
  0xb8   : > { %v503_v54 = vadd.f32 %v774_v53, %v497_v51 }
  0xba   : > { %vm505_vm3 = vcmp.ge.f32.partialorder %v503_v54, 0.0  ;;  %v507_v56 = vmul.f32 0.2, %v503_v54 }
  0xbc   : > { %v498_v52 = vld [vmem:[#allocation2 + $0x8] sm:$0xff]  ;;  %v509_v58 = vsel %vm505_vm3, %v503_v54, %v507_v56 }
  0xbd   : > { %v504_v55 = vadd.f32 %v774_v53, %v498_v52 }
  0xbf   : > { %vm506_vm4 = vcmp.ge.f32.partialorder %v504_v55, 0.0  ;;  %v508_v57 = vmul.f32 0.2, %v504_v55 }
  0xc1   : > { %v510_v59 = vsel %vm506_vm4, %v504_v55, %v508_v57 }
  0xc2   : > { %v713_v60 = vpack.c.bf16 %v510_v59, %v509_v58 }
  0xc4   : > { %714 = vst [vmem:[%s918_s17] sm:$0xff] %v713_v60  }
  0xc5 PF: > { %s14_s21 = sadd.s32 1, %s829_s21   ;;  %s968_s30 = sld [smem:[#allocation3_spill]] }
  0xc6   : > { %p11_p11 = scmp.ge.s32.totalorder %s14_s21, 130   ;;  %s969_s15 = smov %s817_s18 }
  0xc7   : > { %s970_s16 = smov %s821_s19  ;;  %s971_s17 = smov %s825_s20 }
  0xc8   : > { %s972_s18 = smov %s976_s22  ;;  %s973_s19 = smov %s980_s23 }
  0xc9   :  { %13 = sbr.rel (!%p11_p11) target bundleno = 4 (0x4), region = 81 }
  0xcb   : > { %s974_s20 = smov %s968_s30 }

// kernel: _lambda_.10
= control target key start
LH: loop header
LB: loop body
LE: loop exit
PB: predicated region body
PF: predicated region fallthrough
CT: control target
= control target key end

     0   :  { %s502_s12 = smov 0   ;;  %s504_s13 = smov 0   ;;  %s548_s0 = inlined_call_operand.vmem [shape: bf16[2,8,8,128], index: 0, kind: input, shape index: {}]   ;;  %s549_s1 = inlined_call_operand.vmem [shape: f32[1,1,1,128], index: 1, kind: input, shape index: {}]   ;;  %s550_s2 = inlined_call_operand.vmem [shape: f32[1,1,1,128], index: 2, kind: input, shape index: {}]   ;;  %s551_s3 = inlined_call_operand.vmem [shape: bf16[2,8,8,128], index: 3, kind: output, shape index: {}]  }
   0x1   :  { %s506_s14 = smov 0  }
   0x2 LB: > { %s25_s15 = sadd.s32 1, %s476_s13  ;;  %p381_p0 = scmp.ge.s32.totalorder %s480_s14, 1  ;;  %s480_s14 = sphi %s506_s14, %s13_s14   ;;  %s476_s13 = sphi %s504_s13, %s553_s13   ;;  %s472_s12 = sphi %s502_s12, %s552_s12  }
   0x3   : > { %p27_p1 = scmp.ge.s32.totalorder %s25_s15, 2  ;;  %p158_p2 = scmp.lt.s32.totalorder %s480_s14, 3 }
   0x5   : > { %s555_s15 = smov (%p27_p1, %s25_s15), 0  ;;  %p159_p3 = pnand %p381_p0, %p158_p2 }
   0x6   : > { %p191_p4 = scmp.lt.s32.totalorder (!%p159_p3), %s472_s12, 1 }
   0x7   : > { %162 = sbr.rel (%p159_p3) target bundleno = 33 (0x21), region = 32 }
   0xc   : > { %s557_s12 = smov (!%p191_p4, %s472_s12), 1  ;;  %v456_v0 = vld [vmem:[%s549_s1] ss:$0 sm:$0xff] }
   0xd   : > { %s388_s16 = sshll.u32 %s557_s12, 5  ;;  %v457_v9 = vld [vmem:[%s550_s2] ss:$0 sm:$0xff] }
   0xe   : > { %s198_s19 = scalar_lea.vmem %s548_s0, %s388_s16  ;;  %s208_s26 = scalar_lea.vmem %s551_s3, %s388_s16 }
   0xf   : > { %v391_v1 = vld [vmem:[%s198_s19] sm:$0xff]   ;;  %v426_v2 = vld [vmem:[%s198_s19 + $0x8] sm:$0xff]   ;;  %v427_v3 = vld [vmem:[%s198_s19 + $0x10] sm:$0xff]  }
  0x10   : > { %v392_v4 = vunpack.c.l.bf16 %v391_v1  ;;  %v393_v5 = vunpack.c.h.bf16 %v391_v1  ;;  %v396_v6 = vunpack.c.l.bf16 %v426_v2  ;;  %v397_v7 = vunpack.c.h.bf16 %v426_v2  ;;  %v428_v8 = vld [vmem:[%s198_s19 + $0x18] sm:$0xff]  }
  0x11   : > { %v400_v10 = vunpack.c.l.bf16 %v427_v3  ;;  %v401_v11 = vunpack.c.h.bf16 %v427_v3  ;;  %v404_v12 = vunpack.c.l.bf16 %v428_v8  ;;  %v405_v13 = vunpack.c.h.bf16 %v428_v8 }
  0x12   : > { %v230_v14 = vmul.f32 %v456_v0, %v392_v4  ;;  %v231_v15 = vmul.f32 %v456_v0, %v393_v5  ;;  %v232_v16 = vmul.f32 %v456_v0, %v396_v6  ;;  %v233_v17 = vmul.f32 %v456_v0, %v397_v7 }
  0x13   : > { %v234_v18 = vmul.f32 %v456_v0, %v400_v10  ;;  %v235_v19 = vmul.f32 %v456_v0, %v401_v11  ;;  %v236_v20 = vmul.f32 %v456_v0, %v404_v12  ;;  %v237_v21 = vmul.f32 %v456_v0, %v405_v13 }
  0x14   : > { %v242_v22 = vadd.f32 %v457_v9, %v230_v14  ;;  %v243_v23 = vadd.f32 %v457_v9, %v231_v15  ;;  %v244_v24 = vadd.f32 %v457_v9, %v232_v16  ;;  %v245_v25 = vadd.f32 %v457_v9, %v233_v17 }
  0x15   : > { %v246_v26 = vadd.f32 %v457_v9, %v234_v18  ;;  %v247_v27 = vadd.f32 %v457_v9, %v235_v19  ;;  %v248_v28 = vadd.f32 %v457_v9, %v236_v20  ;;  %v249_v29 = vadd.f32 %v457_v9, %v237_v21 }
  0x16   : > { %vm250_vm0 = vcmp.ge.f32.partialorder %v242_v22, 0.0  ;;  %vm251_vm1 = vcmp.ge.f32.partialorder %v243_v23, 0.0  ;;  %v258_v30 = vmul.f32 0.2, %v242_v22  ;;  %v259_v31 = vmul.f32 0.2, %v243_v23 }
  0x17   : > { %vm252_vm2 = vcmp.ge.f32.partialorder %v244_v24, 0.0  ;;  %vm253_vm3 = vcmp.ge.f32.partialorder %v245_v25, 0.0  ;;  %v260_v32 = vmul.f32 0.2, %v244_v24  ;;  %v261_v33 = vmul.f32 0.2, %v245_v25 }
  0x18   : > { %v266_v34 = vsel %vm250_vm0, %v242_v22, %v258_v30  ;;  %v267_v35 = vsel %vm251_vm1, %v243_v23, %v259_v31  ;;  %vm254_vm4 = vcmp.ge.f32.partialorder %v246_v26, 0.0  ;;  %vm255_vm5 = vcmp.ge.f32.partialorder %v247_v27, 0.0 }
  0x19   : > { %v409_v36 = vpack.c.bf16 %v267_v35, %v266_v34  ;;  %v268_v37 = vsel %vm252_vm2, %v244_v24, %v260_v32  ;;  %v269_v38 = vsel %vm253_vm3, %v245_v25, %v261_v33  ;;  %v262_v39 = vmul.f32 0.2, %v246_v26 }
  0x1a   : > { %v414_v40 = vpack.c.bf16 %v269_v38, %v268_v37  ;;  %v263_v41 = vmul.f32 0.2, %v247_v27  ;;  %vm256_vm6 = vcmp.ge.f32.partialorder %v248_v28, 0.0  ;;  %vm257_vm7 = vcmp.ge.f32.partialorder %v249_v29, 0.0 }
  0x1b   : > { %410 = vst [vmem:[%s208_s26] sm:$0xff] %v409_v36   ;;  %v270_v42 = vsel %vm254_vm4, %v246_v26, %v262_v39  ;;  %v264_v43 = vmul.f32 0.2, %v248_v28  ;;  %v265_v44 = vmul.f32 0.2, %v249_v29 }
  0x1c   : > { %429 = vst [vmem:[%s208_s26 + $0x8] sm:$0xff] %v414_v40   ;;  %v271_v45 = vsel %vm255_vm5, %v247_v27, %v263_v41 }
  0x1d   : > { %v419_v46 = vpack.c.bf16 %v271_v45, %v270_v42  ;;  %v272_v47 = vsel %vm256_vm6, %v248_v28, %v264_v43  ;;  %v273_v48 = vsel %vm257_vm7, %v249_v29, %v265_v44 }
  0x1e   : > { %v424_v49 = vpack.c.bf16 %v273_v48, %v272_v47 }
  0x1f   : > { %430 = vst [vmem:[%s208_s26 + $0x10] sm:$0xff] %v419_v46  }
  0x20   : > { %431 = vst [vmem:[%s208_s26 + $0x18] sm:$0xff] %v424_v49  }
  0x21 PF: > { %s13_s14 = sadd.s32 1, %s480_s14   ;;  %s552_s12 = smov %s476_s13 }
  0x22   : > { %p10_p5 = scmp.ge.s32.totalorder %s13_s14, 4   ;;  %s553_s13 = smov %s555_s15 }
  0x24   :  { %12 = sbr.rel (!%p10_p5) target bundleno = 2 (0x2), region = 62 }

// kernel: _lambda_.9
= control target key start
LH: loop header
LB: loop body
LE: loop exit
PB: predicated region body
PF: predicated region fallthrough
CT: control target
= control target key end

     0   :  { %s1372_s18 = smov 0   ;;  %s1374_s19 = smov 0   ;;  %s1526_s0 = inlined_call_operand.vmem [shape: bf16[2,18,9,128], index: 0, kind: input, shape index: {}]   ;;  %s1527_s1 = inlined_call_operand.vmem [shape: bf16[2,18,9,128], index: 1, kind: input, shape index: {}]   ;;  %s1528_s2 = inlined_call_operand.vmem [shape: bf16[16,128,128], index: 2, kind: input, shape index: {}]   ;;  %s1529_s3 = inlined_call_operand.vmem [shape: bf16[2,8,8,128], index: 3, kind: output, shape index: {0}]   ;;  %s1530_s4 = inlined_call_operand.vmem [shape: f32[2,8,1,128], index: 4, kind: output, shape index: {1}]   ;;  %s1531_s5 = inlined_call_operand.vmem [shape: f32[2,8,1,128], index: 5, kind: output, shape index: {2}]  }
   0x1   :  { %s1376_s20 = smov 0   ;;  %s1378_s21 = smov 0  }
   0x2   :  { %s1380_s22 = smov 0   ;;  %s1382_s23 = smov 0  }
   0x3   :  { %s1384_s24 = smov 0  }
   0x4 LB: > { %s28_s25 = sadd.s32 1, %s1327_s21  ;;  %s31_s26 = sadd.s32 1, %s1331_s22  ;;  %s1339_s24 = sphi %s1384_s24, %s16_s24   ;;  %s1335_s23 = sphi %s1382_s23, %s1537_s23   ;;  %s1331_s22 = sphi %s1380_s22, %s1536_s22   ;;  %s1327_s21 = sphi %s1378_s21, %s1535_s21   ;;  %s1323_s20 = sphi %s1376_s20, %s1534_s20   ;;  %s1319_s19 = sphi %s1374_s19, %s1533_s19   ;;  %s1315_s18 = sphi %s1372_s18, %s1532_s18  }
   0x5   : > { %p29_p0 = scmp.ge.s32.totalorder %s28_s25, 4  ;;  %p980_p1 = scmp.ge.s32.totalorder %s1339_s24, 1 }
   0x6   : > { %p255_p2 = scmp.lt.s32.totalorder %s1339_s24, 65  ;;  %s35_s27 = sadd.s32 1, %s1335_s23 }
   0x7   : > { %s1539_s25 = smov (%p29_p0, %s28_s25), 0  ;;  %s1541_s26 = smov (!%p29_p0, %s31_s26), %s1331_s22 }
   0x8   : > { %p256_p3 = pnand %p980_p1, %p255_p2  ;;  %p33_p4 = scmp.ge.s32.totalorder %s1541_s26, 8 }
   0x9   : > { %s981_s28 = sshll.u32 (!%p256_p3), %s1319_s19, 1  ;;  %p319_p6 = scmp.lt.s32.totalorder (!%p256_p3), %s1323_s20, 1 }
   0xa   : > { %s1543_s26 = smov (%p33_p4, %s1541_s26), 0  ;;  %s1545_s27 = smov (!%p33_p4, %s35_s27), %s1335_s23 }
   0xb   : > { %p37_p5 = scmp.ge.s32.totalorder %s1545_s27, 2  ;;  %259 = sbr.rel (%p256_p3) target bundleno = 225 (0xe1), region = 32 }
   0xc   : > { %s318_s29 = sadd.s32 (!%p256_p3), %s1315_s18, %s981_s28  ;;  %p345_p7 = scmp.lt.s32.totalorder (!%p256_p3), %s1319_s19, 7 }
   0xd   : > { %s1547_s27 = smov (%p37_p5, %s1545_s27), 0  ;;  %p321_p8 = scmp.lt.s32.totalorder (!%p256_p3), %s318_s29, 17 }
   0xe   : > { %p991_p9 = scmp.ne.s32.totalorder (!%p256_p3), %s1315_s18, 0 }
  0x10   : > { %s1549_s20 = smov (!%p319_p6, %s1323_s20), 1  ;;  %s1551_s29 = smov (!%p321_p8, %s318_s29), 17 }
  0x11   : > { %s1227_s30 = smul.u32 36, %s1549_s20  ;;  %s987_s6 = sshll.u32 %s1549_s20, 3 }
  0x12   : > { %s1553_s19 = smov (!%p345_p7, %s1319_s19), 7  ;;  %s982_s7 = sshll.u32 %s1551_s29, 1 }
  0x13   : > { %s325_s8 = sadd.s32 %s1227_s30, %s982_s7  ;;  %s1422_s9 = sadd.s32 %s987_s6, %s1553_s19 }
  0x14   : > { %s983_s10 = sshll.u32 %s325_s8, 2  ;;  %s988_s11 = sshll.u32 %s1422_s9, 2 }
  0x15   : > { %s1428_s14 = scalar_lea.vmem %s1526_s0, %s983_s10  ;;  %s1433_s17 = scalar_lea.vmem %s1527_s1, %s983_s10 }
  0x16   : > { %s1438_s19 = scalar_lea.vmem %s1529_s3, %s988_s11  ;;  %s357_s6 = scalar_lea.vmem %s1530_s4, %s1422_s9 }
  0x17   : > { %s364_s12 = scalar_lea.vmem %s1531_s5, %s1422_s9  ;;  %368 = sbr.rel (%p991_p9) target bundleno = 30 (0x1e), region = 36 }
  0x1c   : > { %v1341_v0 = vmov 0.0  }
  0x1d   : > { %369 = vst [vmem:[#allocation2] sm:$0xff] %v1341_v0 }
  0x1e PF: > { %s1189_s10 = sshll.u32 %s1315_s18, 8  ;;  %v1097_v20 = vld [vmem:[%s1428_s14] sm:$0xf]  ;;  %v1207_v21 = vld [vmem:[%s1428_s14] sm:$0x10]  ;;  %p1185_p10 = scmp.ne.s32.totalorder %s1315_s18, 3 }
  0x1f   : > { %s1453_s11 = scalar_lea.vmem %s1528_s2, %s1189_s10  ;;  %v1151_v23 = vld [vmem:[%s1433_s17] sm:$0xf]  ;;  %v1217_v24 = vld [vmem:[%s1433_s17] sm:$0x10]  ;;  %v1098_v27 = vor.u32 %v1207_v21, %v1097_v20 }
  0x20   : > { %v1197_v1 = vld [vmem:[%s1453_s11 + $0x38] sm:$0xff]  ;;  %v1196_v4 = vld [vmem:[%s1453_s11 + $0x30] sm:$0xff]  ;;  %v1195_v9 = vld [vmem:[%s1453_s11 + $0x28] sm:$0xff]  ;;  %v1152_v29 = vor.u32 %v1217_v24, %v1151_v23 }
  0x21   : > { %v1206_v2 = vld [vmem:[%s1453_s11 + $0x78] sm:$0xff]  ;;  %440 = vmatpush.bf16.msra.mxu0 %v1197_v1  ;;  %v1205_v5 = vld [vmem:[%s1453_s11 + $0x70] sm:$0xff]  ;;  %v1204_v10 = vld [vmem:[%s1453_s11 + $0x68] sm:$0xff]  ;;  %v571_v33 = vshll.u32 %v1098_v27, 16  ;;  %v569_v39 = vshrl.u32 %v1098_v27, 16 }
  0x22   : > { %v1216_v3 = vld [vmem:[%s1453_s11 + $0xb8] sm:$0xff]  ;;  %525 = vmatpush.bf16.msra.mxu1 %v1206_v2  ;;  %v1215_v7 = vld [vmem:[%s1453_s11 + $0xb0] sm:$0xff]  ;;  %v1214_v11 = vld [vmem:[%s1453_s11 + $0xa8] sm:$0xff]  ;;  %v670_v35 = vshll.u32 %v1152_v29, 16  ;;  %v668_v42 = vshrl.u32 %v1152_v29, 16 }
  0x23   : > { %v1226_v6 = vld [vmem:[%s1453_s11 + $0xf8] sm:$0xff]  ;;  %624 = vmatpush.bf16.msra.mxu2 %v1216_v3  ;;  %v1225_v8 = vld [vmem:[%s1453_s11 + $0xf0] sm:$0xff]  ;;  %v1224_v12 = vld [vmem:[%s1453_s11 + $0xe8] sm:$0xff]  ;;  %v573_v40 = vrot.slane %v571_v33, 1 }
  0x24   : > { %723 = vmatpush.bf16.msra.mxu3 %v1226_v6  ;;  %v1194_v13 = vld [vmem:[%s1453_s11 + $0x20] sm:$0xff]  ;;  %v1193_v17 = vld [vmem:[%s1453_s11 + $0x18] sm:$0xff]  ;;  %v1192_v25 = vld [vmem:[%s1453_s11 + $0x10] sm:$0xff]  ;;  %v672_v43 = vrot.slane %v670_v35, 1 }
  0x25   : > { %441 = vmatpush.bf16.msra.mxu0 %v1196_v4  ;;  %v1203_v14 = vld [vmem:[%s1453_s11 + $0x60] sm:$0xff]  ;;  %v1202_v18 = vld [vmem:[%s1453_s11 + $0x58] sm:$0xff]  ;;  %v1201_v26 = vld [vmem:[%s1453_s11 + $0x50] sm:$0xff]  ;;  %v574_v47 = vor.u32 %v573_v40, %v569_v39 }
  0x26   : > { %526 = vmatpush.bf16.msra.mxu1 %v1205_v5  ;;  %v1213_v15 = vld [vmem:[%s1453_s11 + $0xa0] sm:$0xff]  ;;  %v1212_v19 = vld [vmem:[%s1453_s11 + $0x98] sm:$0xff]  ;;  %v1211_v28 = vld [vmem:[%s1453_s11 + $0x90] sm:$0xff]  ;;  %v673_v48 = vor.u32 %v672_v43, %v668_v42 }
  0x27   : > { %625 = vmatpush.bf16.msra.mxu2 %v1215_v7  ;;  %v1223_v16 = vld [vmem:[%s1453_s11 + $0xe0] sm:$0xff]  ;;  %v1222_v22 = vld [vmem:[%s1453_s11 + $0xd8] sm:$0xff]  ;;  %v1221_v30 = vld [vmem:[%s1453_s11 + $0xd0] sm:$0xff] }
  0x28   : > { %724 = vmatpush.bf16.msra.mxu3 %v1225_v8  ;;  %v1191_v31 = vld [vmem:[%s1453_s11 + $0x8] sm:$0xff]  ;;  %v1190_v37 = vld [vmem:[%s1453_s11] sm:$0xff] }
  0x29   : > { %442 = vmatpush.bf16.msra.mxu0 %v1195_v9  ;;  %v1200_v32 = vld [vmem:[%s1453_s11 + $0x48] sm:$0xff]  ;;  %v1199_v38 = vld [vmem:[%s1453_s11 + $0x40] sm:$0xff] }
  0x2a   : > { %527 = vmatpush.bf16.msra.mxu1 %v1204_v10  ;;  %v1210_v34 = vld [vmem:[%s1453_s11 + $0x88] sm:$0xff]  ;;  %v1209_v41 = vld [vmem:[%s1453_s11 + $0x80] sm:$0xff] }
  0x2b   : > { %626 = vmatpush.bf16.msra.mxu2 %v1214_v11  ;;  %v1220_v36 = vld [vmem:[%s1453_s11 + $0xc8] sm:$0xff]  ;;  %v1219_v44 = vld [vmem:[%s1453_s11 + $0xc0] sm:$0xff] }
  0x2c   : > { %725 = vmatpush.bf16.msra.mxu3 %v1224_v12  ;;  %v370_v45 = vld [vmem:[%s1428_s14] sm:$0xf] }
  0x2d   : > { %443 = vmatpush.bf16.msra.mxu0 %v1194_v13  ;;  %v455_v46 = vld [vmem:[%s1433_s17] sm:$0xf] }
  0x2e   : > { %528 = vmatpush.bf16.msra.mxu1 %v1203_v14  ;;  %v391_v49 = vld [vmem:[#allocation2] sm:$0xff] }
  0x2f   : > { %627 = vmatpush.bf16.msra.mxu2 %v1213_v15 }
  0x30   : > { %726 = vmatpush.bf16.msra.mxu3 %v1223_v16 }
  0x31   : > { %444 = vmatpush.bf16.msra.mxu0 %v1193_v17 }
  0x32   : > { %529 = vmatpush.bf16.msra.mxu1 %v1202_v18 }
  0x33   : > { %628 = vmatpush.bf16.msra.mxu2 %v1212_v19 }
  0x34   : > { %727 = vmatpush.bf16.msra.mxu3 %v1222_v22 }
  0x35   : > { %445 = vmatpush.bf16.msra.mxu0 %v1192_v25 }
  0x36   : > { %530 = vmatpush.bf16.msra.mxu1 %v1201_v26 }
  0x37   : > { %629 = vmatpush.bf16.msra.mxu2 %v1211_v28 }
  0x38   : > { %728 = vmatpush.bf16.msra.mxu3 %v1221_v30 }
  0x39   : > { %446 = vmatpush.bf16.msra.mxu0 %v1191_v31 }
  0x3a   : > { %531 = vmatpush.bf16.msra.mxu1 %v1200_v32 }
  0x3b   : > { %630 = vmatpush.bf16.msra.mxu2 %v1210_v34 }
  0x3c   : > { %729 = vmatpush.bf16.msra.mxu3 %v1220_v36 }
  0x3d   : > { %447 = vmatpush.bf16.msra.mxu0 %v1190_v37 }
  0x3e   : > { %532 = vmatpush.bf16.msra.mxu1 %v1199_v38 }
  0x3f   : > { %631 = vmatpush.bf16.msra.mxu2 %v1209_v41 }
  0x40   : > { %730 = vmatpush.bf16.msra.mxu3 %v1219_v44  ;;  %448 = vmatmul.bf16.vlgmr.msra.gmra.mxu0 %v370_v45 }
  0x41   : > { %533 = vmatmul.bf16.vlgmr.msra.gmra.mxu1 %v455_v46 }
  0x42   : > { %632 = vmatmul.bf16.vlgmr.msra.gmra.mxu2 %v574_v47 }
  0x43   : > { %731 = vmatmul.bf16.vlgmr.msra.gmra.mxu3 %v673_v48 }
  0xbd   : > { %v449_v50 = vpop.f32.mrf.mxu0 }
  0xbe   : > { %v534_v51 = vpop.f32.mrf.mxu1  ;;  %v453_v52 = vadd.f32 %v449_v50, %v391_v49 }
  0xc0   : > { %v538_v53 = vadd.f32 %v534_v51, %v453_v52 }
  0xc5   : > { %v633_v54 = vpop.f32.mrf.mxu2  ;;  %v451_v55 = vpop.f32.mrf.mxu0 }
  0xc6   : > { %v536_v56 = vpop.f32.mrf.mxu1  ;;  %v637_v57 = vadd.f32 %v633_v54, %v538_v53  ;;  %v732_v58 = vpop.f32.mrf.mxu3 }
  0xc8   : > { %v736_v59 = vadd.f32 %v732_v58, %v637_v57 }
  0xca   : > { %737 = vst [vmem:[#allocation2] sm:$0xff] %v736_v59  ;;  %741 = sbr.rel (%p1185_p10) target bundleno = 225 (0xe1), region = 40 }
  0xcd   : > { %v635_v60 = vpop.f32.mrf.mxu2 }
  0xce   : > { %v734_v61 = vpop.f32.mrf.mxu3 }
  0xd1   : > { %v742_v62 = vld [vmem:[#allocation2] sm:$0xff] }
  0xd2   : > { %v743_v63 = vrot.slane %v742_v62, 4  ;;  %v750_v0 = vmul.f32 %v742_v62, %v742_v62  ;;  %v758_v1 = vpack.c.bf16 %v742_v62, %v742_v62 }
  0xd4   : > { %v744_v2 = vadd.f32 %v743_v63, %v742_v62  ;;  %v751_v3 = vrot.slane %v750_v0, 4  ;;  %759 = vst [vmem:[%s1438_s19] sm:$0xf] %v758_v1 }
  0xd6   : > { %v745_v4 = vrot.slane %v744_v2, 2  ;;  %v752_v5 = vadd.f32 %v751_v3, %v750_v0 }
  0xd8   : > { %v746_v6 = vadd.f32 %v745_v4, %v744_v2  ;;  %v753_v7 = vrot.slane %v752_v5, 2 }
  0xda   : > { %v747_v8 = vrot.slane %v746_v6, 1  ;;  %v754_v9 = vadd.f32 %v753_v7, %v752_v5 }
  0xdc   : > { %v748_v10 = vadd.f32 %v747_v8, %v746_v6  ;;  %v755_v11 = vrot.slane %v754_v9, 1 }
  0xde   : > { %749 = vst [vmem:[%s357_s6] sm:$0x1] %v748_v10  ;;  %v756_v12 = vadd.f32 %v755_v11, %v754_v9 }
  0xe0   : > { %757 = vst [vmem:[%s364_s12] sm:$0x1] %v756_v12 }
  0xe1 PF: > { %s16_s24 = sadd.s32 1, %s1339_s24   ;;  %s1532_s18 = smov %s1327_s21 }
  0xe2   : > { %p13_p11 = scmp.ge.s32.totalorder %s16_s24, 66   ;;  %s1533_s19 = smov %s1331_s22 }
  0xe3   : > { %s1534_s20 = smov %s1335_s23  ;;  %s1535_s21 = smov %s1539_s25 }
  0xe4   : > { %s1536_s22 = smov %s1543_s26  ;;  %s1537_s23 = smov %s1547_s27 }
  0xe5   :  { %15 = sbr.rel (!%p13_p11) target bundleno = 4 (0x4), region = 101 }

// kernel: _lambda_.12
= control target key start
LH: loop header
LB: loop body
LE: loop exit
PB: predicated region body
PF: predicated region fallthrough
CT: control target
= control target key end

     0   :  { %s424_s12 = smov 0   ;;  %s426_s13 = smov 0   ;;  %s466_s0 = inlined_call_operand.vmem [shape: bf16[2,4,4,128], index: 0, kind: input, shape index: {}]   ;;  %s467_s1 = inlined_call_operand.vmem [shape: f32[1,1,1,128], index: 1, kind: input, shape index: {}]   ;;  %s468_s2 = inlined_call_operand.vmem [shape: f32[1,1,1,128], index: 2, kind: input, shape index: {}]   ;;  %s469_s3 = inlined_call_operand.vmem [shape: bf16[2,4,4,128], index: 3, kind: output, shape index: {}]  }
   0x1   :  { %s428_s14 = smov 0  }
   0x2 LB: > { %s25_s15 = sadd.s32 1, %s398_s13  ;;  %p345_p0 = scmp.ge.s32.totalorder %s402_s14, 1  ;;  %s402_s14 = sphi %s428_s14, %s13_s14   ;;  %s398_s13 = sphi %s426_s13, %s471_s13   ;;  %s394_s12 = sphi %s424_s12, %s470_s12  }
   0x3   : > { %p27_p1 = scmp.ge.s32.totalorder %s25_s15, 2  ;;  %p158_p2 = scmp.lt.s32.totalorder %s402_s14, 3 }
   0x5   : > { %s473_s15 = smov (%p27_p1, %s25_s15), 0  ;;  %p159_p3 = pnand %p345_p0, %p158_p2 }
   0x6   : > { %p191_p4 = scmp.lt.s32.totalorder (!%p159_p3), %s394_s12, 1 }
   0x7   : > { %162 = sbr.rel (%p159_p3) target bundleno = 31 (0x1f), region = 32 }
   0xc   : > { %s475_s12 = smov (!%p191_p4, %s394_s12), 1  ;;  %v378_v0 = vld [vmem:[%s467_s1] ss:$0 sm:$0xff] }
   0xd   : > { %s352_s16 = sshll.u32 %s475_s12, 3  ;;  %v379_v8 = vld [vmem:[%s468_s2] ss:$0 sm:$0xff] }
   0xe   : > { %s198_s19 = scalar_lea.vmem %s466_s0, %s352_s16  ;;  %s208_s26 = scalar_lea.vmem %s469_s3, %s352_s16 }
   0xf   : > { %v210_v1 = vld [vmem:[%s198_s19] sm:$0x3]  ;;  %v211_v2 = vld [vmem:[%s198_s19 + $0x2] sm:$0x3]  ;;  %v212_v3 = vld [vmem:[%s198_s19 + $0x4] sm:$0x3] }
  0x10   : > { %v213_v4 = vld [vmem:[%s198_s19 + $0x6] sm:$0x3]  ;;  %v214_v5 = vunpack.c.l.bf16 %v210_v1  ;;  %v215_v6 = vunpack.c.l.bf16 %v211_v2  ;;  %v216_v7 = vunpack.c.l.bf16 %v212_v3 }
  0x11   : > { %v217_v9 = vunpack.c.l.bf16 %v213_v4 }
  0x12   : > { %v222_v10 = vmul.f32 %v378_v0, %v214_v5  ;;  %v223_v11 = vmul.f32 %v378_v0, %v215_v6  ;;  %v224_v12 = vmul.f32 %v378_v0, %v216_v7 }
  0x13   : > { %v225_v13 = vmul.f32 %v378_v0, %v217_v9 }
  0x14   : > { %v230_v14 = vadd.f32 %v379_v8, %v222_v10  ;;  %v231_v15 = vadd.f32 %v379_v8, %v223_v11  ;;  %v232_v16 = vadd.f32 %v379_v8, %v224_v12 }
  0x15   : > { %v233_v17 = vadd.f32 %v379_v8, %v225_v13 }
  0x16   : > { %vm234_vm0 = vcmp.ge.f32.partialorder %v230_v14, 0.0  ;;  %v238_v18 = vmul.f32 0.2, %v230_v14  ;;  %vm235_vm1 = vcmp.ge.f32.partialorder %v231_v15, 0.0  ;;  %v239_v19 = vmul.f32 0.2, %v231_v15 }
  0x17   : > { %vm236_vm2 = vcmp.ge.f32.partialorder %v232_v16, 0.0  ;;  %v240_v20 = vmul.f32 0.2, %v232_v16  ;;  %vm237_vm3 = vcmp.ge.f32.partialorder %v233_v17, 0.0  ;;  %v241_v21 = vmul.f32 0.2, %v233_v17 }
  0x18   : > { %v242_v22 = vsel %vm234_vm0, %v230_v14, %v238_v18  ;;  %v243_v23 = vsel %vm235_vm1, %v231_v15, %v239_v19 }
  0x19   : > { %v246_v24 = vpack.c.bf16 %v242_v22, %v242_v22  ;;  %v247_v25 = vpack.c.bf16 %v243_v23, %v243_v23  ;;  %v244_v26 = vsel %vm236_vm2, %v232_v16, %v240_v20  ;;  %v245_v27 = vsel %vm237_vm3, %v233_v17, %v241_v21 }
  0x1a   : > { %v248_v28 = vpack.c.bf16 %v244_v26, %v244_v26  ;;  %v249_v29 = vpack.c.bf16 %v245_v27, %v245_v27 }
  0x1b   : > { %250 = vst [vmem:[%s208_s26] sm:$0x3] %v246_v24 }
  0x1c   : > { %251 = vst [vmem:[%s208_s26 + $0x2] sm:$0x3] %v247_v25 }
  0x1d   : > { %252 = vst [vmem:[%s208_s26 + $0x4] sm:$0x3] %v248_v28 }
  0x1e   : > { %253 = vst [vmem:[%s208_s26 + $0x6] sm:$0x3] %v249_v29 }
  0x1f PF: > { %s13_s14 = sadd.s32 1, %s402_s14   ;;  %s470_s12 = smov %s398_s13 }
  0x20   : > { %p10_p5 = scmp.ge.s32.totalorder %s13_s14, 4   ;;  %s471_s13 = smov %s473_s15 }
  0x22   :  { %12 = sbr.rel (!%p10_p5) target bundleno = 2 (0x2), region = 62 }

// kernel: _lambda_.11
= control target key start
LH: loop header
LB: loop body
LE: loop exit
PB: predicated region body
PF: predicated region fallthrough
CT: control target
= control target key end

     0   :  { %s1345_s18 = smov 0   ;;  %s1347_s19 = smov 0   ;;  %s1497_s0 = inlined_call_operand.vmem [shape: bf16[2,10,5,128], index: 0, kind: input, shape index: {}]   ;;  %s1498_s1 = inlined_call_operand.vmem [shape: bf16[2,10,5,128], index: 1, kind: input, shape index: {}]   ;;  %s1499_s2 = inlined_call_operand.vmem [shape: bf16[16,128,128], index: 2, kind: input, shape index: {}]   ;;  %s1500_s3 = inlined_call_operand.vmem [shape: bf16[2,4,4,128], index: 3, kind: output, shape index: {0}]   ;;  %s1501_s4 = inlined_call_operand.vmem [shape: f32[2,4,1,128], index: 4, kind: output, shape index: {1}]   ;;  %s1502_s5 = inlined_call_operand.vmem [shape: f32[2,4,1,128], index: 5, kind: output, shape index: {2}]  }
   0x1   :  { %s1349_s20 = smov 0   ;;  %s1351_s21 = smov 0  }
   0x2   :  { %s1353_s22 = smov 0   ;;  %s1355_s23 = smov 0  }
   0x3   :  { %s1357_s24 = smov 0  }
   0x4 LB: > { %s28_s25 = sadd.s32 1, %s1300_s21  ;;  %s31_s26 = sadd.s32 1, %s1304_s22  ;;  %s1312_s24 = sphi %s1357_s24, %s16_s24   ;;  %s1308_s23 = sphi %s1355_s23, %s1508_s23   ;;  %s1304_s22 = sphi %s1353_s22, %s1507_s22   ;;  %s1300_s21 = sphi %s1351_s21, %s1506_s21   ;;  %s1296_s20 = sphi %s1349_s20, %s1505_s20   ;;  %s1292_s19 = sphi %s1347_s19, %s1504_s19   ;;  %s1288_s18 = sphi %s1345_s18, %s1503_s18  }
   0x5   : > { %p29_p0 = scmp.ge.s32.totalorder %s28_s25, 4  ;;  %p965_p1 = scmp.ge.s32.totalorder %s1312_s24, 1 }
   0x6   : > { %p253_p2 = scmp.lt.s32.totalorder %s1312_s24, 33  ;;  %s35_s27 = sadd.s32 1, %s1308_s23 }
   0x7   : > { %s1510_s25 = smov (%p29_p0, %s28_s25), 0  ;;  %s1512_s26 = smov (!%p29_p0, %s31_s26), %s1304_s22 }
   0x8   : > { %p254_p3 = pnand %p965_p1, %p253_p2  ;;  %p33_p4 = scmp.ge.s32.totalorder %s1512_s26, 4 }
   0x9   : > { %s966_s28 = sshll.u32 (!%p254_p3), %s1292_s19, 1  ;;  %p315_p6 = scmp.lt.s32.totalorder (!%p254_p3), %s1296_s20, 1 }
   0xa   : > { %s1514_s26 = smov (%p33_p4, %s1512_s26), 0  ;;  %s1516_s27 = smov (!%p33_p4, %s35_s27), %s1308_s23 }
   0xb   : > { %p37_p5 = scmp.ge.s32.totalorder %s1516_s27, 2  ;;  %257 = sbr.rel (%p254_p3) target bundleno = 246 (0xf6), region = 32 }
   0xc   : > { %s314_s29 = sadd.s32 (!%p254_p3), %s1288_s18, %s966_s28  ;;  %p339_p7 = scmp.lt.s32.totalorder (!%p254_p3), %s1292_s19, 3 }
   0xd   : > { %s1518_s27 = smov (%p37_p5, %s1516_s27), 0  ;;  %p317_p8 = scmp.lt.s32.totalorder (!%p254_p3), %s314_s29, 9 }
   0xe   : > { %p974_p9 = scmp.ne.s32.totalorder (!%p254_p3), %s1288_s18, 0 }
  0x10   : > { %s1520_s20 = smov (!%p315_p6, %s1296_s20), 1  ;;  %s1522_s29 = smov (!%p317_p8, %s314_s29), 9 }
  0x11   : > { %s1200_s30 = smul.u32 10, %s1520_s20  ;;  %s970_s6 = sshll.u32 %s1520_s20, 2 }
  0x12   : > { %s1524_s19 = smov (!%p339_p7, %s1292_s19), 3 }
  0x13   : > { %s320_s7 = sadd.s32 %s1200_s30, %s1522_s29  ;;  %s1395_s9 = sadd.s32 %s970_s6, %s1524_s19 }
  0x14   : > { %s967_s8 = sshll.u32 %s320_s7, 2  ;;  %s971_s16 = sshll.u32 %s1395_s9, 1 }
  0x15   : > { %s1400_s12 = scalar_lea.vmem %s1497_s0, %s967_s8  ;;  %s1405_s15 = scalar_lea.vmem %s1498_s1, %s967_s8 }
  0x16   : > { %s351_s28 = scalar_lea.vmem %s1501_s4, %s1395_s9  ;;  %s1415_s30 = scalar_lea.vmem %s1500_s3, %s971_s16 }
  0x17   : > { %s358_s10 = scalar_lea.vmem %s1502_s5, %s1395_s9  ;;  %362 = sbr.rel (%p974_p9) target bundleno = 30 (0x1e), region = 36 }
  0x1c   : > { %v1314_v0 = vmov 0.0  }
  0x1d   : > { %363 = vst [vmem:[#allocation2] sm:$0xf] %v1314_v0 }
  0x1e PF: > { %s1164_s8 = sshll.u32 %s1288_s18, 8  ;;  %v534_v16 = vld [vmem:[%s1400_s12] sm:$0x7]  ;;  %p1160_p10 = scmp.ne.s32.totalorder %s1288_s18, 3 }
  0x1f   : > { %s1426_s14 = scalar_lea.vmem %s1499_s2, %s1164_s8  ;;  %v630_v18 = vld [vmem:[%s1405_s15] sm:$0x7]  ;;  %v557_v21 = vunpack.c.l.b16 %v534_v16 }
  0x20   : > { %v1172_v1 = vld [vmem:[%s1426_s14 + $0x38] sm:$0xff]  ;;  %v1171_v4 = vld [vmem:[%s1426_s14 + $0x30] sm:$0xff]  ;;  %v1170_v9 = vld [vmem:[%s1426_s14 + $0x28] sm:$0xff]  ;;  %v653_v23 = vunpack.c.l.b16 %v630_v18 }
  0x21   : > { %v1181_v2 = vld [vmem:[%s1426_s14 + $0x78] sm:$0xff]  ;;  %434 = vmatpush.bf16.msra.mxu0 %v1172_v1  ;;  %v1180_v5 = vld [vmem:[%s1426_s14 + $0x70] sm:$0xff]  ;;  %v1179_v10 = vld [vmem:[%s1426_s14 + $0x68] sm:$0xff]  ;;  %v558_v27 = vpack.c.b16 %v557_v21, %v557_v21 }
  0x22   : > { %v1190_v3 = vld [vmem:[%s1426_s14 + $0xb8] sm:$0xff]  ;;  %519 = vmatpush.bf16.msra.mxu1 %v1181_v2  ;;  %v1189_v7 = vld [vmem:[%s1426_s14 + $0xb0] sm:$0xff]  ;;  %v1188_v11 = vld [vmem:[%s1426_s14 + $0xa8] sm:$0xff]  ;;  %v654_v29 = vpack.c.b16 %v653_v23, %v653_v23 }
  0x23   : > { %v1199_v6 = vld [vmem:[%s1426_s14 + $0xf8] sm:$0xff]  ;;  %615 = vmatpush.bf16.msra.mxu2 %v1190_v3  ;;  %v1198_v8 = vld [vmem:[%s1426_s14 + $0xf0] sm:$0xff]  ;;  %v1197_v12 = vld [vmem:[%s1426_s14 + $0xe8] sm:$0xff]  ;;  %v562_v33 = vshll.u32 %v558_v27, 16  ;;  %v560_v39 = vshrl.u32 %v558_v27, 16 }
  0x24   : > { %711 = vmatpush.bf16.msra.mxu3 %v1199_v6  ;;  %v1169_v13 = vld [vmem:[%s1426_s14 + $0x20] sm:$0xff]  ;;  %v1168_v19 = vld [vmem:[%s1426_s14 + $0x18] sm:$0xff]  ;;  %v1167_v25 = vld [vmem:[%s1426_s14 + $0x10] sm:$0xff]  ;;  %v658_v35 = vshll.u32 %v654_v29, 16  ;;  %v656_v42 = vshrl.u32 %v654_v29, 16 }
  0x25   : > { %435 = vmatpush.bf16.msra.mxu0 %v1171_v4  ;;  %v1178_v14 = vld [vmem:[%s1426_s14 + $0x60] sm:$0xff]  ;;  %v1177_v20 = vld [vmem:[%s1426_s14 + $0x58] sm:$0xff]  ;;  %v1176_v26 = vld [vmem:[%s1426_s14 + $0x50] sm:$0xff]  ;;  %v564_v40 = vrot.slane %v562_v33, 1 }
  0x26   : > { %520 = vmatpush.bf16.msra.mxu1 %v1180_v5  ;;  %v1187_v15 = vld [vmem:[%s1426_s14 + $0xa0] sm:$0xff]  ;;  %v1186_v22 = vld [vmem:[%s1426_s14 + $0x98] sm:$0xff]  ;;  %v1185_v28 = vld [vmem:[%s1426_s14 + $0x90] sm:$0xff]  ;;  %v660_v43 = vrot.slane %v658_v35, 1 }
  0x27   : > { %616 = vmatpush.bf16.msra.mxu2 %v1189_v7  ;;  %v1196_v17 = vld [vmem:[%s1426_s14 + $0xe0] sm:$0xff]  ;;  %v1195_v24 = vld [vmem:[%s1426_s14 + $0xd8] sm:$0xff]  ;;  %v1194_v30 = vld [vmem:[%s1426_s14 + $0xd0] sm:$0xff]  ;;  %v565_v47 = vor.u32 %v564_v40, %v560_v39 }
  0x28   : > { %712 = vmatpush.bf16.msra.mxu3 %v1198_v8  ;;  %v1166_v31 = vld [vmem:[%s1426_s14 + $0x8] sm:$0xff]  ;;  %v1165_v37 = vld [vmem:[%s1426_s14] sm:$0xff]  ;;  %v661_v48 = vor.u32 %v660_v43, %v656_v42 }
  0x29   : > { %436 = vmatpush.bf16.msra.mxu0 %v1170_v9  ;;  %v1175_v32 = vld [vmem:[%s1426_s14 + $0x48] sm:$0xff]  ;;  %v1174_v38 = vld [vmem:[%s1426_s14 + $0x40] sm:$0xff] }
  0x2a   : > { %521 = vmatpush.bf16.msra.mxu1 %v1179_v10  ;;  %v1184_v34 = vld [vmem:[%s1426_s14 + $0x88] sm:$0xff]  ;;  %v1183_v41 = vld [vmem:[%s1426_s14 + $0x80] sm:$0xff] }
  0x2b   : > { %617 = vmatpush.bf16.msra.mxu2 %v1188_v11  ;;  %v1193_v36 = vld [vmem:[%s1426_s14 + $0xc8] sm:$0xff]  ;;  %v1192_v44 = vld [vmem:[%s1426_s14 + $0xc0] sm:$0xff] }
  0x2c   : > { %713 = vmatpush.bf16.msra.mxu3 %v1197_v12  ;;  %v364_v45 = vld [vmem:[%s1400_s12] sm:$0x3] }
  0x2d   : > { %437 = vmatpush.bf16.msra.mxu0 %v1169_v13  ;;  %v449_v46 = vld [vmem:[%s1405_s15] sm:$0x3] }
  0x2e   : > { %522 = vmatpush.bf16.msra.mxu1 %v1178_v14  ;;  %v385_v49 = vld [vmem:[#allocation2] sm:$0xf] }
  0x2f   : > { %618 = vmatpush.bf16.msra.mxu2 %v1187_v15 }
  0x30   : > { %714 = vmatpush.bf16.msra.mxu3 %v1196_v17 }
  0x31   : > { %438 = vmatpush.bf16.msra.mxu0 %v1168_v19 }
  0x32   : > { %523 = vmatpush.bf16.msra.mxu1 %v1177_v20 }
  0x33   : > { %619 = vmatpush.bf16.msra.mxu2 %v1186_v22 }
  0x34   : > { %715 = vmatpush.bf16.msra.mxu3 %v1195_v24 }
  0x35   : > { %439 = vmatpush.bf16.msra.mxu0 %v1167_v25 }
  0x36   : > { %524 = vmatpush.bf16.msra.mxu1 %v1176_v26 }
  0x37   : > { %620 = vmatpush.bf16.msra.mxu2 %v1185_v28 }
  0x38   : > { %716 = vmatpush.bf16.msra.mxu3 %v1194_v30 }
  0x39   : > { %440 = vmatpush.bf16.msra.mxu0 %v1166_v31 }
  0x3a   : > { %525 = vmatpush.bf16.msra.mxu1 %v1175_v32 }
  0x3b   : > { %621 = vmatpush.bf16.msra.mxu2 %v1184_v34 }
  0x3c   : > { %717 = vmatpush.bf16.msra.mxu3 %v1193_v36 }
  0x3d   : > { %441 = vmatpush.bf16.msra.mxu0 %v1165_v37 }
  0x3e   : > { %526 = vmatpush.bf16.msra.mxu1 %v1174_v38 }
  0x3f   : > { %622 = vmatpush.bf16.msra.mxu2 %v1183_v41 }
  0x40   : > { %718 = vmatpush.bf16.msra.mxu3 %v1192_v44  ;;  %442 = vmatmul.bf16.vlgmr.msra.gmra.mxu0 %v364_v45 }
  0x41   : > { %527 = vmatmul.bf16.vlgmr.msra.gmra.mxu1 %v449_v46 }
  0x42   : > { %623 = vmatmul.bf16.vlgmr.msra.gmra.mxu2 %v565_v47 }
  0x43   : > { %719 = vmatmul.bf16.vlgmr.msra.gmra.mxu3 %v661_v48 }
  0xbd   : > { %v443_v50 = vpop.f32.mrf.mxu0 }
  0xbe   : > { %v528_v51 = vpop.f32.mrf.mxu1  ;;  %v447_v52 = vadd.f32 %v443_v50, %v385_v49 }
  0xc0   : > { %448 = vst [vmem:[#allocation2] sm:$0xf] %v447_v52 }
  0xc5   : > { %v624_v53 = vpop.f32.mrf.mxu2  ;;  %v445_v54 = vpop.f32.mrf.mxu0 }
  0xc6   : > { %v530_v55 = vpop.f32.mrf.mxu1  ;;  %v720_v56 = vpop.f32.mrf.mxu3 }
  0xc7   : > { %v470_v57 = vld [vmem:[#allocation2] sm:$0xf] }
  0xc8   : > { %v532_v58 = vadd.f32 %v528_v51, %v470_v57 }
  0xca   : > { %533 = vst [vmem:[#allocation2] sm:$0xf] %v532_v58 }
  0xcd   : > { %v626_v59 = vpop.f32.mrf.mxu2 }
  0xce   : > { %v722_v60 = vpop.f32.mrf.mxu3 }
  0xd1   : > { %v555_v61 = vld [vmem:[#allocation2] sm:$0xf] }
  0xd2   : > { %v628_v62 = vadd.f32 %v624_v53, %v555_v61 }
  0xd4   : > { %629 = vst [vmem:[#allocation2] sm:$0xf] %v628_v62 }
  0xda   : > { %729 = sbr.rel (%p1160_p10) target bundleno = 246 (0xf6), region = 40 }
  0xdb   : > { %v651_v63 = vld [vmem:[#allocation2] sm:$0xf] }
  0xdc   : > { %v724_v0 = vadd.f32 %v720_v56, %v651_v63 }
  0xde   : > { %725 = vst [vmem:[#allocation2] sm:$0xf] %v724_v0 }
  0xdf   : > { %vm731_vm0 = vcmask 1043456  }
  0xe5   : > { %v730_v1 = vld [vmem:[#allocation2] sm:$0xf] }
  0xe6   : > { %v732_v2 = vsel %vm731_vm0, %v730_v1, 0.0  ;;  %v740_v3 = vmul.f32 %v730_v1, %v730_v1  ;;  %v749_v4 = vpack.c.bf16 %v730_v1, %v730_v1 }
  0xe7   : > { %v733_v5 = vrot.slane %v732_v2, 4 }
  0xe8   : > { %v741_v6 = vsel %vm731_vm0, %v740_v3, 0.0  ;;  %750 = vst [vmem:[%s1415_s30] sm:$0x3] %v749_v4 }
  0xe9   : > { %v734_v7 = vadd.f32 %v733_v5, %v732_v2  ;;  %v742_v8 = vrot.slane %v741_v6, 4 }
  0xeb   : > { %v735_v9 = vrot.slane %v734_v7, 2  ;;  %v743_v10 = vadd.f32 %v742_v8, %v741_v6 }
  0xed   : > { %v736_v11 = vadd.f32 %v735_v9, %v734_v7  ;;  %v744_v12 = vrot.slane %v743_v10, 2 }
  0xef   : > { %v737_v13 = vrot.slane %v736_v11, 1  ;;  %v745_v14 = vadd.f32 %v744_v12, %v743_v10 }
  0xf1   : > { %v738_v15 = vadd.f32 %v737_v13, %v736_v11  ;;  %v746_v16 = vrot.slane %v745_v14, 1 }
  0xf3   : > { %739 = vst [vmem:[%s351_s28] sm:$0x1] %v738_v15  ;;  %v747_v17 = vadd.f32 %v746_v16, %v745_v14 }
  0xf5   : > { %748 = vst [vmem:[%s358_s10] sm:$0x1] %v747_v17 }
  0xf6 PF: > { %s16_s24 = sadd.s32 1, %s1312_s24   ;;  %s1503_s18 = smov %s1300_s21 }
  0xf7   : > { %p13_p11 = scmp.ge.s32.totalorder %s16_s24, 34   ;;  %s1504_s19 = smov %s1304_s22 }
  0xf8   : > { %s1505_s20 = smov %s1308_s23  ;;  %s1506_s21 = smov %s1510_s25 }
  0xf9   : > { %s1507_s22 = smov %s1514_s26  ;;  %s1508_s23 = smov %s1518_s27 }
  0xfa   :  { %15 = sbr.rel (!%p13_p11) target bundleno = 4 (0x4), region = 101 }

// kernel: _lambda_.14
= control target key start
LH: loop header
LB: loop body
LE: loop exit
PB: predicated region body
PF: predicated region fallthrough
CT: control target
= control target key end

     0   :  { %s421_s12 = smov 0   ;;  %s423_s13 = smov 0   ;;  %s460_s0 = inlined_call_operand.vmem [shape: bf16[2,3,3,128], index: 0, kind: input, shape index: {}]   ;;  %s461_s1 = inlined_call_operand.vmem [shape: f32[1,1,1,128], index: 1, kind: input, shape index: {}]   ;;  %s462_s2 = inlined_call_operand.vmem [shape: f32[1,1,1,128], index: 2, kind: input, shape index: {}]   ;;  %s463_s3 = inlined_call_operand.vmem [shape: bf16[2,3,3,128], index: 3, kind: output, shape index: {}]  }
   0x1   :  { %s425_s14 = smov 0  }
   0x2 LB: > { %s25_s15 = sadd.s32 1, %s395_s13  ;;  %p345_p0 = scmp.ge.s32.totalorder %s399_s14, 1  ;;  %s399_s14 = sphi %s425_s14, %s13_s14   ;;  %s395_s13 = sphi %s423_s13, %s465_s13   ;;  %s391_s12 = sphi %s421_s12, %s464_s12  }
   0x3   : > { %p27_p1 = scmp.ge.s32.totalorder %s25_s15, 2  ;;  %p158_p2 = scmp.lt.s32.totalorder %s399_s14, 3 }
   0x5   : > { %s467_s15 = smov (%p27_p1, %s25_s15), 0  ;;  %p159_p3 = pnand %p345_p0, %p158_p2 }
   0x6   : > { %p191_p4 = scmp.lt.s32.totalorder (!%p159_p3), %s391_s12, 1 }
   0x7   : > { %162 = sbr.rel (%p159_p3) target bundleno = 32 (0x20), region = 32 }
   0xc   : > { %s469_s12 = smov (!%p191_p4, %s391_s12), 1  ;;  %v375_v0 = vld [vmem:[%s461_s1] ss:$0 sm:$0xff]  ;;  %vm242_vm0 = vcmask 1041408   ;;  %vm243_vm1 = vsmask.f32 1280 }
   0xd   : > { %s350_s16 = smul.u32 6, %s469_s12  ;;  %v376_v5 = vld [vmem:[%s462_s2] ss:$0 sm:$0xff]  ;;  %vm244_vm5 = vmand %vm242_vm0, %vm243_vm1 }
   0xf   : > { %s198_s19 = scalar_lea.vmem %s460_s0, %s350_s16  ;;  %s208_s26 = scalar_lea.vmem %s463_s3, %s350_s16 }
  0x10   : > { %v210_v1 = vld [vmem:[%s198_s19] sm:$0x3]  ;;  %v211_v2 = vld [vmem:[%s198_s19 + $0x2] sm:$0x3]  ;;  %v212_v3 = vld [vmem:[%s198_s19 + $0x4] sm:$0x3] }
  0x11   : > { %v213_v4 = vunpack.c.l.bf16 %v210_v1  ;;  %v214_v6 = vunpack.c.l.bf16 %v211_v2  ;;  %v215_v7 = vunpack.c.l.bf16 %v212_v3  ;;  %v245_v18 = vld [vmem:[%s208_s26] sm:$0x3]  ;;  %v248_v20 = vld [vmem:[%s208_s26 + $0x2] sm:$0x3]  ;;  %v251_v24 = vld [vmem:[%s208_s26 + $0x4] sm:$0x3] }
  0x13   : > { %v220_v8 = vmul.f32 %v375_v0, %v213_v4  ;;  %v221_v9 = vmul.f32 %v375_v0, %v214_v6  ;;  %v222_v10 = vmul.f32 %v375_v0, %v215_v7 }
  0x15   : > { %v227_v11 = vadd.f32 %v376_v5, %v220_v8  ;;  %v228_v12 = vadd.f32 %v376_v5, %v221_v9  ;;  %v229_v13 = vadd.f32 %v376_v5, %v222_v10 }
  0x17   : > { %vm230_vm2 = vcmp.ge.f32.partialorder %v227_v11, 0.0  ;;  %v233_v14 = vmul.f32 0.2, %v227_v11  ;;  %vm231_vm3 = vcmp.ge.f32.partialorder %v228_v12, 0.0  ;;  %v234_v15 = vmul.f32 0.2, %v228_v12 }
  0x18   : > { %vm232_vm4 = vcmp.ge.f32.partialorder %v229_v13, 0.0  ;;  %v235_v16 = vmul.f32 0.2, %v229_v13 }
  0x19   : > { %v236_v17 = vsel %vm230_vm2, %v227_v11, %v233_v14  ;;  %v237_v19 = vsel %vm231_vm3, %v228_v12, %v234_v15 }
  0x1a   : > { %v239_v21 = vpack.c.bf16 %v236_v17, %v236_v17  ;;  %v240_v22 = vpack.c.bf16 %v237_v19, %v237_v19  ;;  %v238_v23 = vsel %vm232_vm4, %v229_v13, %v235_v16 }
  0x1b   : > { %v241_v25 = vpack.c.bf16 %v238_v23, %v238_v23 }
  0x1c   : > { %v246_v26 = vsel %vm244_vm5, %v239_v21, %v245_v18  ;;  %v249_v27 = vsel %vm244_vm5, %v240_v22, %v248_v20 }
  0x1d   : > { %247 = vst [vmem:[%s208_s26] sm:$0x3] %v246_v26  ;;  %v252_v28 = vsel %vm244_vm5, %v241_v25, %v251_v24 }
  0x1e   : > { %250 = vst [vmem:[%s208_s26 + $0x2] sm:$0x3] %v249_v27 }
  0x1f   : > { %253 = vst [vmem:[%s208_s26 + $0x4] sm:$0x3] %v252_v28 }
  0x20 PF: > { %s13_s14 = sadd.s32 1, %s399_s14   ;;  %s464_s12 = smov %s395_s13 }
  0x21   : > { %p10_p5 = scmp.ge.s32.totalorder %s13_s14, 4   ;;  %s465_s13 = smov %s467_s15 }
  0x23   :  { %12 = sbr.rel (!%p10_p5) target bundleno = 2 (0x2), region = 62 }

// kernel: _lambda_.13
= control target key start
LH: loop header
LB: loop body
LE: loop exit
PB: predicated region body
PF: predicated region fallthrough
CT: control target
= control target key end

     0   :  { %s1245_s15 = smov 0   ;;  %s1247_s16 = smov 0   ;;  %s1388_s0 = inlined_call_operand.vmem [shape: bf16[2,6,6,128], index: 0, kind: input, shape index: {}]   ;;  %s1389_s1 = inlined_call_operand.vmem [shape: bf16[16,128,128], index: 1, kind: input, shape index: {}]   ;;  %s1390_s2 = inlined_call_operand.vmem [shape: bf16[2,3,3,128], index: 2, kind: output, shape index: {0}]   ;;  %s1391_s3 = inlined_call_operand.vmem [shape: f32[2,3,1,128], index: 3, kind: output, shape index: {1}]   ;;  %s1392_s4 = inlined_call_operand.vmem [shape: f32[2,3,1,128], index: 4, kind: output, shape index: {2}]  }
   0x1   :  { %s1249_s17 = smov 0   ;;  %s1251_s18 = smov 0  }
   0x2   :  { %s1253_s19 = smov 0   ;;  %s1255_s20 = smov 0  }
   0x3   :  { %s1257_s21 = smov 0  }
   0x4 LB: > { %s27_s22 = sadd.s32 1, %s1205_s18  ;;  %s30_s23 = sadd.s32 1, %s1209_s19  ;;  %s1217_s21 = sphi %s1257_s21, %s15_s21   ;;  %s1213_s20 = sphi %s1255_s20, %s1398_s20   ;;  %s1209_s19 = sphi %s1253_s19, %s1397_s19   ;;  %s1205_s18 = sphi %s1251_s18, %s1396_s18   ;;  %s1201_s17 = sphi %s1249_s17, %s1395_s17   ;;  %s1197_s16 = sphi %s1247_s16, %s1394_s16   ;;  %s1193_s15 = sphi %s1245_s15, %s1393_s15  }
   0x5   : > { %p28_p0 = scmp.ge.s32.totalorder %s27_s22, 4  ;;  %p875_p1 = scmp.ge.s32.totalorder %s1217_s21, 1 }
   0x6   : > { %p201_p2 = scmp.lt.s32.totalorder %s1217_s21, 25  ;;  %s34_s24 = sadd.s32 1, %s1213_s20 }
   0x7   : > { %s1400_s22 = smov (%p28_p0, %s27_s22), 0  ;;  %s1402_s23 = smov (!%p28_p0, %s30_s23), %s1209_s19 }
   0x8   : > { %p202_p3 = pnand %p875_p1, %p201_p2  ;;  %p32_p4 = scmp.ge.s32.totalorder %s1402_s23, 3 }
   0x9   : > { %s248_s25 = sadd.s32 (!%p202_p3), %s1193_s15, %s1197_s16  ;;  %p249_p6 = scmp.lt.s32.totalorder (!%p202_p3), %s1201_s17, 1 }
   0xa   : > { %s1404_s23 = smov (%p32_p4, %s1402_s23), 0  ;;  %s1406_s24 = smov (!%p32_p4, %s34_s24), %s1213_s20 }
   0xb   : > { %p36_p5 = scmp.ge.s32.totalorder %s1406_s24, 2  ;;  %205 = sbr.rel (%p202_p3) target bundleno = 242 (0xf2), region = 28 }
   0xc   : > { %p251_p7 = scmp.lt.s32.totalorder (!%p202_p3), %s248_s25, 5  ;;  %p260_p8 = scmp.lt.s32.totalorder (!%p202_p3), %s1197_s16, 2 }
   0xd   : > { %s1408_s24 = smov (%p36_p5, %s1406_s24), 0  ;;  %p878_p9 = scmp.ne.s32.totalorder (!%p202_p3), %s1193_s15, 0 }
  0x10   : > { %s1410_s17 = smov (!%p249_p6, %s1201_s17), 1  ;;  %s1412_s25 = smov (!%p251_p7, %s248_s25), 5 }
  0x11   : > { %s1104_s26 = smul.u32 6, %s1410_s17  ;;  %s1414_s16 = smov (!%p260_p8, %s1197_s16), 2 }
  0x12   : > { %s1105_s28 = smul.u32 3, %s1410_s17 }
  0x13   : > { %s254_s27 = sadd.s32 %s1104_s26, %s1412_s25  ;;  %283 = sbr.rel (%p878_p9) target bundleno = 26 (0x1a), region = 32 }
  0x14   : > { %s876_s29 = sshll.u32 %s254_s27, 2  ;;  %s1295_s7 = sadd.s32 %s1105_s28, %s1414_s16 }
  0x15   : > { %s1293_s6 = scalar_lea.vmem %s1388_s0, %s876_s29  ;;  %s877_s8 = sshll.u32 %s1295_s7, 1 }
  0x16   : > { %s272_s11 = scalar_lea.vmem %s1391_s3, %s1295_s7  ;;  %s1305_s14 = scalar_lea.vmem %s1390_s2, %s877_s8 }
  0x17   : > { %s279_s26 = scalar_lea.vmem %s1392_s4, %s1295_s7 }
  0x18   : > { %v1219_v0 = vmov 0.0  }
  0x19   : > { %284 = vst [vmem:[#allocation2] sm:$0x7] %v1219_v0 }
  0x1a PF: > { %s1068_s16 = sshll.u32 %s1193_s15, 8  ;;  %v370_v15 = vld [vmem:[%s1293_s6] sm:$0x3]  ;;  %p1064_p10 = scmp.ne.s32.totalorder %s1193_s15, 3 }
  0x1b   : > { %s1316_s29 = scalar_lea.vmem %s1389_s1, %s1068_s16  ;;  %v556_v18 = vld [vmem:[%s1293_s6] sm:$0x6]  ;;  %v393_v19 = vunpack.c.l.b16 %v370_v15 }
  0x1c   : > { %v1076_v1 = vld [vmem:[%s1316_s29 + $0x38] sm:$0xff]  ;;  %v1075_v4 = vld [vmem:[%s1316_s29 + $0x30] sm:$0xff]  ;;  %v1074_v9 = vld [vmem:[%s1316_s29 + $0x28] sm:$0xff]  ;;  %v579_v23 = vunpack.c.l.b16 %v556_v18 }
  0x1d   : > { %v1085_v2 = vld [vmem:[%s1316_s29 + $0x78] sm:$0xff]  ;;  %355 = vmatpush.bf16.msra.mxu0 %v1076_v1  ;;  %v1084_v5 = vld [vmem:[%s1316_s29 + $0x70] sm:$0xff]  ;;  %v1083_v10 = vld [vmem:[%s1316_s29 + $0x68] sm:$0xff]  ;;  %v394_v25 = vpack.c.b16 %v393_v19, %v393_v19 }
  0x1e   : > { %v1094_v3 = vld [vmem:[%s1316_s29 + $0xb8] sm:$0xff]  ;;  %451 = vmatpush.bf16.msra.mxu1 %v1085_v2  ;;  %v1093_v7 = vld [vmem:[%s1316_s29 + $0xb0] sm:$0xff]  ;;  %v1092_v11 = vld [vmem:[%s1316_s29 + $0xa8] sm:$0xff]  ;;  %v580_v30 = vpack.c.b16 %v579_v23, %v579_v23 }
  0x1f   : > { %v1103_v6 = vld [vmem:[%s1316_s29 + $0xf8] sm:$0xff]  ;;  %541 = vmatpush.bf16.msra.mxu2 %v1094_v3  ;;  %v1102_v8 = vld [vmem:[%s1316_s29 + $0xf0] sm:$0xff]  ;;  %v1101_v12 = vld [vmem:[%s1316_s29 + $0xe8] sm:$0xff]  ;;  %v398_v32 = vshll.u32 %v394_v25, 16  ;;  %v396_v40 = vshrl.u32 %v394_v25, 16 }
  0x20   : > { %638 = vmatpush.bf16.msra.mxu3 %v1103_v6  ;;  %v1073_v13 = vld [vmem:[%s1316_s29 + $0x20] sm:$0xff]  ;;  %v1072_v20 = vld [vmem:[%s1316_s29 + $0x18] sm:$0xff]  ;;  %v1071_v26 = vld [vmem:[%s1316_s29 + $0x10] sm:$0xff]  ;;  %v582_v37 = vshrl.u32 %v580_v30, 16  ;;  %v585_v38 = vshll.u32 %v580_v30, 16 }
  0x21   : > { %356 = vmatpush.bf16.msra.mxu0 %v1075_v4  ;;  %v1082_v14 = vld [vmem:[%s1316_s29 + $0x60] sm:$0xff]  ;;  %v1081_v21 = vld [vmem:[%s1316_s29 + $0x58] sm:$0xff]  ;;  %v1080_v27 = vld [vmem:[%s1316_s29 + $0x50] sm:$0xff]  ;;  %v400_v41 = vrot.slane %v398_v32, 1 }
  0x22   : > { %452 = vmatpush.bf16.msra.mxu1 %v1084_v5  ;;  %v1091_v16 = vld [vmem:[%s1316_s29 + $0xa0] sm:$0xff]  ;;  %v1090_v22 = vld [vmem:[%s1316_s29 + $0x98] sm:$0xff]  ;;  %v1089_v28 = vld [vmem:[%s1316_s29 + $0x90] sm:$0xff]  ;;  %v584_v46 = vrot.slane %v582_v37, 1  ;;  %v587_v47 = vrot.slane %v585_v38, 2 }
  0x23   : > { %542 = vmatpush.bf16.msra.mxu2 %v1093_v7  ;;  %v1100_v17 = vld [vmem:[%s1316_s29 + $0xe0] sm:$0xff]  ;;  %v1099_v24 = vld [vmem:[%s1316_s29 + $0xd8] sm:$0xff]  ;;  %v1098_v31 = vld [vmem:[%s1316_s29 + $0xd0] sm:$0xff]  ;;  %v401_v49 = vor.u32 %v400_v41, %v396_v40 }
  0x24   : > { %639 = vmatpush.bf16.msra.mxu3 %v1102_v8  ;;  %v466_v29 = vld [vmem:[%s1293_s6] sm:$0x6]  ;;  %v1070_v33 = vld [vmem:[%s1316_s29 + $0x8] sm:$0xff]  ;;  %v588_v52 = vor.u32 %v587_v47, %v584_v46 }
  0x25   : > { %357 = vmatpush.bf16.msra.mxu0 %v1074_v9  ;;  %v1079_v34 = vld [vmem:[%s1316_s29 + $0x48] sm:$0xff]  ;;  %v489_v35 = vunpack.c.l.b16 %v466_v29  ;;  %v1069_v42 = vld [vmem:[%s1316_s29] sm:$0xff] }
  0x26   : > { %453 = vmatpush.bf16.msra.mxu1 %v1083_v10  ;;  %v1088_v36 = vld [vmem:[%s1316_s29 + $0x88] sm:$0xff]  ;;  %v1078_v43 = vld [vmem:[%s1316_s29 + $0x40] sm:$0xff] }
  0x27   : > { %543 = vmatpush.bf16.msra.mxu2 %v1092_v11  ;;  %v1097_v39 = vld [vmem:[%s1316_s29 + $0xc8] sm:$0xff]  ;;  %v490_v44 = vpack.c.b16 %v489_v35, %v489_v35  ;;  %v1087_v45 = vld [vmem:[%s1316_s29 + $0x80] sm:$0xff] }
  0x28   : > { %640 = vmatpush.bf16.msra.mxu3 %v1101_v12  ;;  %v1096_v48 = vld [vmem:[%s1316_s29 + $0xc0] sm:$0xff] }
  0x29   : > { %358 = vmatpush.bf16.msra.mxu0 %v1073_v13  ;;  %v285_v50 = vld [vmem:[%s1293_s6] sm:$0x3]  ;;  %v491_v51 = vrot.slane %v490_v44, 1 }
  0x2a   : > { %454 = vmatpush.bf16.msra.mxu1 %v1082_v14  ;;  %v306_v53 = vld [vmem:[#allocation2] sm:$0x7] }
  0x2b   : > { %544 = vmatpush.bf16.msra.mxu2 %v1091_v16 }
  0x2c   : > { %641 = vmatpush.bf16.msra.mxu3 %v1100_v17 }
  0x2d   : > { %359 = vmatpush.bf16.msra.mxu0 %v1072_v20 }
  0x2e   : > { %455 = vmatpush.bf16.msra.mxu1 %v1081_v21 }
  0x2f   : > { %545 = vmatpush.bf16.msra.mxu2 %v1090_v22 }
  0x30   : > { %642 = vmatpush.bf16.msra.mxu3 %v1099_v24 }
  0x31   : > { %360 = vmatpush.bf16.msra.mxu0 %v1071_v26 }
  0x32   : > { %456 = vmatpush.bf16.msra.mxu1 %v1080_v27 }
  0x33   : > { %546 = vmatpush.bf16.msra.mxu2 %v1089_v28 }
  0x34   : > { %643 = vmatpush.bf16.msra.mxu3 %v1098_v31 }
  0x35   : > { %361 = vmatpush.bf16.msra.mxu0 %v1070_v33 }
  0x36   : > { %457 = vmatpush.bf16.msra.mxu1 %v1079_v34 }
  0x37   : > { %547 = vmatpush.bf16.msra.mxu2 %v1088_v36 }
  0x38   : > { %644 = vmatpush.bf16.msra.mxu3 %v1097_v39 }
  0x39   : > { %362 = vmatpush.bf16.msra.mxu0 %v1069_v42 }
  0x3a   : > { %458 = vmatpush.bf16.msra.mxu1 %v1078_v43 }
  0x3b   : > { %548 = vmatpush.bf16.msra.mxu2 %v1087_v45 }
  0x3c   : > { %645 = vmatpush.bf16.msra.mxu3 %v1096_v48  ;;  %363 = vmatmul.bf16.vlgmr.msra.gmra.mxu0 %v285_v50 }
  0x3d   : > { %459 = vmatmul.bf16.vlgmr.msra.gmra.mxu1 %v401_v49 }
  0x3e   : > { %549 = vmatmul.bf16.vlgmr.msra.gmra.mxu2 %v491_v51 }
  0x3f   : > { %646 = vmatmul.bf16.vlgmr.msra.gmra.mxu3 %v588_v52 }
  0xb9   : > { %v364_v54 = vpop.f32.mrf.mxu0 }
  0xba   : > { %v460_v55 = vpop.f32.mrf.mxu1  ;;  %v368_v56 = vadd.f32 %v364_v54, %v306_v53 }
  0xbc   : > { %369 = vst [vmem:[#allocation2] sm:$0x7] %v368_v56 }
  0xc1   : > { %v550_v57 = vpop.f32.mrf.mxu2  ;;  %v366_v58 = vpop.f32.mrf.mxu0 }
  0xc2   : > { %v462_v59 = vpop.f32.mrf.mxu1  ;;  %v647_v60 = vpop.f32.mrf.mxu3 }
  0xc3   : > { %v391_v61 = vld [vmem:[#allocation2] sm:$0x7] }
  0xc4   : > { %v464_v62 = vadd.f32 %v460_v55, %v391_v61 }
  0xc6   : > { %465 = vst [vmem:[#allocation2] sm:$0x7] %v464_v62 }
  0xc9   : > { %v552_v63 = vpop.f32.mrf.mxu2 }
  0xca   : > { %v649_v0 = vpop.f32.mrf.mxu3 }
  0xcd   : > { %v487_v1 = vld [vmem:[#allocation2] sm:$0x7] }
  0xce   : > { %v554_v2 = vadd.f32 %v550_v57, %v487_v1 }
  0xd0   : > { %555 = vst [vmem:[#allocation2] sm:$0x7] %v554_v2 }
  0xd6   : > { %656 = sbr.rel (%p1064_p10) target bundleno = 242 (0xf2), region = 36 }
  0xd7   : > { %v577_v3 = vld [vmem:[#allocation2] sm:$0x7] }
  0xd8   : > { %v651_v4 = vadd.f32 %v647_v60, %v577_v3 }
  0xda   : > { %652 = vst [vmem:[#allocation2] sm:$0x7] %v651_v4 }
  0xdb   : > { %vm658_vm0 = vcmask 1042432   ;;  %vm677_vm1 = vcmask 1041408   ;;  %vm678_vm2 = vsmask.f32 1280  ;;  %v680_v9 = vld [vmem:[%s1305_s14] sm:$0x3] }
  0xdc   : > { %vm679_vm3 = vmand %vm677_vm1, %vm678_vm2 }
  0xe1   : > { %v657_v5 = vld [vmem:[#allocation2] sm:$0x7] }
  0xe2   : > { %v659_v6 = vsel %vm658_vm0, %v657_v5, 0.0  ;;  %v667_v7 = vmul.f32 %v657_v5, %v657_v5  ;;  %v676_v8 = vpack.c.bf16 %v657_v5, %v657_v5 }
  0xe3   : > { %v660_v10 = vrot.slane %v659_v6, 4 }
  0xe4   : > { %v668_v11 = vsel %vm658_vm0, %v667_v7, 0.0  ;;  %v681_v12 = vsel %vm679_vm3, %v676_v8, %v680_v9 }
  0xe5   : > { %v661_v13 = vadd.f32 %v660_v10, %v659_v6  ;;  %v669_v14 = vrot.slane %v668_v11, 4  ;;  %682 = vst [vmem:[%s1305_s14] sm:$0x3] %v681_v12 }
  0xe7   : > { %v662_v15 = vrot.slane %v661_v13, 2  ;;  %v670_v16 = vadd.f32 %v669_v14, %v668_v11 }
  0xe9   : > { %v663_v17 = vadd.f32 %v662_v15, %v661_v13  ;;  %v671_v18 = vrot.slane %v670_v16, 2 }
  0xeb   : > { %v664_v19 = vrot.slane %v663_v17, 1  ;;  %v672_v20 = vadd.f32 %v671_v18, %v670_v16 }
  0xed   : > { %v665_v21 = vadd.f32 %v664_v19, %v663_v17  ;;  %v673_v22 = vrot.slane %v672_v20, 1 }
  0xef   : > { %666 = vst [vmem:[%s272_s11] sm:$0x1] %v665_v21  ;;  %v674_v23 = vadd.f32 %v673_v22, %v672_v20 }
  0xf1   : > { %675 = vst [vmem:[%s279_s26] sm:$0x1] %v674_v23 }
  0xf2 PF: > { %s15_s21 = sadd.s32 1, %s1217_s21   ;;  %s1393_s15 = smov %s1205_s18 }
  0xf3   : > { %p12_p11 = scmp.ge.s32.totalorder %s15_s21, 26   ;;  %s1394_s16 = smov %s1209_s19 }
  0xf4   : > { %s1395_s17 = smov %s1213_s20  ;;  %s1396_s18 = smov %s1400_s22 }
  0xf5   : > { %s1397_s19 = smov %s1404_s23  ;;  %s1398_s20 = smov %s1408_s24 }
  0xf6   :  { %14 = sbr.rel (!%p12_p11) target bundleno = 4 (0x4), region = 94 }

// kernel: _lambda_.15
= control target key start
LH: loop header
LB: loop body
LE: loop exit
PB: predicated region body
PF: predicated region fallthrough
CT: control target
= control target key end

     0   :  { %s1076_s12 = smov 0   ;;  %s1078_s13 = smov 0   ;;  %s1200_s0 = inlined_call_operand.vmem [shape: bf16[2,5,5,128], index: 0, kind: input, shape index: {}]   ;;  %s1201_s1 = inlined_call_operand.vmem [shape: bf16[16,128,128], index: 1, kind: input, shape index: {}]   ;;  %s1202_s2 = inlined_call_operand.vmem [shape: f32[1,128], index: 2, kind: input, shape index: {}]   ;;  %s1203_s3 = inlined_call_operand.vmem [shape: f32[2,2,2,128], index: 3, kind: output, shape index: {}]  }
   0x1   :  { %s1080_s14 = smov 0   ;;  %s1082_s15 = smov 0  }
   0x2   :  { %s1084_s16 = smov 0   ;;  %s1086_s17 = smov 0  }
   0x3   :  { %s1088_s18 = smov 0  }
   0x4 LB: > { %s25_s19 = sadd.s32 1, %s1041_s15  ;;  %s28_s20 = sadd.s32 1, %s1045_s16  ;;  %s1053_s18 = sphi %s1088_s18, %s13_s18   ;;  %s1049_s17 = sphi %s1086_s17, %s1209_s17   ;;  %s1045_s16 = sphi %s1084_s16, %s1208_s16   ;;  %s1041_s15 = sphi %s1082_s15, %s1207_s15   ;;  %s1037_s14 = sphi %s1080_s14, %s1206_s14   ;;  %s1033_s13 = sphi %s1078_s13, %s1205_s13   ;;  %s1029_s12 = sphi %s1076_s12, %s1204_s12  }
   0x5   : > { %p26_p0 = scmp.ge.s32.totalorder %s25_s19, 4  ;;  %p710_p1 = scmp.ge.s32.totalorder %s1053_s18, 1 }
   0x6   : > { %p167_p2 = scmp.lt.s32.totalorder %s1053_s18, 17  ;;  %s32_s21 = sadd.s32 1, %s1049_s17 }
   0x7   : > { %s1211_s19 = smov (%p26_p0, %s25_s19), 0  ;;  %s1213_s20 = smov (!%p26_p0, %s28_s20), %s1045_s16 }
   0x8   : > { %p168_p3 = pnand %p710_p1, %p167_p2  ;;  %p30_p4 = scmp.ge.s32.totalorder %s1213_s20, 2 }
   0x9   : > { %s198_s22 = sadd.s32 (!%p168_p3), %s1029_s12, %s1033_s13  ;;  %p199_p6 = scmp.lt.s32.totalorder (!%p168_p3), %s1037_s14, 1 }
   0xa   : > { %s1215_s20 = smov (%p30_p4, %s1213_s20), 0  ;;  %s1217_s21 = smov (!%p30_p4, %s32_s21), %s1049_s17 }
   0xb   : > { %p34_p5 = scmp.ge.s32.totalorder %s1217_s21, 2  ;;  %171 = sbr.rel (%p168_p3) target bundleno = 228 (0xe4), region = 32 }
   0xc   : > { %p201_p7 = scmp.lt.s32.totalorder (!%p168_p3), %s198_s22, 4  ;;  %p210_p8 = scmp.lt.s32.totalorder (!%p168_p3), %s1033_s13, 1 }
   0xd   : > { %s1219_s21 = smov (%p34_p5, %s1217_s21), 0  ;;  %p714_p9 = scmp.ne.s32.totalorder (!%p168_p3), %s1029_s12, 0 }
  0x10   : > { %s1221_s14 = smov (!%p199_p6, %s1037_s14), 1  ;;  %s1223_s22 = smov (!%p201_p7, %s198_s22), 4 }
  0x11   : > { %s940_s23 = smul.u32 5, %s1221_s14  ;;  %s712_s24 = sshll.u32 %s1221_s14, 1 }
  0x12   : > { %s1225_s13 = smov (!%p210_p8, %s1033_s13), 1  ;;  %219 = sbr.rel (%p714_p9) target bundleno = 25 (0x19), region = 36 }
  0x13   : > { %s204_s25 = sadd.s32 %s940_s23, %s1223_s22  ;;  %s213_s27 = sadd.s32 %s712_s24, %s1225_s13 }
  0x14   : > { %s711_s26 = sshll.u32 %s204_s25, 2  ;;  %s713_s4 = sshll.u32 %s213_s27, 1 }
  0x15   : > { %s1124_s30 = scalar_lea.vmem %s1200_s0, %s711_s26  ;;  %s1129_s7 = scalar_lea.vmem %s1203_s3, %s713_s4 }
  0x17   : > { %v1055_v0 = vmov 0.0  }
  0x18   : > { %220 = vst [vmem:[#allocation2] sm:$0x3] %v1055_v0 }
  0x19 PF: > { %s904_s8 = sshll.u32 %s1029_s12, 8  ;;  %v306_v15 = vld [vmem:[%s1124_s30] sm:$0x3]  ;;  %p900_p10 = scmp.ne.s32.totalorder %s1029_s12, 3 }
  0x1a   : > { %s1136_s11 = scalar_lea.vmem %s1201_s1, %s904_s8  ;;  %v492_v18 = vld [vmem:[%s1124_s30] sm:$0x6]  ;;  %v329_v19 = vunpack.c.l.b16 %v306_v15  ;;  %v221_v50 = vld [vmem:[%s1124_s30] sm:$0x1] }
  0x1b   : > { %v912_v1 = vld [vmem:[%s1136_s11 + $0x38] sm:$0xff]  ;;  %v911_v4 = vld [vmem:[%s1136_s11 + $0x30] sm:$0xff]  ;;  %v910_v9 = vld [vmem:[%s1136_s11 + $0x28] sm:$0xff]  ;;  %v515_v23 = vunpack.c.l.b16 %v492_v18 }
  0x1c   : > { %v921_v2 = vld [vmem:[%s1136_s11 + $0x78] sm:$0xff]  ;;  %291 = vmatpush.bf16.msra.mxu0 %v912_v1  ;;  %v920_v5 = vld [vmem:[%s1136_s11 + $0x70] sm:$0xff]  ;;  %v919_v10 = vld [vmem:[%s1136_s11 + $0x68] sm:$0xff]  ;;  %v330_v25 = vpack.c.b16 %v329_v19, %v329_v19 }
  0x1d   : > { %v930_v3 = vld [vmem:[%s1136_s11 + $0xb8] sm:$0xff]  ;;  %387 = vmatpush.bf16.msra.mxu1 %v921_v2  ;;  %v929_v7 = vld [vmem:[%s1136_s11 + $0xb0] sm:$0xff]  ;;  %v928_v11 = vld [vmem:[%s1136_s11 + $0xa8] sm:$0xff]  ;;  %v516_v30 = vpack.c.b16 %v515_v23, %v515_v23 }
  0x1e   : > { %v939_v6 = vld [vmem:[%s1136_s11 + $0xf8] sm:$0xff]  ;;  %477 = vmatpush.bf16.msra.mxu2 %v930_v3  ;;  %v938_v8 = vld [vmem:[%s1136_s11 + $0xf0] sm:$0xff]  ;;  %v937_v12 = vld [vmem:[%s1136_s11 + $0xe8] sm:$0xff]  ;;  %v334_v32 = vshll.u32 %v330_v25, 16  ;;  %v332_v40 = vshrl.u32 %v330_v25, 16 }
  0x1f   : > { %574 = vmatpush.bf16.msra.mxu3 %v939_v6  ;;  %v909_v13 = vld [vmem:[%s1136_s11 + $0x20] sm:$0xff]  ;;  %v908_v20 = vld [vmem:[%s1136_s11 + $0x18] sm:$0xff]  ;;  %v907_v26 = vld [vmem:[%s1136_s11 + $0x10] sm:$0xff]  ;;  %v518_v37 = vshrl.u32 %v516_v30, 16  ;;  %v521_v38 = vshll.u32 %v516_v30, 16 }
  0x20   : > { %292 = vmatpush.bf16.msra.mxu0 %v911_v4  ;;  %v918_v14 = vld [vmem:[%s1136_s11 + $0x60] sm:$0xff]  ;;  %v917_v21 = vld [vmem:[%s1136_s11 + $0x58] sm:$0xff]  ;;  %v916_v27 = vld [vmem:[%s1136_s11 + $0x50] sm:$0xff]  ;;  %v336_v41 = vrot.slane %v334_v32, 1 }
  0x21   : > { %388 = vmatpush.bf16.msra.mxu1 %v920_v5  ;;  %v927_v16 = vld [vmem:[%s1136_s11 + $0xa0] sm:$0xff]  ;;  %v926_v22 = vld [vmem:[%s1136_s11 + $0x98] sm:$0xff]  ;;  %v925_v28 = vld [vmem:[%s1136_s11 + $0x90] sm:$0xff]  ;;  %v520_v46 = vrot.slane %v518_v37, 1  ;;  %v523_v47 = vrot.slane %v521_v38, 2 }
  0x22   : > { %478 = vmatpush.bf16.msra.mxu2 %v929_v7  ;;  %v936_v17 = vld [vmem:[%s1136_s11 + $0xe0] sm:$0xff]  ;;  %v935_v24 = vld [vmem:[%s1136_s11 + $0xd8] sm:$0xff]  ;;  %v934_v31 = vld [vmem:[%s1136_s11 + $0xd0] sm:$0xff]  ;;  %v337_v49 = vor.u32 %v336_v41, %v332_v40 }
  0x23   : > { %575 = vmatpush.bf16.msra.mxu3 %v938_v8  ;;  %v402_v29 = vld [vmem:[%s1124_s30] sm:$0x2]  ;;  %v906_v33 = vld [vmem:[%s1136_s11 + $0x8] sm:$0xff]  ;;  %v524_v52 = vor.u32 %v523_v47, %v520_v46 }
  0x24   : > { %293 = vmatpush.bf16.msra.mxu0 %v910_v9  ;;  %v915_v34 = vld [vmem:[%s1136_s11 + $0x48] sm:$0xff]  ;;  %v425_v35 = vunpack.c.l.b16 %v402_v29  ;;  %v905_v42 = vld [vmem:[%s1136_s11] sm:$0xff] }
  0x25   : > { %389 = vmatpush.bf16.msra.mxu1 %v919_v10  ;;  %v924_v36 = vld [vmem:[%s1136_s11 + $0x88] sm:$0xff]  ;;  %v914_v43 = vld [vmem:[%s1136_s11 + $0x40] sm:$0xff] }
  0x26   : > { %479 = vmatpush.bf16.msra.mxu2 %v928_v11  ;;  %v933_v39 = vld [vmem:[%s1136_s11 + $0xc8] sm:$0xff]  ;;  %v426_v44 = vpack.c.b16 %v425_v35, %v425_v35  ;;  %v923_v45 = vld [vmem:[%s1136_s11 + $0x80] sm:$0xff] }
  0x27   : > { %576 = vmatpush.bf16.msra.mxu3 %v937_v12  ;;  %v932_v48 = vld [vmem:[%s1136_s11 + $0xc0] sm:$0xff] }
  0x28   : > { %294 = vmatpush.bf16.msra.mxu0 %v909_v13  ;;  %v427_v51 = vrot.slane %v426_v44, 1  ;;  %v242_v53 = vld [vmem:[#allocation2] sm:$0x3] }
  0x29   : > { %390 = vmatpush.bf16.msra.mxu1 %v918_v14 }
  0x2a   : > { %480 = vmatpush.bf16.msra.mxu2 %v927_v16 }
  0x2b   : > { %577 = vmatpush.bf16.msra.mxu3 %v936_v17 }
  0x2c   : > { %295 = vmatpush.bf16.msra.mxu0 %v908_v20 }
  0x2d   : > { %391 = vmatpush.bf16.msra.mxu1 %v917_v21 }
  0x2e   : > { %481 = vmatpush.bf16.msra.mxu2 %v926_v22 }
  0x2f   : > { %578 = vmatpush.bf16.msra.mxu3 %v935_v24 }
  0x30   : > { %296 = vmatpush.bf16.msra.mxu0 %v907_v26 }
  0x31   : > { %392 = vmatpush.bf16.msra.mxu1 %v916_v27 }
  0x32   : > { %482 = vmatpush.bf16.msra.mxu2 %v925_v28 }
  0x33   : > { %579 = vmatpush.bf16.msra.mxu3 %v934_v31 }
  0x34   : > { %297 = vmatpush.bf16.msra.mxu0 %v906_v33 }
  0x35   : > { %393 = vmatpush.bf16.msra.mxu1 %v915_v34 }
  0x36   : > { %483 = vmatpush.bf16.msra.mxu2 %v924_v36 }
  0x37   : > { %580 = vmatpush.bf16.msra.mxu3 %v933_v39 }
  0x38   : > { %298 = vmatpush.bf16.msra.mxu0 %v905_v42 }
  0x39   : > { %394 = vmatpush.bf16.msra.mxu1 %v914_v43 }
  0x3a   : > { %484 = vmatpush.bf16.msra.mxu2 %v923_v45 }
  0x3b   : > { %581 = vmatpush.bf16.msra.mxu3 %v932_v48  ;;  %299 = vmatmul.bf16.vlgmr.msra.gmra.mxu0 %v221_v50 }
  0x3c   : > { %395 = vmatmul.bf16.vlgmr.msra.gmra.mxu1 %v337_v49 }
  0x3d   : > { %485 = vmatmul.bf16.vlgmr.msra.gmra.mxu2 %v427_v51 }
  0x3e   : > { %582 = vmatmul.bf16.vlgmr.msra.gmra.mxu3 %v524_v52 }
  0xb8   : > { %v300_v54 = vpop.f32.mrf.mxu0 }
  0xb9   : > { %v396_v55 = vpop.f32.mrf.mxu1  ;;  %v304_v56 = vadd.f32 %v300_v54, %v242_v53 }
  0xbb   : > { %305 = vst [vmem:[#allocation2] sm:$0x3] %v304_v56 }
  0xc0   : > { %v486_v57 = vpop.f32.mrf.mxu2  ;;  %v302_v58 = vpop.f32.mrf.mxu0 }
  0xc1   : > { %v398_v59 = vpop.f32.mrf.mxu1  ;;  %v583_v60 = vpop.f32.mrf.mxu3 }
  0xc2   : > { %v327_v61 = vld [vmem:[#allocation2] sm:$0x3] }
  0xc3   : > { %v400_v62 = vadd.f32 %v396_v55, %v327_v61 }
  0xc5   : > { %401 = vst [vmem:[#allocation2] sm:$0x3] %v400_v62 }
  0xc8   : > { %v488_v63 = vpop.f32.mrf.mxu2 }
  0xc9   : > { %v585_v0 = vpop.f32.mrf.mxu3 }
  0xcc   : > { %v423_v1 = vld [vmem:[#allocation2] sm:$0x3] }
  0xcd   : > { %v490_v2 = vadd.f32 %v486_v57, %v423_v1 }
  0xcf   : > { %491 = vst [vmem:[#allocation2] sm:$0x3] %v490_v2 }
  0xd5   : > { %592 = sbr.rel (%p900_p10) target bundleno = 228 (0xe4), region = 40 }
  0xd6   : > { %v513_v3 = vld [vmem:[#allocation2] sm:$0x3] }
  0xd7   : > { %v587_v4 = vadd.f32 %v583_v60, %v513_v3 }
  0xd9   : > { %588 = vst [vmem:[#allocation2] sm:$0x3] %v587_v4 }
  0xda   : > { %v998_v6 = vld [vmem:[%s1202_s2] ss:$0 sm:$0xff] }
  0xe0   : > { %v593_v5 = vld [vmem:[#allocation2] sm:$0x3] }
  0xe1   : > { %v598_v7 = vadd.f32 %v998_v6, %v593_v5 }
  0xe3   : > { %599 = vst [vmem:[%s1129_s7] sm:$0x3] %v598_v7 }
  0xe4 PF: > { %s13_s18 = sadd.s32 1, %s1053_s18   ;;  %s1204_s12 = smov %s1041_s15 }
  0xe5   : > { %p10_p11 = scmp.ge.s32.totalorder %s13_s18, 18   ;;  %s1205_s13 = smov %s1045_s16 }
  0xe6   : > { %s1206_s14 = smov %s1049_s17  ;;  %s1207_s15 = smov %s1211_s19 }
  0xe7   : > { %s1208_s16 = smov %s1215_s20  ;;  %s1209_s17 = smov %s1219_s21 }
  0xe8   :  { %12 = sbr.rel (!%p10_p11) target bundleno = 4 (0x4), region = 74 }

</bundles_post_ra>
